<compile_context>
chip_gen: v5e
topology: v5e:2x2
jax: 0.10.0
libtpu: 0.0.40
codegen_flags: <defaults>
</compile_context>

<pallas_src>
import jax
import jax.numpy as jnp
import numpy as np
from jax.experimental import pallas as pl
from jax.experimental.pallas import tpu as pltpu

EPS = 0.001


def support_encoder_kernel(x_ref, w1_ref, b1_ref, w2_ref, ln_ref, o_ref):
    x = x_ref[...]                                      # (tile_n, d_model) f32
    # proj1 + ReLU: bf16 MXU inputs, f32 accumulate.
    h = jnp.dot(x.astype(jnp.bfloat16), w1_ref[...],
                preferred_element_type=jnp.float32) + b1_ref[...]
    h = jnp.maximum(h, 0.0)
    # proj2 (dropout is identity at inference).
    out = jnp.dot(h.astype(jnp.bfloat16), w2_ref[...],
                  preferred_element_type=jnp.float32) + ln_ref[0:1, :]   # + b2
    # Residual add in f32.
    z = out + x
    # LayerNormalization: matches the custom PyTorch module, i.e. torch.std (unbiased, ddof=1)
    # and eps added to sigma — NOT the usual rsqrt(var + eps).
    d_model = z.shape[-1]
    mu = jnp.mean(z, axis=-1, keepdims=True)
    diff = z - mu
    var = jnp.sum(diff * diff, axis=-1, keepdims=True) * (1.0 / (d_model - 1))
    sigma = jnp.sqrt(var)
    inv = pl.reciprocal(sigma + EPS, approx=True)       # EUP reciprocal, frees VALU slots
    ln = diff * inv
    # Note: rows past N in the partial boundary block flow undefined data through the LN; their
    # stores are masked by Pallas so the visible output is correct (rows are independent).
    o_ref[...] = (ln * ln_ref[1:2, :] + ln_ref[2:3, :]).astype(o_ref.dtype)


def _round_up(v, m):
    return -(-v // m) * m


def _num_tensorcores():
    """Best-effort TensorCore count (2 on v7x, 1 on v5e/v6e)."""
    try:
        info = pltpu.get_tpu_info()
    except Exception:
        return 1
    for attr in ("num_tensorcores", "tensorcore_count", "num_cores", "core_count"):
        v = getattr(info, attr, None)
        if isinstance(v, int) and v > 0:
            return v
    return 1


def prepare_params(w1, b1, w2, b2, gamma, beta):
    """One-time parameter prep (hoisted out of the per-call path).

    Weights are stored pre-transposed as (in, out) so the kernel computes x @ W (== x @ weight.T).
    bf16 weight copies halve resident VMEM / HBM traffic; [b2; gamma; beta] are packed into one
    (3, d_model) operand so the kernel issues a single tiny DMA instead of three.
    """
    d_inner = w1.shape[1]
    w1_bf = w1.astype(jnp.bfloat16)
    w2_bf = w2.astype(jnp.bfloat16)
    b1_2d = b1.reshape(1, d_inner).astype(jnp.float32)
    ln_params = jnp.stack([b2, gamma, beta], axis=0).astype(jnp.float32)
    return w1_bf, b1_2d, w2_bf, ln_params


def support_encoder(x, params, *, tile_n=512):
    # x: (N, d_model); params from prepare_params().
    w1_bf, b1_2d, w2_bf, ln_params = params
    N, d_model = x.shape
    d_inner = w1_bf.shape[1]
    # TODO(synk): d_model == 1 (the PyTorch LayerNormalization self-bypass) is a degenerate case
    # not handled by this kernel; likewise very large d_model/d_inner would need K-tiled weights
    # (and single-buffered resident weight blocks, pipeline_mode=pl.Buffered(1)) for v7x's 64 MiB VMEM.

    num_tc = _num_tensorcores()
    # Large row tile (mem-bound kernel: fewer grid steps, less per-step overhead), multiple of 8.
    tn = min(tile_n, _round_up(max(N, 8), 8))
    if num_tc > 1:
        # v7x only: split rows so every TensorCore gets work, and keep the grid a multiple of the
        # core count (best effort) so the "parallel" axis splits evenly across cores.
        tn = min(tn, max(8, _round_up(pl.cdiv(N, num_tc), 8)))
        steps = pl.cdiv(N, tn)
        if steps % num_tc != 0:
            tn = max(8, _round_up(pl.cdiv(N, _round_up(steps, num_tc)), 8))
    grid = (pl.cdiv(N, tn),)   # partial boundary block handled by Pallas (masked stores)

    cost = pl.CostEstimate(
        flops=4 * N * d_model * d_inner,                       # two matmuls
        transcendentals=2 * N,                                 # sqrt + reciprocal per row
        bytes_accessed=(2 * N * d_model * 4                    # x read + out write (f32)
                        + 2 * d_model * d_inner * 2            # bf16 weights
                        + (d_inner + 3 * d_model) * 4),        # biases / LN params
    )

    return pl.pallas_call(
        support_encoder_kernel,
        out_shape=jax.ShapeDtypeStruct((N, d_model), x.dtype),
        grid_spec=pltpu.PrefetchScalarGridSpec(
            num_scalar_prefetch=0,
            grid=grid,
            in_specs=[
                pl.BlockSpec((tn, d_model), lambda i: (i, 0)),        # x tile
                pl.BlockSpec((d_model, d_inner), lambda i: (0, 0)),   # W1 (VMEM-resident, bf16)
                pl.BlockSpec((1, d_inner), lambda i: (0, 0)),         # b1
                pl.BlockSpec((d_inner, d_model), lambda i: (0, 0)),   # W2 (VMEM-resident, bf16)
                pl.BlockSpec((3, d_model), lambda i: (0, 0)),         # [b2; gamma; beta]
            ],
            out_specs=pl.BlockSpec((tn, d_model), lambda i: (i, 0)),
        ),
        compiler_params=pltpu.CompilerParams(dimension_semantics=("parallel",)),
        cost_estimate=cost,
    )(x, w1_bf, b1_2d, w2_bf, ln_params)


def reference(x, w1, b1, w2, b2, gamma, beta):
    # Pure f32 reference mirroring the PyTorch module (dropout = identity).
    h = jnp.maximum(x @ w1 + b1, 0.0)
    out = h @ w2 + b2
    z = out + x
    mu = jnp.mean(z, axis=-1, keepdims=True)
    diff = z - mu
    var = jnp.sum(diff * diff, axis=-1, keepdims=True) / (z.shape[-1] - 1)
    sigma = jnp.sqrt(var)
    return diff / (sigma + EPS) * gamma + beta


if __name__ == "__main__":
    # N not divisible by the tile and > one tile -> exercises multi-step grid + boundary masking.
    d_model, d_inner, N = 128, 256, 600
    key = jax.random.PRNGKey(0)
    kx, kw1, kb1, kw2, kb2 = jax.random.split(key, 5)

    x = jax.random.normal(kx, (N, d_model), dtype=jnp.float32)

    # Deterministic parameter init (xavier_normal_ for weights, small uniform for biases),
    # stored directly in (in, out) layout (= PyTorch weight.T).
    std1 = float(np.sqrt(2.0 / (d_model + d_inner)))
    std2 = float(np.sqrt(2.0 / (d_inner + d_model)))
    w1 = std1 * jax.random.normal(kw1, (d_model, d_inner), dtype=jnp.float32)
    w2 = std2 * jax.random.normal(kw2, (d_inner, d_model), dtype=jnp.float32)
    b1 = jax.random.uniform(kb1, (d_inner,), dtype=jnp.float32,
                            minval=-1.0 / np.sqrt(d_model), maxval=1.0 / np.sqrt(d_model))
    b2 = jax.random.uniform(kb2, (d_model,), dtype=jnp.float32,
                            minval=-1.0 / np.sqrt(d_inner), maxval=1.0 / np.sqrt(d_inner))
    gamma = jnp.ones((d_model,), dtype=jnp.float32)   # LayerNormalization.a_2
    beta = jnp.zeros((d_model,), dtype=jnp.float32)   # LayerNormalization.b_2

    # TODO(synk): dropout is treated as identity (inference); no Pallas RNG masking needed here.

    params = prepare_params(w1, b1, w2, b2, gamma, beta)   # one-time prep, reused across calls
    y = support_encoder(x, params)
    y = jax.block_until_ready(y)

    # Tolerance accounts for bf16 matmul inputs + approx reciprocal (accumulation stays f32).
    y_ref = reference(x, w1, b1, w2, b2, gamma, beta)
    np.testing.assert_allclose(np.asarray(y), np.asarray(y_ref), rtol=2e-2, atol=2e-2)

    print("KERNEL_OK")
</pallas_src>

<mosaic_0001>
module attributes {stable_mosaic.version = 11 : i64} {
  func.func @support_encoder_kernel(%arg0: i32, %arg1: memref<512x128xf32, #tpu.memory_space<vmem>>, %arg2: memref<128x256xbf16, #tpu.memory_space<vmem>>, %arg3: memref<1x256xf32, #tpu.memory_space<vmem>>, %arg4: memref<256x128xbf16, #tpu.memory_space<vmem>>, %arg5: memref<3x128xf32, #tpu.memory_space<vmem>>, %arg6: memref<512x128xf32, #tpu.memory_space<vmem>>) attributes {dimension_semantics = [#tpu.dimension_semantics<parallel>], iteration_bounds = array<i64: 2>, scalar_prefetch = 0 : i64, scratch_operands = 0 : i64, tpu.core_type = #tpu.core_type<tc>, window_params = [{transform_indices = @transform_0, window_bounds = array<i64: 512, 128>}, {pipeline_mode = #tpu.pipeline_mode<synchronous>, transform_indices = @transform_1, window_bounds = array<i64: 128, 256>}, {pipeline_mode = #tpu.pipeline_mode<synchronous>, transform_indices = @transform_2, window_bounds = array<i64: 1, 256>}, {pipeline_mode = #tpu.pipeline_mode<synchronous>, transform_indices = @transform_3, window_bounds = array<i64: 256, 128>}, {pipeline_mode = #tpu.pipeline_mode<synchronous>, transform_indices = @transform_4, window_bounds = array<i64: 3, 128>}, {transform_indices = @transform_5, window_bounds = array<i64: 512, 128>}]} {
    %c0 = arith.constant 0 : index
    %c0_0 = arith.constant 0 : index
    %0 = vector.load %arg1[%c0, %c0_0] : memref<512x128xf32, #tpu.memory_space<vmem>>, vector<512x128xf32>
    %1 = arith.truncf %0 : vector<512x128xf32> to vector<512x128xbf16>
    %c0_1 = arith.constant 0 : index
    %c0_2 = arith.constant 0 : index
    %2 = vector.load %arg2[%c0_1, %c0_2] : memref<128x256xbf16, #tpu.memory_space<vmem>>, vector<128x256xbf16>
    %cst = arith.constant dense<0.000000e+00> : vector<512x256xf32>
    %3 = tpu.matmul %1, %2, %cst {dimension_numbers = #tpu.dot_dimension_numbers<[1], [0], [0], [1], [0, 0, 1, 1], [], []>} : vector<512x128xbf16>, vector<128x256xbf16>, vector<512x256xf32> -> vector<512x256xf32>
    %c0_3 = arith.constant 0 : index
    %c0_4 = arith.constant 0 : index
    %4 = vector.load %arg3[%c0_3, %c0_4] : memref<1x256xf32, #tpu.memory_space<vmem>>, vector<1x256xf32>
    %5 = vector.broadcast %4 : vector<1x256xf32> to vector<512x256xf32>
    %6 = arith.addf %3, %5 : vector<512x256xf32>
    %cst_5 = arith.constant 0.000000e+00 : f32
    %7 = vector.broadcast %cst_5 : f32 to vector<512x256xf32>
    %8 = arith.maximumf %6, %7 : vector<512x256xf32>
    %9 = arith.truncf %8 : vector<512x256xf32> to vector<512x256xbf16>
    %c0_6 = arith.constant 0 : index
    %c0_7 = arith.constant 0 : index
    %10 = vector.load %arg4[%c0_6, %c0_7] : memref<256x128xbf16, #tpu.memory_space<vmem>>, vector<256x128xbf16>
    %cst_8 = arith.constant dense<0.000000e+00> : vector<512x128xf32>
    %11 = tpu.matmul %9, %10, %cst_8 {dimension_numbers = #tpu.dot_dimension_numbers<[1], [0], [0], [1], [0, 0, 1, 1], [], []>} : vector<512x256xbf16>, vector<256x128xbf16>, vector<512x128xf32> -> vector<512x128xf32>
    %c0_9 = arith.constant 0 : index
    %c0_10 = arith.constant 0 : index
    %12 = vector.load %arg5[%c0_9, %c0_10] : memref<3x128xf32, #tpu.memory_space<vmem>>, vector<1x128xf32>
    %13 = vector.broadcast %12 : vector<1x128xf32> to vector<512x128xf32>
    %14 = arith.addf %11, %13 : vector<512x128xf32>
    %15 = arith.addf %14, %0 : vector<512x128xf32>
    %cst_11 = arith.constant dense<0.000000e+00> : vector<512xf32>
    %16 = vector.multi_reduction <add>, %15, %cst_11 [1] : vector<512x128xf32> to vector<512xf32>
    %17 = vector.shape_cast %16 : vector<512xf32> to vector<512x1xf32>
    %cst_12 = arith.constant 1.280000e+02 : f32
    %18 = vector.broadcast %cst_12 : f32 to vector<512x1xf32>
    %19 = arith.divf %17, %18 : vector<512x1xf32>
    %20 = vector.broadcast %19 : vector<512x1xf32> to vector<512x128xf32>
    %21 = arith.subf %15, %20 : vector<512x128xf32>
    %22 = arith.mulf %21, %21 : vector<512x128xf32>
    %cst_13 = arith.constant dense<0.000000e+00> : vector<512xf32>
    %23 = vector.multi_reduction <add>, %22, %cst_13 [1] : vector<512x128xf32> to vector<512xf32>
    %24 = vector.shape_cast %23 : vector<512xf32> to vector<512x1xf32>
    %cst_14 = arith.constant 0.00787401571 : f32
    %25 = vector.broadcast %cst_14 : f32 to vector<512x1xf32>
    %26 = arith.mulf %24, %25 : vector<512x1xf32>
    %27 = math.sqrt %26 : vector<512x1xf32>
    %cst_15 = arith.constant 1.000000e-03 : f32
    %28 = vector.broadcast %cst_15 : f32 to vector<512x1xf32>
    %29 = arith.addf %27, %28 : vector<512x1xf32>
    %30 = tpu.reciprocal %29 {approx = true} : vector<512x1xf32> -> vector<512x1xf32>
    %31 = vector.broadcast %30 : vector<512x1xf32> to vector<512x128xf32>
    %32 = arith.mulf %21, %31 : vector<512x128xf32>
    %c1 = arith.constant 1 : index
    %c0_16 = arith.constant 0 : index
    %33 = vector.load %arg5[%c1, %c0_16] : memref<3x128xf32, #tpu.memory_space<vmem>>, vector<1x128xf32>
    %34 = vector.broadcast %33 : vector<1x128xf32> to vector<512x128xf32>
    %35 = arith.mulf %32, %34 : vector<512x128xf32>
    %c2 = arith.constant 2 : index
    %c0_17 = arith.constant 0 : index
    %36 = vector.load %arg5[%c2, %c0_17] : memref<3x128xf32, #tpu.memory_space<vmem>>, vector<1x128xf32>
    %37 = vector.broadcast %36 : vector<1x128xf32> to vector<512x128xf32>
    %38 = arith.addf %35, %37 : vector<512x128xf32>
    %c0_18 = arith.constant 0 : index
    %c0_19 = arith.constant 0 : index
    %39 = vector.load %arg6[%c0_18, %c0_19] : memref<512x128xf32, #tpu.memory_space<vmem>>, vector<512x128xf32>
    tpu.vector_store %arg6[%c0_18, %c0_19], %38 {strides = array<i32>} : memref<512x128xf32, #tpu.memory_space<vmem>>, vector<512x128xf32>,
    return
  }
  func.func @transform_0(%arg0: i32) -> (i32, i32) {
    %c0_i32 = arith.constant 0 : i32
    %c0_i32_0 = arith.constant 0 : i32
    return %arg0, %c0_i32 : i32, i32
  }
  func.func @transform_1(%arg0: i32) -> (i32, i32) {
    %c0_i32 = arith.constant 0 : i32
    %c0_i32_0 = arith.constant 0 : i32
    %c0_i32_1 = arith.constant 0 : i32
    return %c0_i32, %c0_i32_0 : i32, i32
  }
  func.func @transform_2(%arg0: i32) -> (i32, i32) {
    %c0_i32 = arith.constant 0 : i32
    %c0_i32_0 = arith.constant 0 : i32
    %c0_i32_1 = arith.constant 0 : i32
    return %c0_i32, %c0_i32_0 : i32, i32
  }
  func.func @transform_3(%arg0: i32) -> (i32, i32) {
    %c0_i32 = arith.constant 0 : i32
    %c0_i32_0 = arith.constant 0 : i32
    %c0_i32_1 = arith.constant 0 : i32
    return %c0_i32, %c0_i32_0 : i32, i32
  }
  func.func @transform_4(%arg0: i32) -> (i32, i32) {
    %c0_i32 = arith.constant 0 : i32
    %c0_i32_0 = arith.constant 0 : i32
    %c0_i32_1 = arith.constant 0 : i32
    return %c0_i32, %c0_i32_0 : i32, i32
  }
  func.func @transform_5(%arg0: i32) -> (i32, i32) {
    %c0_i32 = arith.constant 0 : i32
    %c0_i32_0 = arith.constant 0 : i32
    return %arg0, %c0_i32 : i32, i32
  }
}

</mosaic_0001>

<bundles_post_ra>
// kernel: tpu_custom_call.1
= control target key start
LH: loop header
LB: loop body
LE: loop exit
PB: predicated region body
PF: predicated region fallthrough
CT: control target
= control target key end

     0   :  { %s6277_s0 = inlined_call_operand.hbm [shape: f32[600,128], index: 0, kind: input, shape index: {}]   ;;  %s6278_s1 = inlined_call_operand.hbm [shape: bf16[128,256], index: 1, kind: input, shape index: {}]   ;;  %s6279_s2 = inlined_call_operand.hbm [shape: f32[1,256], index: 2, kind: input, shape index: {}]   ;;  %s6280_s3 = inlined_call_operand.hbm [shape: bf16[256,128], index: 3, kind: input, shape index: {}]   ;;  %s6281_s4 = inlined_call_operand.hbm [shape: f32[3,128], index: 4, kind: input, shape index: {}]   ;;  %s6282_s5 = inlined_call_operand.hbm [shape: f32[600,128], index: 5, kind: output, shape index: {}]  }
   0x1   :  { %6293 = sst [smem:[#allocation24_spill]] %s6278_s1 }
   0x2   :  { %6294 = sst [smem:[#allocation25_spill]] %s6280_s3 }
   0x3   :  { %10 = vsyncpa [#allocation3], 0 }
   0x4   :  { %12 = vsyncpa [#allocation3 + $0x1], 0 }
   0x5   :  { %13 = vsyncpa [#allocation6], 0 }
   0x6   :  { %14 = vsyncpa [#allocation9], 0 }
   0x7   :  { %15 = vsyncpa [#allocation4], 0 }
   0x8   :  { %17 = vsyncpa [#allocation4 + $0x1], 0  ;;  %s4282_s18 = smov 0   ;;  %s4284_s19 = smov 0  }
   0x9   :  { %s4286_s20 = smov 0   ;;  %s4288_s21 = smov 0  }
   0xa LB: > { %s4303_s22 = sadd.s32 4294967295, %s4235_s21   ;;  %s3393_s23 = sadd.s32 4294967294, %s4235_s21   ;;  %s4235_s21 = sphi %s4288_s21, %s6325_s21   ;;  %s4231_s20 = sphi %s4286_s20, %s6329_s20   ;;  %s4227_s19 = sphi %s4284_s19, %s6328_s19   ;;  %s4223_s18 = sphi %s4282_s18, %s6327_s18  }
   0xb   : > { %s4307_s24 = sadd.s32 1, %s4235_s21   ;;  %s30_s25 = sadd.s32 1, %s4231_s20 }
   0xc   : > { %6295 = sst [smem:[#allocation16_spill]] %s4307_s24  ;;  %s27_s26 = ssub.s32 %s4235_s21, %s4307_s24 }
   0xd   : > { %p37_p0 = scmp.ne.s32.totalorder %s4231_s20, %s4227_s19  ;;  %p28_p1 = scmp.eq.s32.totalorder %s27_s26, 0 }
   0xe   : > { %p38_p2 = scmp.eq.s32.totalorder %s4235_s21, 0  ;;  %p43_p3 = scmp.ne.s32.totalorder %s4227_s19, %s4223_s18 }
   0xf   : > { %p6287_p4 = scmp.eq.s32.totalorder %s4303_s22, 0  ;;  %p151_p7 = scmp.eq.s32.totalorder %s4303_s22, 1 }
  0x10   : > { %s4319_s27 = scalar_select %p28_p1, %s4231_s20, %s30_s25  }
  0x11   : > { %p4321_p5 = por %p38_p2, %p37_p0  ;;  %p4327_p6 = por %p6287_p4, %p43_p3 }
  0x12   : > { %6296 = sst [smem:[#allocation17_spill]] %s4319_s27  ;;  %p157_p8 = scmp.eq.s32.totalorder %s3393_s23, 1 }
  0x13   : > { %p3394_p9 = scmp.ge.s32.totalorder %s4235_s21, 1  ;;  %p164_p10 = scmp.lt.s32.totalorder %s4235_s21, 3 }
  0x14   : > { %p4334_p11 = por %p151_p7, %p37_p0  ;;  %p4338_p12 = por %p157_p8, %p43_p3 }
  0x15   : > { %p4342_p13 = pnand %p3394_p9, %p164_p10  ;;  %s6303_s1 = sld [smem:[#allocation24_spill]] }
  0x16   : > { %s6300_s6 = scalar_select %p4338_p12, 1, 0 }
  0x17   : > { %p3603_p1 = pneg %p4342_p13  ;;  %s4237_s11 = smov [#allocation5]  }
  0x18   : > { %6301 = sst [smem:[#allocation18_spill]] %s6300_s6  ;;  %s177_s12 = sshll.u32 %s4237_s11, 4  ;;  %s178_s12 = int_to_ptr.vmem [resolvable:$true] %s177_s12 }
  0x19   : > { %p4353_p0 = pnand %p3603_p1, %p6287_p4  ;;  %s6305_s3 = sld [smem:[#allocation25_spill]] }
  0x1a   : > { %s4238_s17 = smov 128   ;;  %s4239_s23 = smov 8  }
  0x1b   : > { %s175_s10 = sshll.u32 %s6303_s1, 4  ;;  %s4240_s25 = smov [#allocation8]   ;;  %s176_s10 = int_to_ptr.hbm [resolvable:$true] %s175_s10 }
  0x1c   : > { %3606 = dma.hbm_to_vmem [thread:$0]  (!%p4353_p0), %s176_s10, 2048, %s178_s12, [#allocation6], %s4238_s17, %s4238_s17, %s4239_s23  }
  0x1d   : > { %s203_s26 = sshll.u32 %s4240_s25, 4  ;;  %s190_s11 = sshll.u32 %s6279_s2, 4  ;;  %s204_s26 = int_to_ptr.vmem [resolvable:$true] %s203_s26  ;;  %s191_s11 = int_to_ptr.hbm [resolvable:$true] %s190_s11 }
  0x1e   : > { %s4241_s1 = smov 64   ;;  %s4242_s27 = smov 4  }
  0x1f   : > { %s201_s16 = sshll.u32 %s6305_s3, 4  ;;  %s4243_s14 = smov [#allocation7]   ;;  %s202_s16 = int_to_ptr.hbm [resolvable:$true] %s201_s16 }
  0x20   : > { %3612 = dma.hbm_to_vmem [thread:$0]  (!%p4353_p0), %s202_s16, 2048, %s204_s26, [#allocation9], %s4241_s1, %s4241_s1, %s4242_s27  }
  0x21   : > { %s192_s15 = sshll.u32 %s4243_s14, 4  ;;  %s216_s6 = sshll.u32 %s6281_s4, 4  ;;  %s193_s15 = int_to_ptr.vmem [resolvable:$true] %s192_s15  ;;  %s217_s6 = int_to_ptr.hbm [resolvable:$true] %s216_s6 }
  0x22   : > { %3609 = dma.hbm_to_vmem [thread:$0]  (!%p4353_p0), %s191_s11, 32, %s193_s15, [#allocation6]  }
  0x23   : > { %s4244_s10 = smov [#allocation10]   ;;  %p6286_p2 = scmp.ge.s32.totalorder %s4235_s21, 2 }
  0x24   : > { %s218_s12 = sshll.u32 %s4244_s10, 4  ;;  %s219_s12 = int_to_ptr.vmem [resolvable:$true] %s218_s12 }
  0x25   : > { %3615 = dma.hbm_to_vmem [thread:$0]  (!%p4353_p0), %s217_s6, 64, %s219_s12, [#allocation9]  }
  0x26   : > { %225 = sbr.rel (%p6286_p2) target bundleno = 79 (0x4f), region = 32 }
  0x2b   : > { %228 = sbr.rel (!%p4321_p5) target bundleno = 79 (0x4f), region = 36  ;;  %s229_s1 = sand.u32 (%p4321_p5), 1, %s4231_s20  }
  0x2c   : > { %s3401_s3 = sshll.u32 (%p4321_p5), %s4235_s21, 6  ;;  %s3400_s24 = sshll.u32 (%p4321_p5), %s229_s1, 9 }
  0x2d   : > { %s235_s27 = ssub.s32 (%p4321_p5), 75, %s3401_s3  ;;  %s4384_s17 = scalar_lea.sflag (%p4321_p5), [#allocation3], %s229_s1 }
  0x2e   : > { %p236_p3 = scmp.lt.s32.totalorder (%p4321_p5), %s235_s27, 64  ;;  %s233_s23 = scalar_lea.vmem (%p4321_p5), [#allocation2], %s3400_s24 }
  0x30   : > { %s6331_s27 = smov (!%p236_p3, %s235_s27), 64 }
  0x31   : > { %s3402_s13 = sshll.u32 %s6331_s27, 3 }
  0x32   : > { %s239_s6 = ssub.s32 512, %s3402_s13 }
  0x33   : > { %s240_s16 = sshll.u32 %s239_s6, 4 }
  0x34   : > { %241 = vsyncadd %s4384_s17, %s240_s16  ;;  %p4387_p5 = scmp.ne.s32.totalorder %s3402_s13, 0  ;;  %s3551_s25 = sshll.u32 %s4235_s21, 9 }
  0x35   : > { %s244_s9 = scalar_lea.hbm %s6277_s0, %s3551_s25  ;;  %s4395_s11 = sshll.u32 %s233_s23, 4  ;;  %s249_s11 = int_to_ptr.vmem [resolvable:$true] %s4395_s11 }
  0x36   : > { %s246_s14 = sshll.u32 %s244_s9, 4  ;;  %s3406_s15 = sshll.u32 %s6331_s27, 7  ;;  %s4398_s14 = int_to_ptr.hbm [resolvable:$true] %s246_s14 }
  0x37   : > { %s4111_s10 = sshra.s32 %s4398_s14, 4  ;;  %s4113_s12 = sshrl.u32 %s3406_s15, 4  ;;  %s4112_s10 = int_to_ptr.hbm [resolvable:$true] %s4111_s10 }
  0x38   : > { %s4118_s1 = scalar_lea.hbm %s4112_s10, %s4113_s12  ;;  %s4122_s13 = scalar_lea.hbm %s6277_s0, 600 }
  0x39   : > { %p4119_p7 = scmp.ne.s32.totalorder %s4112_s10, %s4118_s1  ;;  %p4123_p10 = scmp.lt.s32.totalorder %s4112_s10, %s6277_s0 }
  0x3a   : > { %p4124_p1 = scmp.lt.s32.totalorder %s4122_s13, %s4118_s1 }
  0x3b   : > { %p4120_p8 = pnand %p4119_p7, %p4387_p5 }
  0x3c   : > { %p4125_p0 = por %p4124_p1, %p4123_p10 }
  0x3d   : > { %p4121_p9 = pneg %p4120_p8 }
  0x3f   : > { %p4126_p3 = pnand %p4125_p0, %p4121_p9 }
  0x41   : > { %4129 = shalt.err (!%p4126_p3)
}
  0x42   : > { %s4130_s23 = sshra.s32 %s249_s11, 4  ;;  %s4245_s26 = smov [#allocation2]   ;;  %s4131_s23 = int_to_ptr.vmem [resolvable:$true] %s4130_s23 }
  0x43   : > { %s4137_s25 = scalar_lea.vmem %s4131_s23, %s4113_s12  ;;  %s4141_s8 = scalar_lea.vmem %s4245_s26, 1024 }
  0x44   : > { %p4138_p7 = scmp.ne.s32.totalorder %s4131_s23, %s4137_s25  ;;  %p4143_p4 = scmp.lt.s32.totalorder %s4141_s8, %s4137_s25 }
  0x46   : > { %p4139_p8 = pnand %p4138_p7, %p4387_p5 }
  0x48   : > { %p4140_p2 = pneg %p4139_p8 }
  0x4a   : > { %p4145_p12 = pnand %p4143_p4, %p4140_p2 }
  0x4c   : > { %4148 = shalt.err (!%p4145_p12)
}
  0x4d   : > { %s4246_s9 = smov 128   ;;  %s4247_s10 = smov 8  }
  0x4e   : > { %254 = dma.hbm_to_vmem [thread:$0]  (%p4387_p5), %s4398_s14, %s3406_s15, %s249_s11, %s4384_s17, %s4246_s9, %s4246_s9, %s4247_s10  }
  0x4f PF: > { %260 = sbr.rel (%p4342_p13) target bundleno = 1219 (0x4c3), region = 40 }
  0x54   : > { %s4427_s12 = sand.u32 1, %s4227_s19  }
  0x55   : > { %s3408_s1 = sshll.u32 %s4427_s12, 9  ;;  %s263_s3 = scalar_lea.sflag [#allocation3], %s4427_s12 }
  0x56   : > { %s4433_s24 = scalar_lea.vmem [#allocation2], %s3408_s1 }
  0x57   : > { %4206 = dma.done.wait (%p4327_p6), %s263_s3, 8192  }
  0x58   : > { %4208 = vsyncadd (%p4327_p6), %s263_s3, 4294959104  ;;  %p6307_p4 = scmp.eq.s32.totalorder %s4303_s22, 0 }
  0x5a   : > { %4210 = dma.done.wait (%p6307_p4), [#allocation6], 2080   ;;  %p6308_p12 = pmov %p6307_p4 }
  0x5b   : > { %p6309_p13 = pmov %p6307_p4 }
  0x5c   : > { %4212 = vsyncadd (%p6308_p12), [#allocation6], 4294965216 }
  0x5d   : > { %4214 = dma.done.wait (%p6309_p13), [#allocation9], 2112   ;;  %p6310_p2 = pmov %p6307_p4 }
  0x5e   : > { %v3472_v0 = vld [vmem:[#allocation5 + $0x70] sm:$0xf]  ;;  %v3567_v1 = vld [vmem:[#allocation5 + $0x74] sm:$0xf0]  ;;  %v3566_v2 = vld [vmem:[#allocation5 + $0x74] sm:$0xf] }
  0x5f   : > { %4216 = vsyncadd (%p6310_p2), [#allocation9], 4294965184  ;;  %v3473_v3 = vor.u32 %v3567_v1, %v3472_v0  ;;  %v3474_v4 = vld [vmem:[#allocation5 + $0x78] sm:$0xf0]  ;;  %v3464_v5 = vld [vmem:[#allocation5 + $0x60] sm:$0xf] }
  0x60   : > { %v3565_v6 = vld [vmem:[#allocation5 + $0x64] sm:$0xf0]  ;;  %v3477_v7 = vor.u32 %v3566_v2, %v3474_v4  ;;  %v3564_v8 = vld [vmem:[#allocation5 + $0x64] sm:$0xf]  ;;  %v3466_v9 = vld [vmem:[#allocation5 + $0x68] sm:$0xf0] }
  0x61   : > { %522 = vmatpush.bf16.msra.mxu0 %v3473_v3  ;;  %v3465_v10 = vor.u32 %v3565_v6, %v3464_v5  ;;  %v3469_v11 = vor.u32 %v3564_v8, %v3466_v9  ;;  %v3456_v12 = vld [vmem:[#allocation5 + $0x50] sm:$0xf]  ;;  %v3563_v13 = vld [vmem:[#allocation5 + $0x54] sm:$0xf0]  ;;  %v3562_v14 = vld [vmem:[#allocation5 + $0x54] sm:$0xf] }
  0x62   : > { %691 = vmatpush.bf16.msra.mxu1 %v3477_v7  ;;  %v3458_v15 = vld [vmem:[#allocation5 + $0x58] sm:$0xf0]  ;;  %v3457_v16 = vor.u32 %v3563_v13, %v3456_v12  ;;  %v3448_v18 = vld [vmem:[#allocation5 + $0x40] sm:$0xf]  ;;  %v3561_v19 = vld [vmem:[#allocation5 + $0x44] sm:$0xf0] }
  0x63   : > { %v3461_v17 = vor.u32 %v3562_v14, %v3458_v15  ;;  %v3560_v20 = vld [vmem:[#allocation5 + $0x44] sm:$0xf]  ;;  %v3450_v21 = vld [vmem:[#allocation5 + $0x48] sm:$0xf0]  ;;  %v3449_v22 = vor.u32 %v3561_v19, %v3448_v18  ;;  %v3440_v23 = vld [vmem:[#allocation5 + $0x30] sm:$0xf] }
  0x64   : > { %v3559_v24 = vld [vmem:[#allocation5 + $0x34] sm:$0xf0]  ;;  %v3453_v25 = vor.u32 %v3560_v20, %v3450_v21  ;;  %v3558_v26 = vld [vmem:[#allocation5 + $0x34] sm:$0xf]  ;;  %v3442_v27 = vld [vmem:[#allocation5 + $0x38] sm:$0xf0] }
  0x65   : > { %523 = vmatpush.bf16.msra.mxu0 %v3465_v10  ;;  %v3441_v28 = vor.u32 %v3559_v24, %v3440_v23  ;;  %v3445_v29 = vor.u32 %v3558_v26, %v3442_v27  ;;  %v3432_v30 = vld [vmem:[#allocation5 + $0x20] sm:$0xf]  ;;  %v3557_v31 = vld [vmem:[#allocation5 + $0x24] sm:$0xf0]  ;;  %v3556_v32 = vld [vmem:[#allocation5 + $0x24] sm:$0xf] }
  0x66   : > { %692 = vmatpush.bf16.msra.mxu1 %v3469_v11  ;;  %v3434_v33 = vld [vmem:[#allocation5 + $0x28] sm:$0xf0]  ;;  %v3433_v34 = vor.u32 %v3557_v31, %v3432_v30  ;;  %v3424_v36 = vld [vmem:[#allocation5 + $0x10] sm:$0xf]  ;;  %v3555_v37 = vld [vmem:[#allocation5 + $0x14] sm:$0xf0] }
  0x67   : > { %v3437_v35 = vor.u32 %v3556_v32, %v3434_v33  ;;  %v3554_v38 = vld [vmem:[#allocation5 + $0x14] sm:$0xf]  ;;  %v3426_v39 = vld [vmem:[#allocation5 + $0x18] sm:$0xf0]  ;;  %v3425_v40 = vor.u32 %v3555_v37, %v3424_v36  ;;  %v3416_v42 = vld [vmem:[#allocation5] sm:$0xf] }
  0x68   : > { %v3429_v41 = vor.u32 %v3554_v38, %v3426_v39  ;;  %v3553_v43 = vld [vmem:[#allocation5 + $0x4] sm:$0xf0]  ;;  %v3552_v44 = vld [vmem:[#allocation5 + $0x4] sm:$0xf]  ;;  %v3418_v45 = vld [vmem:[#allocation5 + $0x8] sm:$0xf0] }
  0x69   : > { %524 = vmatpush.bf16.msra.mxu0 %v3457_v16  ;;  %v3417_v46 = vor.u32 %v3553_v43, %v3416_v42  ;;  %v4448_v47 = vld [vmem:[%s4433_s24] sm:$0xff]  ;;  %v4451_v48 = vld [vmem:[%s4433_s24 + $0x8] sm:$0xff]  ;;  %v3421_v49 = vor.u32 %v3552_v44, %v3418_v45  ;;  %v4456_v51 = vld [vmem:[%s4433_s24 + $0x10] sm:$0xff]  ;;  %s5021_s29 = scalar_lea.vmem [#allocation11], %s3408_s1  ;;  %s3260_s7 = scalar_lea.sflag [#allocation4], %s4427_s12 }
  0x6a   : > { %693 = vmatpush.bf16.msra.mxu1 %v3461_v17  ;;  %v388_v50 = vpack.c.bf16 %v4451_v48, %v4448_v47  ;;  %v4459_v52 = vld [vmem:[%s4433_s24 + $0x18] sm:$0xff]  ;;  %v4464_v54 = vld [vmem:[%s4433_s24 + $0x20] sm:$0xff]  ;;  %v4467_v55 = vld [vmem:[%s4433_s24 + $0x28] sm:$0xff]  ;;  %s3543_s27 = sshll.u32 (%p4334_p11), %s4303_s22, 6 }
  0x6b   : > { %v389_v53 = vpack.c.bf16 %v4459_v52, %v4456_v51  ;;  %v390_v56 = vpack.c.bf16 %v4467_v55, %v4464_v54  ;;  %v4472_v57 = vld [vmem:[%s4433_s24 + $0x30] sm:$0xff]  ;;  %v4475_v58 = vld [vmem:[%s4433_s24 + $0x38] sm:$0xff]  ;;  %v4480_v60 = vld [vmem:[%s4433_s24 + $0x40] sm:$0xff]  ;;  %s3268_s17 = ssub.s32 (%p4334_p11), 75, %s3543_s27 }
  0x6c   : > { %v391_v59 = vpack.c.bf16 %v4475_v58, %v4472_v57  ;;  %v4483_v61 = vld [vmem:[%s4433_s24 + $0x48] sm:$0xff]  ;;  %v3575_v63 = vld [vmem:[#allocation8 + $0x38] sm:$0xff]  ;;  %v4488_v1 = vld [vmem:[%s4433_s24 + $0x50] sm:$0xff]  ;;  %p3269_p6 = scmp.lt.s32.totalorder (%p4334_p11), %s3268_s17, 64 }
  0x6d   : > { %525 = vmatpush.bf16.msra.mxu0 %v3449_v22  ;;  %v392_v62 = vpack.c.bf16 %v4483_v61, %v4480_v60  ;;  %v3583_v0 = vld [vmem:[#allocation8 + $0x78] sm:$0xff]  ;;  %1182 = vmatpush.bf16.msra.mxu2 %v3575_v63  ;;  %v3574_v4 = vld [vmem:[#allocation8 + $0x30] sm:$0xff]  ;;  %v3573_v6 = vld [vmem:[#allocation8 + $0x28] sm:$0xff] }
  0x6e   : > { %694 = vmatpush.bf16.msra.mxu1 %v3453_v25  ;;  %1351 = vmatpush.bf16.msra.mxu3 %v3583_v0  ;;  %v4491_v2 = vld [vmem:[%s4433_s24 + $0x58] sm:$0xff]  ;;  %v3581_v7 = vld [vmem:[#allocation8 + $0x68] sm:$0xff]  ;;  %v3572_v8 = vld [vmem:[#allocation8 + $0x20] sm:$0xff] }
  0x6f   : > { %v393_v3 = vpack.c.bf16 %v4491_v2, %v4488_v1  ;;  %v3582_v5 = vld [vmem:[#allocation8 + $0x70] sm:$0xff]  ;;  %v3580_v9 = vld [vmem:[#allocation8 + $0x60] sm:$0xff]  ;;  %v3571_v13 = vld [vmem:[#allocation8 + $0x18] sm:$0xff] }
  0x70   : > { %v4496_v10 = vld [vmem:[%s4433_s24 + $0x60] sm:$0xff]  ;;  %v4499_v11 = vld [vmem:[%s4433_s24 + $0x68] sm:$0xff]  ;;  %v3570_v15 = vld [vmem:[#allocation8 + $0x10] sm:$0xff] }
  0x71   : > { %526 = vmatpush.bf16.msra.mxu0 %v3441_v28  ;;  %1183 = vmatpush.bf16.msra.mxu2 %v3574_v4  ;;  %v394_v12 = vpack.c.bf16 %v4499_v11, %v4496_v10  ;;  %v3579_v14 = vld [vmem:[#allocation8 + $0x58] sm:$0xff]  ;;  %v3578_v16 = vld [vmem:[#allocation8 + $0x50] sm:$0xff]  ;;  %v3569_v17 = vld [vmem:[#allocation8 + $0x8] sm:$0xff] }
  0x72   : > { %695 = vmatpush.bf16.msra.mxu1 %v3445_v29  ;;  %1352 = vmatpush.bf16.msra.mxu3 %v3582_v5  ;;  %v3577_v18 = vld [vmem:[#allocation8 + $0x48] sm:$0xff]  ;;  %v3568_v19 = vld [vmem:[#allocation8] sm:$0xff]  ;;  %v4507_v22 = vld [vmem:[%s4433_s24 + $0x78] sm:$0xff] }
  0x73   : > { %v3576_v20 = vld [vmem:[#allocation8 + $0x40] sm:$0xff]  ;;  %v4504_v21 = vld [vmem:[%s4433_s24 + $0x70] sm:$0xff]  ;;  %v436_v27 = vld [vmem:[#allocation7] sm:$0x3] }
  0x74   : > { %v395_v23 = vpack.c.bf16 %v4507_v22, %v4504_v21  ;;  %v4512_v24 = vld [vmem:[%s4433_s24 + $0x80] sm:$0xff]  ;;  %v341_v25 = vld [vmem:[%s4433_s24 + $0x88] sm:$0xff]  ;;  %v4516_v30 = vperm.slane %v436_v27, 0  ;;  %v4518_v31 = vperm.slane %v436_v27, 1  ;;  %v342_v42 = vld [vmem:[%s4433_s24 + $0x90] sm:$0xff] }
  0x75   : > { %527 = vmatpush.bf16.msra.mxu0 %v3433_v34  ;;  %1184 = vmatpush.bf16.msra.mxu2 %v3573_v6  ;;  %v396_v26 = vpack.c.bf16 %v341_v25, %v4512_v24  ;;  %v343_v43 = vld [vmem:[%s4433_s24 + $0x98] sm:$0xff] }
  0x76   : > { %696 = vmatpush.bf16.msra.mxu1 %v3437_v35  ;;  %1353 = vmatpush.bf16.msra.mxu3 %v3581_v7  ;;  %v344_v7 = vld [vmem:[%s4433_s24 + $0xa0] sm:$0xff] }
  0x79   : > { %528 = vmatpush.bf16.msra.mxu0 %v3425_v40  ;;  %1185 = vmatpush.bf16.msra.mxu2 %v3572_v8  ;;  %v345_v8 = vld [vmem:[%s4433_s24 + $0xa8] sm:$0xff] }
  0x7a   : > { %697 = vmatpush.bf16.msra.mxu1 %v3429_v41  ;;  %1354 = vmatpush.bf16.msra.mxu3 %v3580_v9 }
  0x7d   : > { %529 = vmatpush.bf16.msra.mxu0 %v3417_v46  ;;  %1186 = vmatpush.bf16.msra.mxu2 %v3571_v13  ;;  %v397_v46 = vpack.c.bf16 %v343_v43, %v342_v42  ;;  %v398_v13 = vpack.c.bf16 %v345_v8, %v344_v7 }
  0x7e   : > { %698 = vmatpush.bf16.msra.mxu1 %v3421_v49  ;;  %1355 = vmatpush.bf16.msra.mxu3 %v3579_v14 }
  0x80   : > { %530 = vmatmul.bf16.vlgmr.msra.gmra.mxu0 %v388_v50 }
  0x81   : > { %699 = vmatmul.bf16.vlgmr.msra.gmra.mxu1 %v388_v50  ;;  %1187 = vmatpush.bf16.msra.mxu2 %v3570_v15 }
  0x82   : > { %1356 = vmatpush.bf16.msra.mxu3 %v3578_v16 }
  0x85   : > { %1188 = vmatpush.bf16.msra.mxu2 %v3569_v17 }
  0x86   : > { %1357 = vmatpush.bf16.msra.mxu3 %v3577_v18 }
  0x89   : > { %1189 = vmatpush.bf16.msra.mxu2 %v3568_v19 }
  0x8a   : > { %1358 = vmatpush.bf16.msra.mxu3 %v3576_v20 }
  0x90   : > { %535 = vmatmul.bf16.gmra.mxu0 %v389_v53 }
  0x91   : > { %704 = vmatmul.bf16.gmra.mxu1 %v389_v53 }
  0xa0   : > { %540 = vmatmul.bf16.gmra.mxu0 %v390_v56 }
  0xa1   : > { %709 = vmatmul.bf16.gmra.mxu1 %v390_v56 }
  0xb0   : > { %545 = vmatmul.bf16.gmra.mxu0 %v391_v59 }
  0xb1   : > { %714 = vmatmul.bf16.gmra.mxu1 %v391_v59 }
  0xc0   : > { %550 = vmatmul.bf16.gmra.mxu0 %v392_v62 }
  0xc1   : > { %719 = vmatmul.bf16.gmra.mxu1 %v392_v62 }
  0xd0   : > { %555 = vmatmul.bf16.gmra.mxu0 %v393_v3 }
  0xd1   : > { %724 = vmatmul.bf16.gmra.mxu1 %v393_v3 }
  0xe0   : > { %560 = vmatmul.bf16.gmra.mxu0 %v394_v12 }
  0xe1   : > { %729 = vmatmul.bf16.gmra.mxu1 %v394_v12 }
  0xf0   : > { %565 = vmatmul.bf16.gmra.mxu0 %v395_v23 }
  0xf1   : > { %734 = vmatmul.bf16.gmra.mxu1 %v395_v23 }
  0xfd   : > { %v531_v28 = vpop.f32.mrf.mxu0 }
  0xfe   : > { %v700_v29 = vpop.f32.mrf.mxu1  ;;  %v532_v32 = vadd.f32 %v531_v28, %v4516_v30 }
  0xff   : > { %v701_v33 = vadd.f32 %v700_v29, %v4518_v31  ;;  %v346_v29 = vld [vmem:[%s4433_s24 + $0xb0] sm:$0xff] }
 0x100   : > { %570 = vmatmul.bf16.gmra.mxu0 %v396_v26  ;;  %v860_v38 = vmax.f32 %v532_v32, 0.0  ;;  %v347_v32 = vld [vmem:[%s4433_s24 + $0xb8] sm:$0xff] }
 0x101   : > { %739 = vmatmul.bf16.gmra.mxu1 %v396_v26  ;;  %v861_v40 = vmax.f32 %v701_v33, 0.0 }
 0x105   : > { %v533_v34 = vpop.f32.mrf.mxu0 }
 0x106   : > { %v534_v35 = vadd.f32 %v533_v34, %v4516_v30  ;;  %v702_v36 = vpop.f32.mrf.mxu1 }
 0x107   : > { %v703_v37 = vadd.f32 %v702_v36, %v4518_v31 }
 0x108   : > { %v862_v39 = vmax.f32 %v534_v35, 0.0  ;;  %v399_v35 = vpack.c.bf16 %v347_v32, %v346_v29 }
 0x109   : > { %v863_v41 = vmax.f32 %v703_v37, 0.0 }
 0x10a   : > { %v988_v44 = vpack.c.bf16 %v862_v39, %v860_v38 }
 0x10b   : > { %v989_v45 = vpack.c.bf16 %v863_v41, %v861_v40 }
 0x10c   : > { %1190 = vmatmul.bf16.vlgmr.msra.gmra.mxu2 %v988_v44 }
 0x10d   : > { %1359 = vmatmul.bf16.vlgmr.msra.gmra.mxu3 %v989_v45  ;;  %v536_v49 = vpop.f32.mrf.mxu0 }
 0x10e   : > { %v705_v50 = vpop.f32.mrf.mxu1  ;;  %v537_v53 = vadd.f32 %v536_v49, %v4516_v30 }
 0x10f   : > { %v706_v56 = vadd.f32 %v705_v50, %v4518_v31  ;;  %v348_v50 = vld [vmem:[%s4433_s24 + $0xc0] sm:$0xff] }
 0x110   : > { %575 = vmatmul.bf16.gmra.mxu0 %v397_v46  ;;  %v864_v3 = vmax.f32 %v537_v53, 0.0  ;;  %v349_v53 = vld [vmem:[%s4433_s24 + $0xc8] sm:$0xff] }
 0x111   : > { %744 = vmatmul.bf16.gmra.mxu1 %v397_v46  ;;  %v865_v5 = vmax.f32 %v706_v56, 0.0 }
 0x115   : > { %v538_v59 = vpop.f32.mrf.mxu0 }
 0x116   : > { %v539_v62 = vadd.f32 %v538_v59, %v4516_v30  ;;  %v707_v63 = vpop.f32.mrf.mxu1 }
 0x117   : > { %v708_v0 = vadd.f32 %v707_v63, %v4518_v31 }
 0x118   : > { %v866_v4 = vmax.f32 %v539_v62, 0.0  ;;  %v400_v62 = vpack.c.bf16 %v349_v53, %v348_v50 }
 0x119   : > { %v867_v6 = vmax.f32 %v708_v0, 0.0 }
 0x11a   : > { %v990_v9 = vpack.c.bf16 %v866_v4, %v864_v3 }
 0x11b   : > { %v991_v12 = vpack.c.bf16 %v867_v6, %v865_v5 }
 0x11c   : > { %1195 = vmatmul.bf16.gmra.mxu2 %v990_v9 }
 0x11d   : > { %1364 = vmatmul.bf16.gmra.mxu3 %v991_v12  ;;  %v541_v14 = vpop.f32.mrf.mxu0 }
 0x11e   : > { %v710_v15 = vpop.f32.mrf.mxu1  ;;  %v542_v16 = vadd.f32 %v541_v14, %v4516_v30 }
 0x11f   : > { %v711_v17 = vadd.f32 %v710_v15, %v4518_v31  ;;  %v350_v15 = vld [vmem:[%s4433_s24 + $0xd0] sm:$0xff] }
 0x120   : > { %580 = vmatmul.bf16.gmra.mxu0 %v398_v13  ;;  %v868_v25 = vmax.f32 %v542_v16, 0.0  ;;  %v351_v16 = vld [vmem:[%s4433_s24 + $0xd8] sm:$0xff] }
 0x121   : > { %749 = vmatmul.bf16.gmra.mxu1 %v398_v13  ;;  %v869_v27 = vmax.f32 %v711_v17, 0.0 }
 0x125   : > { %v543_v18 = vpop.f32.mrf.mxu0 }
 0x126   : > { %v544_v19 = vadd.f32 %v543_v18, %v4516_v30  ;;  %v712_v20 = vpop.f32.mrf.mxu1 }
 0x127   : > { %v713_v23 = vadd.f32 %v712_v20, %v4518_v31 }
 0x128   : > { %v870_v26 = vmax.f32 %v544_v19, 0.0  ;;  %v401_v19 = vpack.c.bf16 %v351_v16, %v350_v15 }
 0x129   : > { %v871_v28 = vmax.f32 %v713_v23, 0.0 }
 0x12a   : > { %v992_v33 = vpack.c.bf16 %v870_v26, %v868_v25 }
 0x12b   : > { %v993_v34 = vpack.c.bf16 %v871_v28, %v869_v27 }
 0x12c   : > { %1200 = vmatmul.bf16.gmra.mxu2 %v992_v33 }
 0x12d   : > { %1369 = vmatmul.bf16.gmra.mxu3 %v993_v34  ;;  %v546_v36 = vpop.f32.mrf.mxu0 }
 0x12e   : > { %v715_v37 = vpop.f32.mrf.mxu1  ;;  %v547_v38 = vadd.f32 %v546_v36, %v4516_v30 }
 0x12f   : > { %v716_v39 = vadd.f32 %v715_v37, %v4518_v31  ;;  %v352_v37 = vld [vmem:[%s4433_s24 + $0xe0] sm:$0xff] }
 0x130   : > { %585 = vmatmul.bf16.gmra.mxu0 %v399_v35  ;;  %v872_v44 = vmax.f32 %v547_v38, 0.0  ;;  %v353_v38 = vld [vmem:[%s4433_s24 + $0xe8] sm:$0xff] }
 0x131   : > { %754 = vmatmul.bf16.gmra.mxu1 %v399_v35  ;;  %v873_v46 = vmax.f32 %v716_v39, 0.0 }
 0x135   : > { %v548_v40 = vpop.f32.mrf.mxu0 }
 0x136   : > { %v549_v41 = vadd.f32 %v548_v40, %v4516_v30  ;;  %v717_v42 = vpop.f32.mrf.mxu1 }
 0x137   : > { %v718_v43 = vadd.f32 %v717_v42, %v4518_v31 }
 0x138   : > { %v874_v45 = vmax.f32 %v549_v41, 0.0  ;;  %v402_v41 = vpack.c.bf16 %v353_v38, %v352_v37 }
 0x139   : > { %v875_v49 = vmax.f32 %v718_v43, 0.0 }
 0x13a   : > { %v994_v56 = vpack.c.bf16 %v874_v45, %v872_v44 }
 0x13b   : > { %v995_v59 = vpack.c.bf16 %v875_v49, %v873_v46 }
 0x13c   : > { %1205 = vmatmul.bf16.gmra.mxu2 %v994_v56 }
 0x13d   : > { %1374 = vmatmul.bf16.gmra.mxu3 %v995_v59  ;;  %v551_v63 = vpop.f32.mrf.mxu0 }
 0x13e   : > { %v720_v0 = vpop.f32.mrf.mxu1  ;;  %v552_v3 = vadd.f32 %v551_v63, %v4516_v30 }
 0x13f   : > { %v721_v4 = vadd.f32 %v720_v0, %v4518_v31  ;;  %v354_v0 = vld [vmem:[%s4433_s24 + $0xf0] sm:$0xff] }
 0x140   : > { %590 = vmatmul.bf16.gmra.mxu0 %v400_v62  ;;  %v876_v9 = vmax.f32 %v552_v3, 0.0  ;;  %v355_v3 = vld [vmem:[%s4433_s24 + $0xf8] sm:$0xff] }
 0x141   : > { %759 = vmatmul.bf16.gmra.mxu1 %v400_v62  ;;  %v877_v13 = vmax.f32 %v721_v4, 0.0 }
 0x145   : > { %v553_v5 = vpop.f32.mrf.mxu0 }
 0x146   : > { %v554_v6 = vadd.f32 %v553_v5, %v4516_v30  ;;  %v722_v7 = vpop.f32.mrf.mxu1 }
 0x147   : > { %v723_v8 = vadd.f32 %v722_v7, %v4518_v31 }
 0x148   : > { %v878_v12 = vmax.f32 %v554_v6, 0.0  ;;  %v403_v6 = vpack.c.bf16 %v355_v3, %v354_v0 }
 0x149   : > { %v879_v14 = vmax.f32 %v723_v8, 0.0 }
 0x14a   : > { %v996_v17 = vpack.c.bf16 %v878_v12, %v876_v9 }
 0x14b   : > { %v997_v18 = vpack.c.bf16 %v879_v14, %v877_v13 }
 0x14c   : > { %1210 = vmatmul.bf16.gmra.mxu2 %v996_v17 }
 0x14d   : > { %1379 = vmatmul.bf16.gmra.mxu3 %v997_v18  ;;  %v556_v20 = vpop.f32.mrf.mxu0 }
 0x14e   : > { %v725_v23 = vpop.f32.mrf.mxu1  ;;  %v557_v25 = vadd.f32 %v556_v20, %v4516_v30 }
 0x14f   : > { %v726_v26 = vadd.f32 %v725_v23, %v4518_v31  ;;  %v356_v23 = vld [vmem:[%s4433_s24 + $0x100] sm:$0xff] }
 0x150   : > { %595 = vmatmul.bf16.gmra.mxu0 %v401_v19  ;;  %v880_v33 = vmax.f32 %v557_v25, 0.0  ;;  %v357_v25 = vld [vmem:[%s4433_s24 + $0x108] sm:$0xff] }
 0x151   : > { %764 = vmatmul.bf16.gmra.mxu1 %v401_v19  ;;  %v881_v35 = vmax.f32 %v726_v26, 0.0 }
 0x155   : > { %v558_v27 = vpop.f32.mrf.mxu0 }
 0x156   : > { %v559_v28 = vadd.f32 %v558_v27, %v4516_v30  ;;  %v727_v29 = vpop.f32.mrf.mxu1 }
 0x157   : > { %v728_v32 = vadd.f32 %v727_v29, %v4518_v31 }
 0x158   : > { %v882_v34 = vmax.f32 %v559_v28, 0.0  ;;  %v404_v28 = vpack.c.bf16 %v357_v25, %v356_v23 }
 0x159   : > { %v883_v36 = vmax.f32 %v728_v32, 0.0 }
 0x15a   : > { %v998_v39 = vpack.c.bf16 %v882_v34, %v880_v33 }
 0x15b   : > { %v999_v40 = vpack.c.bf16 %v883_v36, %v881_v35 }
 0x15c   : > { %1215 = vmatmul.bf16.gmra.mxu2 %v998_v39 }
 0x15d   : > { %1384 = vmatmul.bf16.gmra.mxu3 %v999_v40  ;;  %v561_v42 = vpop.f32.mrf.mxu0 }
 0x15e   : > { %v730_v43 = vpop.f32.mrf.mxu1  ;;  %v562_v44 = vadd.f32 %v561_v42, %v4516_v30 }
 0x15f   : > { %v731_v45 = vadd.f32 %v730_v43, %v4518_v31  ;;  %v358_v43 = vld [vmem:[%s4433_s24 + $0x110] sm:$0xff] }
 0x160   : > { %600 = vmatmul.bf16.gmra.mxu0 %v402_v41  ;;  %v884_v56 = vmax.f32 %v562_v44, 0.0  ;;  %v359_v44 = vld [vmem:[%s4433_s24 + $0x118] sm:$0xff] }
 0x161   : > { %769 = vmatmul.bf16.gmra.mxu1 %v402_v41  ;;  %v885_v62 = vmax.f32 %v731_v45, 0.0 }
 0x165   : > { %v563_v46 = vpop.f32.mrf.mxu0 }
 0x166   : > { %v564_v49 = vadd.f32 %v563_v46, %v4516_v30  ;;  %v732_v50 = vpop.f32.mrf.mxu1 }
 0x167   : > { %v733_v53 = vadd.f32 %v732_v50, %v4518_v31  ;;  %v405_v50 = vpack.c.bf16 %v359_v44, %v358_v43 }
 0x168   : > { %v886_v59 = vmax.f32 %v564_v49, 0.0  ;;  %v4574_v49 = vld [vmem:[#allocation10] ss:$0 sm:$0xff] }
 0x169   : > { %v887_v63 = vmax.f32 %v733_v53, 0.0 }
 0x16a   : > { %v1000_v4 = vpack.c.bf16 %v886_v59, %v884_v56 }
 0x16b   : > { %v1001_v5 = vpack.c.bf16 %v887_v63, %v885_v62 }
 0x16c   : > { %1220 = vmatmul.bf16.gmra.mxu2 %v1000_v4 }
 0x16d   : > { %1389 = vmatmul.bf16.gmra.mxu3 %v1001_v5  ;;  %v566_v7 = vpop.f32.mrf.mxu0 }
 0x16e   : > { %v735_v8 = vpop.f32.mrf.mxu1  ;;  %v567_v9 = vadd.f32 %v566_v7, %v4516_v30 }
 0x16f   : > { %v736_v12 = vadd.f32 %v735_v8, %v4518_v31 }
 0x170   : > { %605 = vmatmul.bf16.gmra.mxu0 %v403_v6  ;;  %v888_v17 = vmax.f32 %v567_v9, 0.0 }
 0x171   : > { %774 = vmatmul.bf16.gmra.mxu1 %v403_v6  ;;  %v889_v19 = vmax.f32 %v736_v12, 0.0 }
 0x175   : > { %v568_v13 = vpop.f32.mrf.mxu0 }
 0x176   : > { %v569_v14 = vadd.f32 %v568_v13, %v4516_v30  ;;  %v737_v15 = vpop.f32.mrf.mxu1 }
 0x177   : > { %v738_v16 = vadd.f32 %v737_v15, %v4518_v31 }
 0x178   : > { %v890_v18 = vmax.f32 %v569_v14, 0.0 }
 0x179   : > { %v891_v20 = vmax.f32 %v738_v16, 0.0 }
 0x17a   : > { %v1002_v26 = vpack.c.bf16 %v890_v18, %v888_v17 }
 0x17b   : > { %v1003_v27 = vpack.c.bf16 %v891_v20, %v889_v19  ;;  %v361_v19 = vld [vmem:[%s4433_s24 + $0x128] sm:$0xff] }
 0x17c   : > { %1225 = vmatmul.bf16.gmra.mxu2 %v1002_v26 }
 0x17d   : > { %1394 = vmatmul.bf16.gmra.mxu3 %v1003_v27  ;;  %v571_v29 = vpop.f32.mrf.mxu0 }
 0x17e   : > { %v740_v32 = vpop.f32.mrf.mxu1  ;;  %v572_v33 = vadd.f32 %v571_v29, %v4516_v30 }
 0x17f   : > { %v741_v34 = vadd.f32 %v740_v32, %v4518_v31 }
 0x180   : > { %610 = vmatmul.bf16.gmra.mxu0 %v404_v28  ;;  %v892_v39 = vmax.f32 %v572_v33, 0.0 }
 0x181   : > { %779 = vmatmul.bf16.gmra.mxu1 %v404_v28  ;;  %v893_v41 = vmax.f32 %v741_v34, 0.0 }
 0x185   : > { %v573_v35 = vpop.f32.mrf.mxu0 }
 0x186   : > { %v574_v36 = vadd.f32 %v573_v35, %v4516_v30  ;;  %v742_v37 = vpop.f32.mrf.mxu1 }
 0x187   : > { %v743_v38 = vadd.f32 %v742_v37, %v4518_v31 }
 0x188   : > { %v894_v40 = vmax.f32 %v574_v36, 0.0 }
 0x189   : > { %v895_v42 = vmax.f32 %v743_v38, 0.0 }
 0x18a   : > { %v1004_v45 = vpack.c.bf16 %v894_v40, %v892_v39 }
 0x18b   : > { %v1005_v46 = vpack.c.bf16 %v895_v42, %v893_v41 }
 0x18c   : > { %1230 = vmatmul.bf16.gmra.mxu2 %v1004_v45 }
 0x18d   : > { %1399 = vmatmul.bf16.gmra.mxu3 %v1005_v46  ;;  %v576_v53 = vpop.f32.mrf.mxu0 }
 0x18e   : > { %v745_v56 = vpop.f32.mrf.mxu1  ;;  %v577_v3 = vadd.f32 %v576_v53, %v4516_v30 }
 0x18f   : > { %v1191_v59 = vpop.f32.mrf.mxu2  ;;  %v746_v5 = vadd.f32 %v745_v56, %v4518_v31  ;;  %v363_v56 = vld [vmem:[%s4433_s24 + $0x138] sm:$0xff] }
 0x190   : > { %v1192_v62 = vadd.f32 %v4574_v49, %v1191_v59  ;;  %v1360_v63 = vpop.f32.mrf.mxu3  ;;  %615 = vmatmul.bf16.gmra.mxu0 %v405_v50  ;;  %v896_v13 = vmax.f32 %v577_v3, 0.0 }
 0x191   : > { %784 = vmatmul.bf16.gmra.mxu1 %v405_v50  ;;  %v897_v17 = vmax.f32 %v746_v5, 0.0 }
 0x192   : > { %v1361_v0 = vadd.f32 %v1360_v63, %v1192_v62 }
 0x194   : > { %v4579_v4 = vadd.f32 %v1361_v0, %v4448_v47  ;;  %v360_v47 = vld [vmem:[%s4433_s24 + $0x120] sm:$0xff] }
 0x195   : > { %v578_v6 = vpop.f32.mrf.mxu0  ;;  %v406_v27 = vpack.c.bf16 %v361_v19, %v360_v47 }
 0x196   : > { %v579_v7 = vadd.f32 %v578_v6, %v4516_v30  ;;  %v747_v8 = vpop.f32.mrf.mxu1  ;;  %1584 = vadd.xlane.f32.xlu0 %v4579_v4 }
 0x197   : > { %v748_v9 = vadd.f32 %v747_v8, %v4518_v31  ;;  %v1193_v12 = vpop.f32.mrf.mxu2 }
 0x198   : > { %v898_v14 = vmax.f32 %v579_v7, 0.0  ;;  %v1194_v15 = vadd.f32 %v4574_v49, %v1193_v12  ;;  %v1362_v16 = vpop.f32.mrf.mxu3 }
 0x199   : > { %v899_v18 = vmax.f32 %v748_v9, 0.0 }
 0x19a   : > { %v1363_v20 = vadd.f32 %v1362_v16, %v1194_v15  ;;  %v1006_v23 = vpack.c.bf16 %v898_v14, %v896_v13 }
 0x19b   : > { %v1007_v25 = vpack.c.bf16 %v899_v18, %v897_v17 }
 0x19c   : > { %1235 = vmatmul.bf16.gmra.mxu2 %v1006_v23  ;;  %v4589_v26 = vadd.f32 %v1363_v20, %v4451_v48 }
 0x19d   : > { %1404 = vmatmul.bf16.gmra.mxu3 %v1007_v25  ;;  %v581_v28 = vpop.f32.mrf.mxu0 }
 0x19e   : > { %v750_v29 = vpop.f32.mrf.mxu1  ;;  %1586 = vadd.xlane.f32.xlu0 %v4589_v26  ;;  %v582_v36 = vadd.f32 %v581_v28, %v4516_v30 }
 0x19f   : > { %v1196_v32 = vpop.f32.mrf.mxu2  ;;  %v751_v37 = vadd.f32 %v750_v29, %v4518_v31  ;;  %v365_v29 = vld [vmem:[%s4433_s24 + $0x148] sm:$0xff] }
 0x1a0   : > { %v1197_v33 = vadd.f32 %v4574_v49, %v1196_v32  ;;  %v1365_v34 = vpop.f32.mrf.mxu3  ;;  %620 = vmatmul.bf16.gmra.mxu0 %v406_v27  ;;  %v900_v43 = vmax.f32 %v582_v36, 0.0 }
 0x1a1   : > { %789 = vmatmul.bf16.gmra.mxu1 %v406_v27  ;;  %v901_v50 = vmax.f32 %v751_v37, 0.0 }
 0x1a2   : > { %v1366_v35 = vadd.f32 %v1365_v34, %v1197_v33 }
 0x1a4   : > { %v4595_v48 = vadd.f32 %v1366_v35, %v4456_v51  ;;  %v362_v51 = vld [vmem:[%s4433_s24 + $0x130] sm:$0xff] }
 0x1a5   : > { %v583_v38 = vpop.f32.mrf.mxu0  ;;  %v407_v3 = vpack.c.bf16 %v363_v56, %v362_v51 }
 0x1a6   : > { %v584_v39 = vadd.f32 %v583_v38, %v4516_v30  ;;  %v752_v40 = vpop.f32.mrf.mxu1  ;;  %1588 = vadd.xlane.f32.xlu1 %v4595_v48 }
 0x1a7   : > { %v753_v41 = vadd.f32 %v752_v40, %v4518_v31  ;;  %v1198_v42 = vpop.f32.mrf.mxu2 }
 0x1a8   : > { %v902_v44 = vmax.f32 %v584_v39, 0.0  ;;  %v1199_v45 = vadd.f32 %v4574_v49, %v1198_v42  ;;  %v1367_v46 = vpop.f32.mrf.mxu3 }
 0x1a9   : > { %v903_v53 = vmax.f32 %v753_v41, 0.0 }
 0x1aa   : > { %v1368_v59 = vadd.f32 %v1367_v46, %v1199_v45  ;;  %v1008_v62 = vpack.c.bf16 %v902_v44, %v900_v43 }
 0x1ab   : > { %v1009_v63 = vpack.c.bf16 %v903_v53, %v901_v50 }
 0x1ac   : > { %1240 = vmatmul.bf16.gmra.mxu2 %v1008_v62  ;;  %v4605_v0 = vadd.f32 %v1368_v59, %v4459_v52 }
 0x1ad   : > { %1409 = vmatmul.bf16.gmra.mxu3 %v1009_v63  ;;  %v586_v5 = vpop.f32.mrf.mxu0 }
 0x1ae   : > { %v755_v6 = vpop.f32.mrf.mxu1  ;;  %1590 = vadd.xlane.f32.xlu1 %v4605_v0  ;;  %v587_v13 = vadd.f32 %v586_v5, %v4516_v30 }
 0x1af   : > { %v1201_v7 = vpop.f32.mrf.mxu2  ;;  %v756_v14 = vadd.f32 %v755_v6, %v4518_v31  ;;  %v367_v6 = vld [vmem:[%s4433_s24 + $0x158] sm:$0xff] }
 0x1b0   : > { %v1202_v8 = vadd.f32 %v4574_v49, %v1201_v7  ;;  %v1370_v9 = vpop.f32.mrf.mxu3  ;;  %625 = vmatmul.bf16.gmra.mxu0 %v407_v3  ;;  %v904_v19 = vmax.f32 %v587_v13, 0.0 }
 0x1b1   : > { %794 = vmatmul.bf16.gmra.mxu1 %v407_v3  ;;  %v905_v27 = vmax.f32 %v756_v14, 0.0 }
 0x1b2   : > { %v1371_v12 = vadd.f32 %v1370_v9, %v1202_v8 }
 0x1b4   : > { %v4611_v52 = vadd.f32 %v1371_v12, %v4464_v54  ;;  %v364_v54 = vld [vmem:[%s4433_s24 + $0x140] sm:$0xff] }
 0x1b5   : > { %v588_v15 = vpop.f32.mrf.mxu0  ;;  %v408_v36 = vpack.c.bf16 %v365_v29, %v364_v54 }
 0x1b6   : > { %v589_v16 = vadd.f32 %v588_v15, %v4516_v30  ;;  %v757_v17 = vpop.f32.mrf.mxu1  ;;  %1592 = vadd.xlane.f32.xlu2 %v4611_v52 }
 0x1b7   : > { %v758_v18 = vadd.f32 %v757_v17, %v4518_v31  ;;  %v1203_v47 = vpop.f32.mrf.mxu2 }
 0x1b8   : > { %v906_v20 = vmax.f32 %v589_v16, 0.0  ;;  %v1204_v23 = vadd.f32 %v4574_v49, %v1203_v47  ;;  %v1372_v25 = vpop.f32.mrf.mxu3 }
 0x1b9   : > { %v907_v28 = vmax.f32 %v758_v18, 0.0 }
 0x1ba   : > { %v1373_v32 = vadd.f32 %v1372_v25, %v1204_v23  ;;  %v1010_v33 = vpack.c.bf16 %v906_v20, %v904_v19 }
 0x1bb   : > { %v1011_v34 = vpack.c.bf16 %v907_v28, %v905_v27 }
 0x1bc   : > { %1245 = vmatmul.bf16.gmra.mxu2 %v1010_v33  ;;  %v4621_v35 = vadd.f32 %v1373_v32, %v4467_v55 }
 0x1bd   : > { %1414 = vmatmul.bf16.gmra.mxu3 %v1011_v34  ;;  %v591_v37 = vpop.f32.mrf.mxu0 }
 0x1be   : > { %v760_v38 = vpop.f32.mrf.mxu1  ;;  %1594 = vadd.xlane.f32.xlu2 %v4621_v35  ;;  %v592_v43 = vadd.f32 %v591_v37, %v4516_v30 }
 0x1bf   : > { %v1206_v39 = vpop.f32.mrf.mxu2  ;;  %v761_v44 = vadd.f32 %v760_v38, %v4518_v31  ;;  %v369_v38 = vld [vmem:[%s4433_s24 + $0x168] sm:$0xff] }
 0x1c0   : > { %v1207_v40 = vadd.f32 %v4574_v49, %v1206_v39  ;;  %v1375_v41 = vpop.f32.mrf.mxu3  ;;  %630 = vmatmul.bf16.gmra.mxu0 %v408_v36  ;;  %v908_v56 = vmax.f32 %v592_v43, 0.0 }
 0x1c1   : > { %799 = vmatmul.bf16.gmra.mxu1 %v408_v36  ;;  %v909_v3 = vmax.f32 %v761_v44, 0.0 }
 0x1c2   : > { %v1376_v42 = vadd.f32 %v1375_v41, %v1207_v40 }
 0x1c4   : > { %v4627_v55 = vadd.f32 %v1376_v42, %v4472_v57  ;;  %v366_v57 = vld [vmem:[%s4433_s24 + $0x150] sm:$0xff] }
 0x1c5   : > { %v593_v45 = vpop.f32.mrf.mxu0  ;;  %v409_v13 = vpack.c.bf16 %v367_v6, %v366_v57 }
 0x1c6   : > { %v594_v46 = vadd.f32 %v593_v45, %v4516_v30  ;;  %v762_v50 = vpop.f32.mrf.mxu1  ;;  %1596 = vadd.xlane.f32.xlu0 %v4627_v55 }
 0x1c7   : > { %v763_v53 = vadd.f32 %v762_v50, %v4518_v31  ;;  %v1208_v51 = vpop.f32.mrf.mxu2 }
 0x1c8   : > { %v910_v59 = vmax.f32 %v594_v46, 0.0  ;;  %v1209_v62 = vadd.f32 %v4574_v49, %v1208_v51  ;;  %v1377_v63 = vpop.f32.mrf.mxu3 }
 0x1c9   : > { %v911_v5 = vmax.f32 %v763_v53, 0.0 }
 0x1ca   : > { %v1378_v7 = vadd.f32 %v1377_v63, %v1209_v62  ;;  %v1012_v8 = vpack.c.bf16 %v910_v59, %v908_v56 }
 0x1cb   : > { %v1013_v9 = vpack.c.bf16 %v911_v5, %v909_v3 }
 0x1cc   : > { %1250 = vmatmul.bf16.gmra.mxu2 %v1012_v8  ;;  %v4637_v12 = vadd.f32 %v1378_v7, %v4475_v58 }
 0x1cd   : > { %1419 = vmatmul.bf16.gmra.mxu3 %v1013_v9  ;;  %v596_v14 = vpop.f32.mrf.mxu0 }
 0x1ce   : > { %v765_v15 = vpop.f32.mrf.mxu1  ;;  %1598 = vadd.xlane.f32.xlu1 %v4637_v12  ;;  %v597_v19 = vadd.f32 %v596_v14, %v4516_v30 }
 0x1cf   : > { %v1211_v16 = vpop.f32.mrf.mxu2  ;;  %v766_v20 = vadd.f32 %v765_v15, %v4518_v31  ;;  %v371_v15 = vld [vmem:[%s4433_s24 + $0x178] sm:$0xff] }
 0x1d0   : > { %v1212_v17 = vadd.f32 %v4574_v49, %v1211_v16  ;;  %v1380_v18 = vpop.f32.mrf.mxu3  ;;  %635 = vmatmul.bf16.gmra.mxu0 %v409_v13  ;;  %v912_v29 = vmax.f32 %v597_v19, 0.0 }
 0x1d1   : > { %804 = vmatmul.bf16.gmra.mxu1 %v409_v13  ;;  %v913_v36 = vmax.f32 %v766_v20, 0.0 }
 0x1d2   : > { %v1381_v47 = vadd.f32 %v1380_v18, %v1212_v17 }
 0x1d4   : > { %v4643_v58 = vadd.f32 %v1381_v47, %v4480_v60  ;;  %v368_v60 = vld [vmem:[%s4433_s24 + $0x160] sm:$0xff] }
 0x1d5   : > { %v598_v23 = vpop.f32.mrf.mxu0  ;;  %v410_v43 = vpack.c.bf16 %v369_v38, %v368_v60 }
 0x1d6   : > { %v599_v25 = vadd.f32 %v598_v23, %v4516_v30  ;;  %v767_v27 = vpop.f32.mrf.mxu1  ;;  %1600 = vadd.xlane.f32.xlu2 %v4643_v58 }
 0x1d7   : > { %v768_v28 = vadd.f32 %v767_v27, %v4518_v31  ;;  %v1213_v54 = vpop.f32.mrf.mxu2 }
 0x1d8   : > { %v914_v32 = vmax.f32 %v599_v25, 0.0  ;;  %v1214_v33 = vadd.f32 %v4574_v49, %v1213_v54  ;;  %v1382_v34 = vpop.f32.mrf.mxu3  ;;  %v4248_v25 = vmov 128.0  }
 0x1d9   : > { %v915_v37 = vmax.f32 %v768_v28, 0.0  ;;  %3677 = vrcp.f32 %v4248_v25 }
 0x1da   : > { %v1383_v39 = vadd.f32 %v1382_v34, %v1214_v33  ;;  %v1014_v40 = vpack.c.bf16 %v914_v32, %v912_v29 }
 0x1db   : > { %v1015_v41 = vpack.c.bf16 %v915_v37, %v913_v36 }
 0x1dc   : > { %1255 = vmatmul.bf16.gmra.mxu2 %v1014_v40  ;;  %v4653_v42 = vadd.f32 %v1383_v39, %v4483_v61 }
 0x1dd   : > { %1424 = vmatmul.bf16.gmra.mxu3 %v1015_v41  ;;  %v601_v44 = vpop.f32.mrf.mxu0 }
 0x1de   : > { %v770_v45 = vpop.f32.mrf.mxu1  ;;  %1602 = vadd.xlane.f32.xlu0 %v4653_v42  ;;  %v602_v56 = vadd.f32 %v601_v44, %v4516_v30 }
 0x1df   : > { %v1216_v46 = vpop.f32.mrf.mxu2  ;;  %v771_v59 = vadd.f32 %v770_v45, %v4518_v31  ;;  %v3678_v32 = vpop.eup %3677 }
 0x1e0   : > { %v1217_v50 = vadd.f32 %v4574_v49, %v1216_v46  ;;  %v1385_v53 = vpop.f32.mrf.mxu3  ;;  %640 = vmatmul.bf16.gmra.mxu0 %v410_v43  ;;  %v916_v6 = vmax.f32 %v602_v56, 0.0  ;;  %v1713_v40 = vmul.f32 128.0, %v3678_v32  ;;  %vm1717_vm0 = vweird.f32 %v3678_v32 }
 0x1e1   : > { %809 = vmatmul.bf16.gmra.mxu1 %v410_v43  ;;  %v917_v13 = vmax.f32 %v771_v59, 0.0 }
 0x1e2   : > { %v1386_v51 = vadd.f32 %v1385_v53, %v1217_v50  ;;  %v372_v50 = vld [vmem:[%s4433_s24 + $0x180] sm:$0xff]  ;;  %v373_v53 = vld [vmem:[%s4433_s24 + $0x188] sm:$0xff] }
 0x1e4   : > { %v4659_v61 = vadd.f32 %v1386_v51, %v4488_v1  ;;  %v370_v1 = vld [vmem:[%s4433_s24 + $0x170] sm:$0xff] }
 0x1e5   : > { %v603_v62 = vpop.f32.mrf.mxu0  ;;  %v411_v19 = vpack.c.bf16 %v371_v15, %v370_v1 }
 0x1e6   : > { %v604_v63 = vadd.f32 %v603_v62, %v4516_v30  ;;  %v772_v3 = vpop.f32.mrf.mxu1  ;;  %1604 = vadd.xlane.f32.xlu1 %v4659_v61  ;;  %v1714_v62 = vsub.f32 1.0, %v1713_v40 }
 0x1e7   : > { %v773_v5 = vadd.f32 %v772_v3, %v4518_v31  ;;  %v1218_v57 = vpop.f32.mrf.mxu2  ;;  %v412_v3 = vpack.c.bf16 %v373_v53, %v372_v50 }
 0x1e8   : > { %v918_v7 = vmax.f32 %v604_v63, 0.0  ;;  %v1219_v8 = vadd.f32 %v4574_v49, %v1218_v57  ;;  %v1387_v9 = vpop.f32.mrf.mxu3 }
 0x1e9   : > { %v919_v14 = vmax.f32 %v773_v5, 0.0 }
 0x1ea   : > { %v1388_v16 = vadd.f32 %v1387_v9, %v1219_v8  ;;  %v1016_v17 = vpack.c.bf16 %v918_v7, %v916_v6  ;;  %v1715_v7 = vmul.f32 %v3678_v32, %v1714_v62 }
 0x1eb   : > { %v1017_v18 = vpack.c.bf16 %v919_v14, %v917_v13 }
 0x1ec   : > { %1260 = vmatmul.bf16.gmra.mxu2 %v1016_v17  ;;  %v4669_v47 = vadd.f32 %v1388_v16, %v4491_v2  ;;  %v1716_v14 = vadd.f32 %v3678_v32, %v1715_v7 }
 0x1ed   : > { %1429 = vmatmul.bf16.gmra.mxu3 %v1017_v18  ;;  %v606_v20 = vpop.f32.mrf.mxu0 }
 0x1ee   : > { %v775_v23 = vpop.f32.mrf.mxu1  ;;  %1606 = vadd.xlane.f32.xlu2 %v4669_v47  ;;  %v607_v33 = vadd.f32 %v606_v20, %v4516_v30 }
 0x1ef   : > { %v1221_v27 = vpop.f32.mrf.mxu2  ;;  %v776_v34 = vadd.f32 %v775_v23, %v4518_v31  ;;  %v4697_v23 = vsel %vm1717_vm0, %v3678_v32, %v1716_v14 }
 0x1f0   : > { %v1222_v28 = vadd.f32 %v4574_v49, %v1221_v27  ;;  %v1390_v54 = vpop.f32.mrf.mxu3  ;;  %645 = vmatmul.bf16.gmra.mxu0 %v411_v19  ;;  %v920_v41 = vmax.f32 %v607_v33, 0.0 }
 0x1f1   : > { %814 = vmatmul.bf16.gmra.mxu1 %v411_v19 }
 0x1f2   : > { %v1391_v29 = vadd.f32 %v1390_v54, %v1222_v28 }
 0x1f4   : > { %v4675_v2 = vadd.f32 %v1391_v29, %v4496_v10  ;;  %v921_v10 = vmax.f32 %v776_v34, 0.0  ;;  %v374_v34 = vld [vmem:[%s4433_s24 + $0x190] sm:$0xff] }
 0x1f5   : > { %v608_v36 = vpop.f32.mrf.mxu0 }
 0x1f6   : > { %v609_v37 = vadd.f32 %v608_v36, %v4516_v30  ;;  %v777_v60 = vpop.f32.mrf.mxu1  ;;  %1608 = vadd.xlane.f32.xlu0 %v4675_v2  ;;  %v375_v36 = vld [vmem:[%s4433_s24 + $0x198] sm:$0xff] }
 0x1f7   : > { %v778_v38 = vadd.f32 %v777_v60, %v4518_v31  ;;  %v1223_v39 = vpop.f32.mrf.mxu2 }
 0x1f8   : > { %v922_v43 = vmax.f32 %v609_v37, 0.0  ;;  %v1224_v44 = vadd.f32 %v4574_v49, %v1223_v39  ;;  %v1392_v45 = vpop.f32.mrf.mxu3 }
 0x1f9   : > { %v923_v46 = vmax.f32 %v778_v38, 0.0 }
 0x1fa   : > { %v1393_v51 = vadd.f32 %v1392_v45, %v1224_v44  ;;  %v1018_v56 = vpack.c.bf16 %v922_v43, %v920_v41  ;;  %v413_v41 = vpack.c.bf16 %v375_v36, %v374_v34  ;;  %v3935_v34 = vld [vmem:[%s4433_s24 + $0x88] sm:$0xff] }
 0x1fb   : > { %v1019_v59 = vpack.c.bf16 %v923_v46, %v921_v10 }
 0x1fc   : > { %1265 = vmatmul.bf16.gmra.mxu2 %v1018_v56  ;;  %v4685_v63 = vadd.f32 %v1393_v51, %v4499_v11 }
 0x1fd   : > { %1434 = vmatmul.bf16.gmra.mxu3 %v1019_v59  ;;  %v611_v5 = vpop.f32.mrf.mxu0 }
 0x1fe   : > { %v780_v57 = vpop.f32.mrf.mxu1  ;;  %1610 = vadd.xlane.f32.xlu1 %v4685_v63  ;;  %v612_v1 = vadd.f32 %v611_v5, %v4516_v30 }
 0x1ff   : > { %v1226_v6 = vpop.f32.mrf.mxu2  ;;  %v781_v15 = vadd.f32 %v780_v57, %v4518_v31 }
 0x200   : > { %v1227_v8 = vadd.f32 %v4574_v49, %v1226_v6  ;;  %v1395_v9 = vpop.f32.mrf.mxu3  ;;  %650 = vmatmul.bf16.gmra.mxu0 %v412_v3  ;;  %v924_v25 = vmax.f32 %v612_v1, 0.0 }
 0x201   : > { %819 = vmatmul.bf16.gmra.mxu1 %v412_v3  ;;  %v925_v54 = vmax.f32 %v781_v15, 0.0 }
 0x202   : > { %v1396_v13 = vadd.f32 %v1395_v9, %v1227_v8 }
 0x204   : > { %v4691_v11 = vadd.f32 %v1396_v13, %v4504_v21 }
 0x205   : > { %v613_v16 = vpop.f32.mrf.mxu0 }
 0x206   : > { %v614_v17 = vadd.f32 %v613_v16, %v4516_v30  ;;  %v782_v18 = vpop.f32.mrf.mxu1  ;;  %1612 = vadd.xlane.f32.xlu2 %v4691_v11 }
 0x207   : > { %v783_v19 = vadd.f32 %v782_v18, %v4518_v31  ;;  %v1228_v20 = vpop.f32.mrf.mxu2 }
 0x208   : > { %v926_v27 = vmax.f32 %v614_v17, 0.0  ;;  %v1229_v21 = vadd.f32 %v4574_v49, %v1228_v20  ;;  %v1397_v28 = vpop.f32.mrf.mxu3  ;;  %v377_v17 = vld [vmem:[%s4433_s24 + $0x1a8] sm:$0xff] }
 0x209   : > { %v927_v29 = vmax.f32 %v783_v19, 0.0  ;;  %v1585_v33 = vpop.xlane.xlu0 %1584 }
 0x20a   : > { %v1398_v37 = vadd.f32 %v1397_v28, %v1229_v21  ;;  %v1719_v60 = vmul.f32 %v4697_v23, %v1585_v33  ;;  %v1020_v38 = vpack.c.bf16 %v926_v27, %v924_v25 }
 0x20b   : > { %v1021_v39 = vpack.c.bf16 %v927_v29, %v925_v54 }
 0x20c   : > { %v4704_v40 = vsub.f32 %v4579_v4, %v1719_v60  ;;  %1270 = vmatmul.bf16.gmra.mxu2 %v1020_v38  ;;  %v4707_v32 = vadd.f32 %v1398_v37, %v4507_v22 }
 0x20d   : > { %1439 = vmatmul.bf16.gmra.mxu3 %v1021_v39  ;;  %v616_v43 = vpop.f32.mrf.mxu0 }
 0x20e   : > { %v785_v44 = vpop.f32.mrf.mxu1  ;;  %1614 = vadd.xlane.f32.xlu0 %v4707_v32  ;;  %v1847_v45 = vmul.f32 %v4704_v40, %v4704_v40  ;;  %v617_v51 = vadd.f32 %v616_v43, %v4516_v30 }
 0x20f   : > { %v1231_v10 = vpop.f32.mrf.mxu2  ;;  %v786_v59 = vadd.f32 %v785_v44, %v4518_v31 }
 0x210   : > { %v1232_v46 = vadd.f32 %v4574_v49, %v1231_v10  ;;  %v1400_v50 = vpop.f32.mrf.mxu3  ;;  %655 = vmatmul.bf16.gmra.mxu0 %v413_v41  ;;  %1911 = vadd.xlane.f32.xlu1 %v1847_v45  ;;  %v928_v9 = vmax.f32 %v617_v51, 0.0 }
 0x211   : > { %824 = vmatmul.bf16.gmra.mxu1 %v413_v41  ;;  %v1587_v4 = vpop.xlane.xlu0 %1586  ;;  %v929_v1 = vmax.f32 %v786_v59, 0.0 }
 0x212   : > { %v1401_v53 = vadd.f32 %v1400_v50, %v1232_v46  ;;  %v1720_v22 = vmul.f32 %v4697_v23, %v1587_v4  ;;  %v3936_v50 = vld [vmem:[%s4433_s24 + $0x90] sm:$0xff] }
 0x214   : > { %v4716_v56 = vsub.f32 %v4589_v26, %v1720_v22  ;;  %v4721_v57 = vadd.f32 %v1401_v53, %v4512_v24  ;;  %v376_v24 = vld [vmem:[%s4433_s24 + $0x1a0] sm:$0xff] }
 0x215   : > { %v618_v62 = vpop.f32.mrf.mxu0  ;;  %v414_v21 = vpack.c.bf16 %v377_v17, %v376_v24 }
 0x216   : > { %v619_v3 = vadd.f32 %v618_v62, %v4516_v30  ;;  %v787_v5 = vpop.f32.mrf.mxu1  ;;  %v1848_v6 = vmul.f32 %v4716_v56, %v4716_v56 }
 0x217   : > { %v788_v7 = vadd.f32 %v787_v5, %v4518_v31  ;;  %v1233_v8 = vpop.f32.mrf.mxu2 }
 0x218   : > { %v930_v26 = vmax.f32 %v619_v3, 0.0  ;;  %v1234_v13 = vadd.f32 %v4574_v49, %v1233_v8  ;;  %v1402_v14 = vpop.f32.mrf.mxu3  ;;  %1616 = vadd.xlane.f32.xlu1 %v4721_v57  ;;  %1913 = vadd.xlane.f32.xlu2 %v1848_v6  ;;  %v378_v8 = vld [vmem:[%s4433_s24 + $0x1b0] sm:$0xff] }
 0x219   : > { %v931_v15 = vmax.f32 %v788_v7, 0.0  ;;  %v1589_v16 = vpop.xlane.xlu1 %1588 }
 0x21a   : > { %v1721_v18 = vmul.f32 %v4697_v23, %v1589_v16  ;;  %v1022_v19 = vpack.c.bf16 %v930_v26, %v928_v9  ;;  %v1403_v20 = vadd.f32 %v1402_v14, %v1234_v13  ;;  %v379_v9 = vld [vmem:[%s4433_s24 + $0x1b8] sm:$0xff] }
 0x21b   : > { %v1023_v25 = vpack.c.bf16 %v931_v15, %v929_v1  ;;  %v415_v16 = vpack.c.bf16 %v379_v9, %v378_v8 }
 0x21c   : > { %v4732_v27 = vsub.f32 %v4595_v48, %v1721_v18  ;;  %1275 = vmatmul.bf16.gmra.mxu2 %v1022_v19  ;;  %v4737_v36 = vadd.f32 %v3935_v34, %v1403_v20  ;;  %v3937_v18 = vld [vmem:[%s4433_s24 + $0x98] sm:$0xff] }
 0x21d   : > { %1444 = vmatmul.bf16.gmra.mxu3 %v1023_v25  ;;  %v621_v28 = vpop.f32.mrf.mxu0 }
 0x21e   : > { %v790_v54 = vpop.f32.mrf.mxu1  ;;  %v1849_v29 = vmul.f32 %v4732_v27, %v4732_v27  ;;  %v622_v41 = vadd.f32 %v621_v28, %v4516_v30 }
 0x21f   : > { %v1236_v33 = vpop.f32.mrf.mxu2  ;;  %v791_v44 = vadd.f32 %v790_v54, %v4518_v31 }
 0x220   : > { %v1237_v37 = vadd.f32 %v4574_v49, %v1236_v33  ;;  %v1405_v60 = vpop.f32.mrf.mxu3  ;;  %660 = vmatmul.bf16.gmra.mxu0 %v414_v21  ;;  %1915 = vadd.xlane.f32.xlu0 %v1849_v29  ;;  %v932_v59 = vmax.f32 %v622_v41, 0.0 }
 0x221   : > { %829 = vmatmul.bf16.gmra.mxu1 %v414_v21  ;;  %1618 = vadd.xlane.f32.xlu2 %v4737_v36  ;;  %v1591_v48 = vpop.xlane.xlu1 %1590  ;;  %v933_v5 = vmax.f32 %v791_v44, 0.0 }
 0x222   : > { %v1406_v38 = vadd.f32 %v1405_v60, %v1237_v37  ;;  %v1722_v39 = vmul.f32 %v4697_v23, %v1591_v48 }
 0x224   : > { %v4744_v43 = vsub.f32 %v4605_v0, %v1722_v39  ;;  %v4749_v4 = vadd.f32 %v3936_v50, %v1406_v38 }
 0x225   : > { %v623_v45 = vpop.f32.mrf.mxu0 }
 0x226   : > { %v624_v10 = vadd.f32 %v623_v45, %v4516_v30  ;;  %v792_v46 = vpop.f32.mrf.mxu1  ;;  %v1850_v53 = vmul.f32 %v4744_v43, %v4744_v43  ;;  %v3938_v45 = vld [vmem:[%s4433_s24 + $0xa0] sm:$0xff] }
 0x227   : > { %v793_v22 = vadd.f32 %v792_v46, %v4518_v31  ;;  %v1238_v51 = vpop.f32.mrf.mxu2 }
 0x228   : > { %v934_v0 = vmax.f32 %v624_v10, 0.0  ;;  %v1239_v62 = vadd.f32 %v4574_v49, %v1238_v51  ;;  %v1407_v3 = vpop.f32.mrf.mxu3  ;;  %1620 = vadd.xlane.f32.xlu0 %v4749_v4  ;;  %1917 = vadd.xlane.f32.xlu1 %v1850_v53 }
 0x229   : > { %v935_v6 = vmax.f32 %v793_v22, 0.0  ;;  %v1593_v7 = vpop.xlane.xlu2 %1592 }
 0x22a   : > { %v1408_v26 = vadd.f32 %v1407_v3, %v1239_v62  ;;  %v1723_v13 = vmul.f32 %v4697_v23, %v1593_v7  ;;  %v1024_v14 = vpack.c.bf16 %v934_v0, %v932_v59  ;;  %v380_v0 = vld [vmem:[%s4433_s24 + $0x1c0] sm:$0xff]  ;;  %v381_v62 = vld [vmem:[%s4433_s24 + $0x1c8] sm:$0xff] }
 0x22b   : > { %v1025_v1 = vpack.c.bf16 %v935_v6, %v933_v5  ;;  %v416_v9 = vpack.c.bf16 %v381_v62, %v380_v0 }
 0x22c   : > { %v4760_v15 = vsub.f32 %v4611_v52, %v1723_v13  ;;  %1280 = vmatmul.bf16.gmra.mxu2 %v1024_v14  ;;  %v4763_v19 = vadd.f32 %v3937_v18, %v1408_v26  ;;  %v3939_v14 = vld [vmem:[%s4433_s24 + $0xa8] sm:$0xff] }
 0x22d   : > { %1449 = vmatmul.bf16.gmra.mxu3 %v1025_v1  ;;  %v626_v24 = vpop.f32.mrf.mxu0 }
 0x22e   : > { %v795_v17 = vpop.f32.mrf.mxu1  ;;  %v1851_v20 = vmul.f32 %v4760_v15, %v4760_v15  ;;  %v627_v33 = vadd.f32 %v626_v24, %v4516_v30 }
 0x22f   : > { %v1241_v25 = vpop.f32.mrf.mxu2  ;;  %v796_v37 = vadd.f32 %v795_v17, %v4518_v31 }
 0x230   : > { %v1242_v21 = vadd.f32 %v4574_v49, %v1241_v25  ;;  %v1410_v28 = vpop.f32.mrf.mxu3  ;;  %665 = vmatmul.bf16.gmra.mxu0 %v415_v16  ;;  %1622 = vadd.xlane.f32.xlu1 %v4763_v19  ;;  %v936_v46 = vmax.f32 %v627_v33, 0.0 }
 0x231   : > { %834 = vmatmul.bf16.gmra.mxu1 %v415_v16  ;;  %1919 = vadd.xlane.f32.xlu2 %v1851_v20  ;;  %v1595_v52 = vpop.xlane.xlu2 %1594  ;;  %v937_v22 = vmax.f32 %v796_v37, 0.0 }
 0x232   : > { %v1724_v54 = vmul.f32 %v4697_v23, %v1595_v52  ;;  %v1411_v29 = vadd.f32 %v1410_v28, %v1242_v21 }
 0x234   : > { %v4772_v34 = vsub.f32 %v4621_v35, %v1724_v54  ;;  %v4780_v10 = vadd.f32 %v3938_v45, %v1411_v29 }
 0x235   : > { %v628_v60 = vpop.f32.mrf.mxu0 }
 0x236   : > { %v629_v48 = vadd.f32 %v628_v60, %v4516_v30  ;;  %v797_v38 = vpop.f32.mrf.mxu1  ;;  %v1852_v39 = vmul.f32 %v4772_v34, %v4772_v34 }
 0x237   : > { %v798_v41 = vadd.f32 %v797_v38, %v4518_v31  ;;  %v1243_v44 = vpop.f32.mrf.mxu2  ;;  %v3940_v38 = vld [vmem:[%s4433_s24 + $0xb0] sm:$0xff] }
 0x238   : > { %v938_v35 = vmax.f32 %v629_v48, 0.0  ;;  %v1244_v50 = vadd.f32 %v4574_v49, %v1243_v44  ;;  %v1412_v53 = vpop.f32.mrf.mxu3  ;;  %1921 = vadd.xlane.f32.xlu0 %v1852_v39 }
 0x239   : > { %v939_v51 = vmax.f32 %v798_v41, 0.0  ;;  %1624 = vadd.xlane.f32.xlu2 %v4780_v10  ;;  %v1597_v59 = vpop.xlane.xlu0 %1596 }
 0x23a   : > { %v1413_v3 = vadd.f32 %v1412_v53, %v1244_v50  ;;  %v1725_v5 = vmul.f32 %v4697_v23, %v1597_v59  ;;  %v1026_v6 = vpack.c.bf16 %v938_v35, %v936_v46  ;;  %v382_v53 = vld [vmem:[%s4433_s24 + $0x1d0] sm:$0xff] }
 0x23b   : > { %v1027_v7 = vpack.c.bf16 %v939_v51, %v937_v22  ;;  %v383_v22 = vld [vmem:[%s4433_s24 + $0x1d8] sm:$0xff] }
 0x23c   : > { %v4788_v8 = vsub.f32 %v4627_v55, %v1725_v5  ;;  %1285 = vmatmul.bf16.gmra.mxu2 %v1026_v6  ;;  %v4791_v1 = vadd.f32 %v3939_v14, %v1413_v3  ;;  %v417_v5 = vpack.c.bf16 %v383_v22, %v382_v53 }
 0x23d   : > { %1454 = vmatmul.bf16.gmra.mxu3 %v1027_v7  ;;  %v631_v26 = vpop.f32.mrf.mxu0 }
 0x23e   : > { %v800_v13 = vpop.f32.mrf.mxu1  ;;  %v1853_v16 = vmul.f32 %v4788_v8, %v4788_v8  ;;  %v632_v21 = vadd.f32 %v631_v26, %v4516_v30 }
 0x23f   : > { %v1246_v24 = vpop.f32.mrf.mxu2  ;;  %v801_v52 = vadd.f32 %v800_v13, %v4518_v31  ;;  %v3941_v13 = vld [vmem:[%s4433_s24 + $0xb8] sm:$0xff] }
 0x240   : > { %v1247_v17 = vadd.f32 %v4574_v49, %v1246_v24  ;;  %v1415_v18 = vpop.f32.mrf.mxu3  ;;  %670 = vmatmul.bf16.gmra.mxu0 %v416_v9  ;;  %1626 = vadd.xlane.f32.xlu0 %v4791_v1  ;;  %v940_v41 = vmax.f32 %v632_v21, 0.0 }
 0x241   : > { %839 = vmatmul.bf16.gmra.mxu1 %v416_v9  ;;  %1923 = vadd.xlane.f32.xlu1 %v1853_v16  ;;  %v1599_v55 = vpop.xlane.xlu1 %1598  ;;  %v941_v46 = vmax.f32 %v801_v52, 0.0 }
 0x242   : > { %v1726_v20 = vmul.f32 %v4697_v23, %v1599_v55  ;;  %v1416_v25 = vadd.f32 %v1415_v18, %v1247_v17 }
 0x244   : > { %v4800_v28 = vsub.f32 %v4637_v12, %v1726_v20  ;;  %v4808_v39 = vadd.f32 %v3940_v38, %v1416_v25 }
 0x245   : > { %v633_v54 = vpop.f32.mrf.mxu0 }
 0x246   : > { %v634_v29 = vadd.f32 %v633_v54, %v4516_v30  ;;  %v802_v33 = vpop.f32.mrf.mxu1  ;;  %v1854_v37 = vmul.f32 %v4800_v28, %v4800_v28 }
 0x247   : > { %v803_v60 = vadd.f32 %v802_v33, %v4518_v31  ;;  %v1248_v48 = vpop.f32.mrf.mxu2 }
 0x248   : > { %v942_v12 = vmax.f32 %v634_v29, 0.0  ;;  %v1249_v44 = vadd.f32 %v4574_v49, %v1248_v48  ;;  %v1417_v45 = vpop.f32.mrf.mxu3  ;;  %1925 = vadd.xlane.f32.xlu2 %v1854_v37  ;;  %v3942_v29 = vld [vmem:[%s4433_s24 + $0xc0] sm:$0xff] }
 0x249   : > { %v943_v35 = vmax.f32 %v803_v60, 0.0  ;;  %1628 = vadd.xlane.f32.xlu1 %v4808_v39  ;;  %v1601_v50 = vpop.xlane.xlu2 %1600 }
 0x24a   : > { %v1028_v51 = vpack.c.bf16 %v942_v12, %v940_v41  ;;  %v1727_v59 = vmul.f32 %v4697_v23, %v1601_v50  ;;  %v1418_v62 = vadd.f32 %v1417_v45, %v1249_v44  ;;  %v385_v50 = vld [vmem:[%s4433_s24 + $0x1e8] sm:$0xff] }
 0x24b   : > { %v1029_v0 = vpack.c.bf16 %v943_v35, %v941_v46  ;;  %v384_v35 = vld [vmem:[%s4433_s24 + $0x1e0] sm:$0xff] }
 0x24c   : > { %v4816_v3 = vsub.f32 %v4643_v58, %v1727_v59  ;;  %1290 = vmatmul.bf16.gmra.mxu2 %v1028_v51  ;;  %v4821_v14 = vadd.f32 %v3941_v13, %v1418_v62  ;;  %v418_v62 = vpack.c.bf16 %v385_v50, %v384_v35  ;;  %v386_v35 = vld [vmem:[%s4433_s24 + $0x1f0] sm:$0xff]  ;;  %v387_v50 = vld [vmem:[%s4433_s24 + $0x1f8] sm:$0xff] }
 0x24d   : > { %1459 = vmatmul.bf16.gmra.mxu3 %v1029_v0  ;;  %v636_v6 = vpop.f32.mrf.mxu0 }
 0x24e   : > { %v805_v7 = vpop.f32.mrf.mxu1  ;;  %v1855_v9 = vmul.f32 %v4816_v3, %v4816_v3  ;;  %v637_v55 = vadd.f32 %v636_v6, %v4516_v30 }
 0x24f   : > { %v1251_v26 = vpop.f32.mrf.mxu2  ;;  %v806_v25 = vadd.f32 %v805_v7, %v4518_v31 }
 0x250   : > { %v1252_v16 = vadd.f32 %v4574_v49, %v1251_v26  ;;  %v1420_v24 = vpop.f32.mrf.mxu3  ;;  %675 = vmatmul.bf16.gmra.mxu0 %v417_v5  ;;  %1927 = vadd.xlane.f32.xlu0 %v1855_v9  ;;  %v944_v38 = vmax.f32 %v637_v55, 0.0  ;;  %v3943_v26 = vld [vmem:[%s4433_s24 + $0xc8] sm:$0xff] }
 0x251   : > { %844 = vmatmul.bf16.gmra.mxu1 %v417_v5  ;;  %1630 = vadd.xlane.f32.xlu2 %v4821_v14  ;;  %v1603_v58 = vpop.xlane.xlu0 %1602  ;;  %v945_v44 = vmax.f32 %v806_v25, 0.0 }
 0x252   : > { %v1421_v17 = vadd.f32 %v1420_v24, %v1252_v16  ;;  %v1728_v18 = vmul.f32 %v4697_v23, %v1603_v58 }
 0x254   : > { %v4828_v20 = vsub.f32 %v4653_v42, %v1728_v18  ;;  %v4833_v33 = vadd.f32 %v3942_v29, %v1421_v17  ;;  %v3944_v29 = vld [vmem:[%s4433_s24 + $0xd0] sm:$0xff] }
 0x255   : > { %v638_v21 = vpop.f32.mrf.mxu0 }
 0x256   : > { %v639_v52 = vadd.f32 %v638_v21, %v4516_v30  ;;  %v807_v54 = vpop.f32.mrf.mxu1  ;;  %v1856_v37 = vmul.f32 %v4828_v20, %v4828_v20 }
 0x257   : > { %v808_v60 = vadd.f32 %v807_v54, %v4518_v31  ;;  %v1253_v48 = vpop.f32.mrf.mxu2 }
 0x258   : > { %v946_v42 = vmax.f32 %v639_v52, 0.0  ;;  %v1254_v41 = vadd.f32 %v4574_v49, %v1253_v48  ;;  %v1422_v12 = vpop.f32.mrf.mxu3  ;;  %1632 = vadd.xlane.f32.xlu0 %v4833_v33  ;;  %1929 = vadd.xlane.f32.xlu1 %v1856_v37 }
 0x259   : > { %v947_v45 = vmax.f32 %v808_v60, 0.0  ;;  %v1605_v46 = vpop.xlane.xlu1 %1604 }
 0x25a   : > { %v1030_v53 = vpack.c.bf16 %v946_v42, %v944_v38  ;;  %v1729_v22 = vmul.f32 %v4697_v23, %v1605_v46  ;;  %v1423_v59 = vadd.f32 %v1422_v12, %v1254_v41  ;;  %v4866_v42 = vld [vmem:[#allocation10] ss:$0 sm:$0xff] }
 0x25b   : > { %v1031_v51 = vpack.c.bf16 %v947_v45, %v945_v44 }
 0x25c   : > { %v4844_v0 = vsub.f32 %v4659_v61, %v1729_v22  ;;  %1295 = vmatmul.bf16.gmra.mxu2 %v1030_v53  ;;  %v4849_v13 = vadd.f32 %v3943_v26, %v1423_v59 }
 0x25d   : > { %1464 = vmatmul.bf16.gmra.mxu3 %v1031_v51  ;;  %v641_v5 = vpop.f32.mrf.mxu0 }
 0x25e   : > { %v810_v6 = vpop.f32.mrf.mxu1  ;;  %v1857_v7 = vmul.f32 %v4844_v0, %v4844_v0  ;;  %v642_v18 = vadd.f32 %v641_v5, %v4516_v30  ;;  %v419_v5 = vpack.c.bf16 %v387_v50, %v386_v35 }
 0x25f   : > { %v1256_v9 = vpop.f32.mrf.mxu2  ;;  %v811_v25 = vadd.f32 %v810_v6, %v4518_v31 }
 0x260   : > { %v1257_v16 = vadd.f32 %v4574_v49, %v1256_v9  ;;  %v1425_v24 = vpop.f32.mrf.mxu3  ;;  %680 = vmatmul.bf16.gmra.mxu0 %v418_v62  ;;  %1931 = vadd.xlane.f32.xlu2 %v1857_v7  ;;  %v948_v38 = vmax.f32 %v642_v18, 0.0  ;;  %v3946_v9 = vld [vmem:[%s4433_s24 + $0xd8] sm:$0xff] }
 0x261   : > { %849 = vmatmul.bf16.gmra.mxu1 %v418_v62  ;;  %1634 = vadd.xlane.f32.xlu1 %v4849_v13  ;;  %v1607_v61 = vpop.xlane.xlu2 %1606  ;;  %v949_v44 = vmax.f32 %v811_v25, 0.0 }
 0x262   : > { %v1426_v58 = vadd.f32 %v1425_v24, %v1257_v16  ;;  %v1730_v17 = vmul.f32 %v4697_v23, %v1607_v61 }
 0x264   : > { %v4856_v55 = vsub.f32 %v4669_v47, %v1730_v17  ;;  %v4863_v37 = vadd.f32 %v3944_v29, %v1426_v58 }
 0x265   : > { %v643_v21 = vpop.f32.mrf.mxu0 }
 0x266   : > { %v644_v49 = vadd.f32 %v643_v21, %v4516_v30  ;;  %v812_v52 = vpop.f32.mrf.mxu1  ;;  %v1858_v54 = vmul.f32 %v4856_v55, %v4856_v55 }
 0x267   : > { %v813_v60 = vadd.f32 %v812_v52, %v4518_v31  ;;  %v1258_v48 = vpop.f32.mrf.mxu2 }
 0x268   : > { %v950_v47 = vmax.f32 %v644_v49, 0.0  ;;  %v1259_v41 = vadd.f32 %v4866_v42, %v1258_v48  ;;  %v1427_v12 = vpop.f32.mrf.mxu3  ;;  %1933 = vadd.xlane.f32.xlu0 %v1858_v54  ;;  %1636 = vadd.xlane.f32.xlu2 %v4863_v37 }
 0x269   : > { %v951_v45 = vmax.f32 %v813_v60, 0.0  ;;  %v1609_v46 = vpop.xlane.xlu0 %1608 }
 0x26a   : > { %v1032_v53 = vpack.c.bf16 %v950_v47, %v948_v38  ;;  %v1428_v22 = vadd.f32 %v1427_v12, %v1259_v41  ;;  %v1731_v51 = vmul.f32 %v4697_v23, %v1609_v46  ;;  %v3947_v47 = vld [vmem:[%s4433_s24 + $0xe0] sm:$0xff] }
 0x26b   : > { %v1033_v59 = vpack.c.bf16 %v951_v45, %v949_v44 }
 0x26c   : > { %v4874_v62 = vsub.f32 %v4675_v2, %v1731_v51  ;;  %1300 = vmatmul.bf16.gmra.mxu2 %v1032_v53  ;;  %v4877_v26 = vadd.f32 %v3946_v9, %v1428_v22 }
 0x26d   : > { %1469 = vmatmul.bf16.gmra.mxu3 %v1033_v59  ;;  %v646_v6 = vpop.f32.mrf.mxu0 }
 0x26e   : > { %v815_v7 = vpop.f32.mrf.mxu1  ;;  %v1859_v16 = vmul.f32 %v4874_v62, %v4874_v62  ;;  %v647_v25 = vadd.f32 %v646_v6, %v4516_v30 }
 0x26f   : > { %v1261_v24 = vpop.f32.mrf.mxu2  ;;  %v816_v49 = vadd.f32 %v815_v7, %v4518_v31 }
 0x270   : > { %v1262_v61 = vadd.f32 %v4866_v42, %v1261_v24  ;;  %v1430_v58 = vpop.f32.mrf.mxu3  ;;  %685 = vmatmul.bf16.gmra.mxu0 %v419_v5  ;;  %1638 = vadd.xlane.f32.xlu0 %v4877_v26  ;;  %v952_v12 = vmax.f32 %v647_v25, 0.0 }
 0x271   : > { %854 = vmatmul.bf16.gmra.mxu1 %v419_v5  ;;  %1935 = vadd.xlane.f32.xlu1 %v1859_v16  ;;  %v1611_v2 = vpop.xlane.xlu1 %1610  ;;  %v953_v46 = vmax.f32 %v816_v49, 0.0  ;;  %v3948_v16 = vld [vmem:[%s4433_s24 + $0xe8] sm:$0xff] }
 0x272   : > { %v1732_v17 = vmul.f32 %v4697_v23, %v1611_v2  ;;  %v1431_v18 = vadd.f32 %v1430_v58, %v1262_v61 }
 0x274   : > { %v4886_v21 = vsub.f32 %v4685_v63, %v1732_v17  ;;  %v4894_v41 = vadd.f32 %v3947_v47, %v1431_v18 }
 0x275   : > { %v648_v52 = vpop.f32.mrf.mxu0 }
 0x276   : > { %v649_v54 = vadd.f32 %v648_v52, %v4516_v30  ;;  %v817_v29 = vpop.f32.mrf.mxu1  ;;  %v1860_v60 = vmul.f32 %v4886_v21, %v4886_v21 }
 0x277   : > { %v818_v48 = vadd.f32 %v817_v29, %v4518_v31  ;;  %v1263_v38 = vpop.f32.mrf.mxu2 }
 0x278   : > { %v954_v44 = vmax.f32 %v649_v54, 0.0  ;;  %v1264_v63 = vadd.f32 %v4866_v42, %v1263_v38  ;;  %v1432_v45 = vpop.f32.mrf.mxu3  ;;  %1937 = vadd.xlane.f32.xlu2 %v1860_v60  ;;  %v3949_v38 = vld [vmem:[%s4433_s24 + $0xf0] sm:$0xff] }
 0x279   : > { %v955_v35 = vmax.f32 %v818_v48, 0.0  ;;  %1640 = vadd.xlane.f32.xlu1 %v4894_v41  ;;  %v1613_v50 = vpop.xlane.xlu2 %1612 }
 0x27a   : > { %v1034_v53 = vpack.c.bf16 %v954_v44, %v952_v12  ;;  %v1433_v22 = vadd.f32 %v1432_v45, %v1264_v63  ;;  %v1733_v51 = vmul.f32 %v4697_v23, %v1613_v50 }
 0x27b   : > { %v1035_v59 = vpack.c.bf16 %v955_v35, %v953_v46 }
 0x27c   : > { %v4900_v5 = vsub.f32 %v4691_v11, %v1733_v51  ;;  %1305 = vmatmul.bf16.gmra.mxu2 %v1034_v53  ;;  %v4905_v24 = vadd.f32 %v3948_v16, %v1433_v22 }
 0x27d   : > { %1474 = vmatmul.bf16.gmra.mxu3 %v1035_v59  ;;  %v651_v6 = vpop.f32.mrf.mxu0 }
 0x27e   : > { %v820_v7 = vpop.f32.mrf.mxu1  ;;  %v1861_v9 = vmul.f32 %v4900_v5, %v4900_v5  ;;  %v652_v54 = vadd.f32 %v651_v6, %v4516_v30 }
 0x27f   : > { %v1266_v61 = vpop.f32.mrf.mxu2  ;;  %v821_v29 = vadd.f32 %v820_v7, %v4518_v31 }
 0x280   : > { %v1267_v58 = vadd.f32 %v4866_v42, %v1266_v61  ;;  %v1435_v2 = vpop.f32.mrf.mxu3  ;;  %1939 = vadd.xlane.f32.xlu0 %v1861_v9  ;;  %1642 = vadd.xlane.f32.xlu2 %v4905_v24  ;;  %v956_v35 = vmax.f32 %v652_v54, 0.0 }
 0x281   : > { %v1615_v11 = vpop.xlane.xlu0 %1614  ;;  %v957_v50 = vmax.f32 %v821_v29, 0.0  ;;  %v3950_v29 = vld [vmem:[%s4433_s24 + $0xf8] sm:$0xff] }
 0x282   : > { %v1436_v17 = vadd.f32 %v1435_v2, %v1267_v58  ;;  %v1734_v18 = vmul.f32 %v4697_v23, %v1615_v11 }
 0x283   : > { %v1912_v25 = vpop.xlane.xlu1 %1911 }
 0x284   : > { %v4911_v49 = vsub.f32 %v4707_v32, %v1734_v18  ;;  %v4913_v52 = vmul.f32 0.007874016, %v1912_v25  ;;  %v4919_v47 = vadd.f32 %v3949_v38, %v1436_v17 }
 0x285   : > { %v653_v60 = vpop.f32.mrf.mxu0 }
 0x286   : > { %3679 = vrsqrt.f32 %v4913_v52  ;;  %v822_v48 = vpop.f32.mrf.mxu1  ;;  %v654_v12 = vadd.f32 %v653_v60, %v4516_v30  ;;  %v1862_v32 = vmul.f32 %v4911_v49, %v4911_v49  ;;  %vm2110_vm1 = vcmp.eq.f32.partialorder %v4913_v52, inf }
 0x287   : > { %v823_v44 = vadd.f32 %v822_v48, %v4518_v31  ;;  %v1268_v63 = vpop.f32.mrf.mxu2  ;;  %vm2112_vm2 = vcmp.eq.f32.partialorder %v4913_v52, 0.0 }
 0x288   : > { %v1269_v45 = vadd.f32 %v4866_v42, %v1268_v63  ;;  %v1437_v46 = vpop.f32.mrf.mxu3  ;;  %1644 = vadd.xlane.f32.xlu0 %v4919_v47  ;;  %v958_v53 = vmax.f32 %v654_v12, 0.0  ;;  %1941 = vadd.xlane.f32.xlu1 %v1862_v32 }
 0x289   : > { %v959_v22 = vmax.f32 %v823_v44, 0.0 }
 0x28a   : > { %v1036_v51 = vpack.c.bf16 %v958_v53, %v956_v35  ;;  %v1438_v6 = vadd.f32 %v1437_v46, %v1269_v45 }
 0x28b   : > { %v1037_v59 = vpack.c.bf16 %v959_v22, %v957_v50  ;;  %v1617_v7 = vpop.xlane.xlu1 %1616  ;;  %v1914_v9 = vpop.xlane.xlu2 %1913 }
 0x28c   : > { %v3680_v16 = vpop.eup %3679  ;;  %v1735_v61 = vmul.f32 %v4697_v23, %v1617_v7  ;;  %v4928_v58 = vmul.f32 0.007874016, %v1914_v9  ;;  %1310 = vmatmul.bf16.gmra.mxu2 %v1036_v51  ;;  %v4936_v60 = vadd.f32 %v3950_v29, %v1438_v6  ;;  %v2113_v6 = vand.u32 2147483648, %v4913_v52 }
 0x28d   : > { %v2104_v2 = vmul.f32 %v3680_v16, %v4913_v52  ;;  %1479 = vmatmul.bf16.gmra.mxu3 %v1037_v59  ;;  %v656_v11 = vpop.f32.mrf.mxu0 }
 0x28e   : > { %v4932_v17 = vsub.f32 %v4721_v57, %v1735_v61  ;;  %3681 = vrsqrt.f32 %v4928_v58  ;;  %v825_v18 = vpop.f32.mrf.mxu1  ;;  %v657_v45 = vadd.f32 %v656_v11, %v4516_v30  ;;  %vm2122_vm3 = vcmp.eq.f32.partialorder %v4928_v58, inf }
 0x28f   : > { %v2105_v25 = vmul.f32 %v3680_v16, %v2104_v2  ;;  %v1271_v54 = vpop.f32.mrf.mxu2  ;;  %v826_v7 = vadd.f32 %v825_v18, %v4518_v31  ;;  %vm2124_vm4 = vcmp.eq.f32.partialorder %v4928_v58, 0.0 }
 0x290   : > { %v1272_v48 = vadd.f32 %v4866_v42, %v1271_v54  ;;  %v1440_v38 = vpop.f32.mrf.mxu3  ;;  %v1863_v12 = vmul.f32 %v4932_v17, %v4932_v17  ;;  %1646 = vadd.xlane.f32.xlu1 %v4936_v60  ;;  %v960_v54 = vmax.f32 %v657_v45, 0.0 }
 0x291   : > { %v2106_v44 = vmul.f32 0.5, %v2105_v25 }
 0x292   : > { %1943 = vadd.xlane.f32.xlu2 %v1863_v12  ;;  %v1441_v46 = vadd.f32 %v1440_v38, %v1272_v48  ;;  %v3951_v12 = vld [vmem:[%s4433_s24 + $0x100] sm:$0xff] }
 0x293   : > { %v2107_v57 = vsub.f32 1.5, %v2106_v44  ;;  %v1916_v63 = vpop.xlane.xlu0 %1915 }
 0x294   : > { %v3682_v32 = vpop.eup %3681  ;;  %v1619_v35 = vpop.xlane.xlu2 %1618  ;;  %v4943_v50 = vmul.f32 0.007874016, %v1916_v63  ;;  %v4960_v18 = vadd.f32 %v3951_v12, %v1441_v46 }
 0x295   : > { %v2108_v53 = vmul.f32 %v3680_v16, %v2107_v57  ;;  %v2116_v22 = vmul.f32 %v3682_v32, %v4928_v58  ;;  %v1736_v51 = vmul.f32 %v4697_v23, %v1619_v35  ;;  %v658_v59 = vpop.f32.mrf.mxu0  ;;  %v961_v35 = vmax.f32 %v826_v7, 0.0 }
 0x296   : > { %3683 = vrsqrt.f32 %v4943_v50  ;;  %v827_v9 = vpop.f32.mrf.mxu1  ;;  %v659_v11 = vadd.f32 %v658_v59, %v4516_v30  ;;  %vm2134_vm5 = vcmp.eq.f32.partialorder %v4943_v50, inf  ;;  %vm2136_vm6 = vcmp.eq.f32.partialorder %v4943_v50, 0.0 }
 0x297   : > { %v2109_v61 = vmul.f32 %v2108_v53, %v4913_v52  ;;  %v2117_v16 = vmul.f32 %v3682_v32, %v2116_v22  ;;  %v4954_v2 = vsub.f32 %v4737_v36, %v1736_v51  ;;  %v1273_v25 = vpop.f32.mrf.mxu2  ;;  %v828_v29 = vadd.f32 %v827_v9, %v4518_v31 }
 0x298   : > { %v1274_v48 = vadd.f32 %v4866_v42, %v1273_v25  ;;  %v1442_v38 = vpop.f32.mrf.mxu3  ;;  %v962_v63 = vmax.f32 %v659_v11, 0.0 }
 0x299   : > { %v2111_v44 = vsel %vm2110_vm1, %v4913_v52, %v2109_v61  ;;  %v2118_v57 = vmul.f32 0.5, %v2117_v16  ;;  %v1864_v36 = vmul.f32 %v4954_v2, %v4954_v2  ;;  %v963_v53 = vmax.f32 %v828_v29, 0.0 }
 0x29a   : > { %v2114_v45 = vsel %vm2112_vm2, %v2113_v6, %v2111_v44  ;;  %1648 = vadd.xlane.f32.xlu2 %v4960_v18  ;;  %v1038_v46 = vpack.c.bf16 %v962_v63, %v960_v54  ;;  %v1443_v6 = vadd.f32 %v1442_v38, %v1274_v48 }
 0x29b   : > { %v2871_v22 = vadd.f32 0.001, %v2114_v45  ;;  %v2119_v51 = vsub.f32 1.5, %v2118_v57  ;;  %1945 = vadd.xlane.f32.xlu0 %v1864_v36  ;;  %v1918_v59 = vpop.xlane.xlu1 %1917  ;;  %v1621_v9 = vpop.xlane.xlu0 %1620  ;;  %v1039_v61 = vpack.c.bf16 %v963_v53, %v961_v35  ;;  %v3952_v35 = vld [vmem:[%s4433_s24 + $0x108] sm:$0xff] }
 0x29c   : > { %v3684_v25 = vpop.eup %3683  ;;  %v4970_v16 = vmul.f32 0.007874016, %v1918_v59  ;;  %v1737_v11 = vmul.f32 %v4697_v23, %v1621_v9  ;;  %1315 = vmatmul.bf16.gmra.mxu2 %v1038_v46  ;;  %v4985_v53 = vadd.f32 %v3952_v35, %v1443_v6 }
 0x29d   : > { %3685 = vrcp.f32 %v2871_v22  ;;  %v2120_v12 = vmul.f32 %v3682_v32, %v2119_v51  ;;  %v2128_v52 = vmul.f32 %v3684_v25, %v4943_v50  ;;  %v661_v7 = vpop.f32.mrf.mxu0  ;;  %1484 = vmatmul.bf16.gmra.mxu3 %v1039_v61  ;;  %v2125_v32 = vand.u32 2147483648, %v4928_v58  ;;  %v4989_v22 = vld [vmem:[#allocation10 + $0x1] ss:$0 sm:$0xff] }
 0x29e   : > { %3687 = vrsqrt.f32 %v4970_v16  ;;  %v830_v54 = vpop.f32.mrf.mxu1  ;;  %v4977_v57 = vsub.f32 %v4749_v4, %v1737_v11  ;;  %v4993_v11 = vld [vmem:[#allocation10 + $0x2] ss:$0 sm:$0xff]  ;;  %vm2146_vm7 = vcmp.eq.f32.partialorder %v4970_v16, inf  ;;  %vm2148_vm8 = vcmp.eq.f32.partialorder %v4970_v16, 0.0 }
 0x29f   : > { %v2121_v29 = vmul.f32 %v2120_v12, %v4928_v58  ;;  %v2129_v44 = vmul.f32 %v3684_v25, %v2128_v52  ;;  %v1276_v63 = vpop.f32.mrf.mxu2  ;;  %v662_v52 = vadd.f32 %v661_v7, %v4516_v30 }
 0x2a0   : > { %6311 = vst [vmem:[#allocation19_spill] sm:$0xff] %v4977_v57  ;;  %v1277_v48 = vadd.f32 %v4866_v42, %v1276_v63  ;;  %v1445_v38 = vpop.f32.mrf.mxu3  ;;  %v1865_v4 = vmul.f32 %v4977_v57, %v4977_v57 }
 0x2a1   : > { %v2123_v36 = vsel %vm2122_vm3, %v4928_v58, %v2121_v29  ;;  %v2130_v45 = vmul.f32 0.5, %v2129_v44 }
 0x2a2   : > { %v2126_v51 = vsel %vm2124_vm4, %v2125_v32, %v2123_v36  ;;  %1947 = vadd.xlane.f32.xlu1 %v1865_v4  ;;  %v1446_v6 = vadd.f32 %v1445_v38, %v1277_v48  ;;  %v831_v38 = vadd.f32 %v830_v54, %v4518_v31 }
 0x2a3   : > { %v3686_v46 = vpop.eup %3685  ;;  %v2872_v59 = vadd.f32 0.001, %v2126_v51  ;;  %v2131_v9 = vsub.f32 1.5, %v2130_v45  ;;  %1650 = vadd.xlane.f32.xlu0 %v4985_v53  ;;  %v1623_v61 = vpop.xlane.xlu1 %1622 }
 0x2a4   : > { %v3688_v58 = vpop.eup %3687  ;;  %v2999_v12 = vmul.f32 %v3686_v46, %v4704_v40  ;;  %v1738_v29 = vmul.f32 %v4697_v23, %v1623_v61  ;;  %v1920_v44 = vpop.xlane.xlu2 %1919 }
 0x2a5   : > { %3689 = vrcp.f32 %v2872_v59  ;;  %v2132_v63 = vmul.f32 %v3684_v25, %v2131_v9  ;;  %v2140_v32 = vmul.f32 %v3688_v58, %v4970_v16  ;;  %v4999_v36 = vmul.f32 0.007874016, %v1920_v44  ;;  %v663_v45 = vpop.f32.mrf.mxu0 }
 0x2a6   : > { %v3065_v35 = vmul.f32 %v4989_v22, %v2999_v12  ;;  %v5004_v4 = vsub.f32 %v4763_v19, %v1738_v29  ;;  %v664_v40 = vadd.f32 %v663_v45, %v4516_v30  ;;  %v832_v7 = vpop.f32.mrf.mxu1  ;;  %v2137_v59 = vand.u32 2147483648, %v4943_v50 }
 0x2a7   : > { %v2133_v48 = vmul.f32 %v2132_v63, %v4943_v50  ;;  %v2141_v25 = vmul.f32 %v3688_v58, %v2140_v32  ;;  %3691 = vrsqrt.f32 %v4999_v36  ;;  %v1278_v51 = vpop.f32.mrf.mxu2  ;;  %v964_v9 = vmax.f32 %v662_v52, 0.0  ;;  %v3953_v63 = vld [vmem:[%s4433_s24 + $0x110] sm:$0xff] }
 0x2a8   : > { %6312 = vst [vmem:[#allocation20_spill] sm:$0xff] %v5004_v4  ;;  %v3131_v46 = vadd.f32 %v4993_v11, %v3065_v35  ;;  %v966_v19 = vmax.f32 %v664_v40, 0.0  ;;  %v1447_v61 = vpop.f32.mrf.mxu3  ;;  %v833_v44 = vadd.f32 %v832_v7, %v4518_v31  ;;  %v5017_v32 = vadd.f32 %v3953_v63, %v1446_v6 }
 0x2a9   : > { %v2135_v12 = vsel %vm2134_vm5, %v4943_v50, %v2133_v48  ;;  %v2142_v29 = vmul.f32 0.5, %v2141_v25  ;;  %v1279_v45 = vadd.f32 %v4866_v42, %v1278_v51  ;;  %v1866_v35 = vmul.f32 %v5004_v4, %v5004_v4 }
 0x2aa   : > { %3195 = vst [vmem:[%s5021_s29] sm:$0xff] %v3131_v46  ;;  %v2138_v54 = vsel %vm2136_vm6, %v2137_v59, %v2135_v12  ;;  %v1040_v52 = vpack.c.bf16 %v966_v19, %v964_v9  ;;  %v965_v25 = vmax.f32 %v831_v38, 0.0  ;;  %v967_v6 = vmax.f32 %v833_v44, 0.0  ;;  %1652 = vadd.xlane.f32.xlu1 %v5017_v32 }
 0x2ab   : > { %v3690_v40 = vpop.eup %3689  ;;  %v2873_v48 = vadd.f32 0.001, %v2138_v54  ;;  %v2143_v7 = vsub.f32 1.5, %v2142_v29  ;;  %v1922_v63 = vpop.xlane.xlu0 %1921  ;;  %1949 = vadd.xlane.f32.xlu2 %v1866_v35  ;;  %v1448_v44 = vadd.f32 %v1447_v61, %v1279_v45  ;;  %vm2158_vm9 = vcmp.eq.f32.partialorder %v4999_v36, inf }
 0x2ac   : > { %v3000_v57 = vmul.f32 %v3690_v40, %v4716_v56  ;;  %v1625_v46 = vpop.xlane.xlu2 %1624  ;;  %v5031_v50 = vmul.f32 0.007874016, %v1922_v63  ;;  %v1041_v9 = vpack.c.bf16 %v967_v6, %v965_v25  ;;  %1320 = vmatmul.bf16.gmra.mxu2 %v1040_v52  ;;  %v3954_v6 = vld [vmem:[%s4433_s24 + $0x118] sm:$0xff]  ;;  %vm2160_vm10 = vcmp.eq.f32.partialorder %v4999_v36, 0.0 }
 0x2ad   : > { %v3692_v59 = vpop.eup %3691  ;;  %3693 = vrcp.f32 %v2873_v48  ;;  %v2144_v51 = vmul.f32 %v3688_v58, %v2143_v7  ;;  %v1739_v19 = vmul.f32 %v4697_v23, %v1625_v46  ;;  %v666_v12 = vpop.f32.mrf.mxu0  ;;  %v5051_v63 = vadd.f32 %v3954_v6, %v1448_v44 }
 0x2ae   : > { %v3066_v38 = vmul.f32 %v4989_v22, %v3000_v57  ;;  %v2152_v29 = vmul.f32 %v3692_v59, %v4999_v36  ;;  %3695 = vrsqrt.f32 %v5031_v50  ;;  %v835_v56 = vpop.f32.mrf.mxu1  ;;  %1489 = vmatmul.bf16.gmra.mxu3 %v1041_v9  ;;  %v2149_v57 = vand.u32 2147483648, %v4970_v16 }
 0x2af   : > { %v2145_v54 = vmul.f32 %v2144_v51, %v4970_v16  ;;  %v5039_v35 = vsub.f32 %v4780_v10, %v1739_v19  ;;  %v1281_v58 = vpop.f32.mrf.mxu2  ;;  %v667_v9 = vadd.f32 %v666_v12, %v4516_v30  ;;  %v2161_v44 = vand.u32 2147483648, %v4999_v36 }
 0x2b0   : > { %v3132_v52 = vadd.f32 %v4993_v11, %v3066_v38  ;;  %v2153_v40 = vmul.f32 %v3692_v59, %v2152_v29  ;;  %v1450_v61 = vpop.f32.mrf.mxu3  ;;  %v1282_v48 = vadd.f32 %v4866_v42, %v1281_v58  ;;  %v836_v6 = vadd.f32 %v835_v56, %v4518_v31 }
 0x2b1   : > { %6313 = vst [vmem:[#allocation21_spill] sm:$0xff] %v5039_v35  ;;  %v2147_v45 = vsel %vm2146_vm7, %v4970_v16, %v2145_v54  ;;  %v1867_v10 = vmul.f32 %v5039_v35, %v5039_v35  ;;  %vm2170_vm11 = vcmp.eq.f32.partialorder %v5031_v50, inf  ;;  %vm2172_vm12 = vcmp.eq.f32.partialorder %v5031_v50, 0.0 }
 0x2b2   : > { %3196 = vst [vmem:[%s5021_s29 + $0x8] sm:$0xff] %v3132_v52  ;;  %v2150_v7 = vsel %vm2148_vm8, %v2149_v57, %v2147_v45  ;;  %v2154_v25 = vmul.f32 0.5, %v2153_v40  ;;  %v1451_v54 = vadd.f32 %v1450_v61, %v1282_v48 }
 0x2b3   : > { %v3694_v46 = vpop.eup %3693  ;;  %v2874_v51 = vadd.f32 0.001, %v2150_v7  ;;  %1951 = vadd.xlane.f32.xlu0 %v1867_v10  ;;  %v1627_v19 = vpop.xlane.xlu0 %1626  ;;  %1654 = vadd.xlane.f32.xlu2 %v5051_v63 }
 0x2b4   : > { %v3696_v16 = vpop.eup %3695  ;;  %v3001_v38 = vmul.f32 %v3694_v46, %v4732_v27  ;;  %v2155_v29 = vsub.f32 1.5, %v2154_v25  ;;  %v1924_v58 = vpop.xlane.xlu1 %1923  ;;  %v1740_v52 = vmul.f32 %v4697_v23, %v1627_v19  ;;  %v968_v25 = vmax.f32 %v667_v9, 0.0 }
 0x2b5   : > { %3697 = vrcp.f32 %v2874_v51  ;;  %v2164_v57 = vmul.f32 %v3696_v16, %v5031_v50  ;;  %v5060_v40 = vmul.f32 0.007874016, %v1924_v58  ;;  %v668_v12 = vpop.f32.mrf.mxu0 }
 0x2b6   : > { %v3067_v45 = vmul.f32 %v4989_v22, %v3001_v38  ;;  %v2156_v10 = vmul.f32 %v3692_v59, %v2155_v29  ;;  %v5064_v27 = vsub.f32 %v4791_v1, %v1740_v52  ;;  %v669_v61 = vadd.f32 %v668_v12, %v4516_v30  ;;  %v837_v48 = vpop.f32.mrf.mxu1  ;;  %v3955_v29 = vld [vmem:[%s4433_s24 + $0x120] sm:$0xff] }
 0x2b7   : > { %v2165_v7 = vmul.f32 %v3696_v16, %v2164_v57  ;;  %3699 = vrsqrt.f32 %v5060_v40  ;;  %v1283_v46 = vpop.f32.mrf.mxu2  ;;  %v5072_v1 = vadd.f32 %v3955_v29, %v1451_v54  ;;  %v838_v52 = vadd.f32 %v837_v48, %v4518_v31 }
 0x2b8   : > { %6314 = vst [vmem:[#allocation22_spill] sm:$0xff] %v5064_v27  ;;  %v3133_v51 = vadd.f32 %v4993_v11, %v3067_v45  ;;  %v2157_v19 = vmul.f32 %v2156_v10, %v4999_v36  ;;  %v970_v38 = vmax.f32 %v669_v61, 0.0  ;;  %v1452_v59 = vpop.f32.mrf.mxu3  ;;  %v1284_v57 = vadd.f32 %v4866_v42, %v1283_v46 }
 0x2b9   : > { %v2166_v58 = vmul.f32 0.5, %v2165_v7  ;;  %v1868_v56 = vmul.f32 %v5064_v27, %v5064_v27  ;;  %v969_v61 = vmax.f32 %v836_v6, 0.0  ;;  %v971_v7 = vmax.f32 %v838_v52, 0.0 }
 0x2ba   : > { %3197 = vst [vmem:[%s5021_s29 + $0x10] sm:$0xff] %v3133_v51  ;;  %v2159_v9 = vsel %vm2158_vm9, %v4999_v36, %v2157_v19  ;;  %v1042_v12 = vpack.c.bf16 %v970_v38, %v968_v25  ;;  %v1453_v36 = vadd.f32 %v1452_v59, %v1284_v57  ;;  %v2173_v59 = vand.u32 2147483648, %v5031_v50 }
 0x2bb   : > { %v3698_v45 = vpop.eup %3697  ;;  %v2162_v10 = vsel %vm2160_vm10, %v2161_v44, %v2159_v9  ;;  %v2167_v54 = vsub.f32 1.5, %v2166_v58  ;;  %1656 = vadd.xlane.f32.xlu0 %v5072_v1  ;;  %1953 = vadd.xlane.f32.xlu1 %v1868_v56  ;;  %v1926_v48 = vpop.xlane.xlu2 %1925  ;;  %v1043_v4 = vpack.c.bf16 %v971_v7, %v969_v61  ;;  %vm2182_vm13 = vcmp.eq.f32.partialorder %v5060_v40, inf }
 0x2bc   : > { %v3002_v46 = vmul.f32 %v3698_v45, %v4744_v43  ;;  %v2875_v29 = vadd.f32 0.001, %v2162_v10  ;;  %v5085_v51 = vmul.f32 0.007874016, %v1926_v48  ;;  %v1629_v27 = vpop.xlane.xlu1 %1628  ;;  %1325 = vmatmul.bf16.gmra.mxu2 %v1042_v12  ;;  %v3956_v45 = vld [vmem:[%s4433_s24 + $0x128] sm:$0xff]  ;;  %vm2184_vm14 = vcmp.eq.f32.partialorder %v5060_v40, 0.0 }
 0x2bd   : > { %v3700_v35 = vpop.eup %3699  ;;  %v2168_v19 = vmul.f32 %v3696_v16, %v2167_v54  ;;  %v1741_v25 = vmul.f32 %v4697_v23, %v1629_v27  ;;  %v671_v44 = vpop.f32.mrf.mxu0  ;;  %v5102_v10 = vadd.f32 %v3956_v45, %v1453_v36 }
 0x2be   : > { %v3068_v6 = vmul.f32 %v4989_v22, %v3002_v46  ;;  %3701 = vrcp.f32 %v2875_v29  ;;  %v2176_v38 = vmul.f32 %v3700_v35, %v5060_v40  ;;  %v840_v58 = vpop.f32.mrf.mxu1  ;;  %1494 = vmatmul.bf16.gmra.mxu3 %v1043_v4  ;;  %vm2194_vm15 = vcmp.eq.f32.partialorder %v5085_v51, inf }
 0x2bf   : > { %v2169_v43 = vmul.f32 %v2168_v19, %v5031_v50  ;;  %3703 = vrsqrt.f32 %v5085_v51  ;;  %v1286_v16 = vpop.f32.mrf.mxu2  ;;  %v5096_v57 = vsub.f32 %v4808_v39, %v1741_v25  ;;  %v672_v39 = vadd.f32 %v671_v44, %v4516_v30 }
 0x2c0   : > { %v3134_v27 = vadd.f32 %v4993_v11, %v3068_v6  ;;  %v2177_v52 = vmul.f32 %v3700_v35, %v2176_v38  ;;  %v1455_v56 = vpop.f32.mrf.mxu3  ;;  %v1287_v12 = vadd.f32 %v4866_v42, %v1286_v16  ;;  %v2185_v16 = vand.u32 2147483648, %v5060_v40 }
 0x2c1   : > { %v2171_v9 = vsel %vm2170_vm11, %v5031_v50, %v2169_v43  ;;  %v1869_v61 = vmul.f32 %v5096_v57, %v5096_v57  ;;  %v841_v45 = vadd.f32 %v840_v58, %v4518_v31  ;;  %vm2196_vm0 = vcmp.eq.f32.partialorder %v5085_v51, 0.0 }
 0x2c2   : > { %3198 = vst [vmem:[%s5021_s29 + $0x18] sm:$0xff] %v3134_v27  ;;  %v2174_v4 = vsel %vm2172_vm12, %v2173_v59, %v2171_v9  ;;  %v2178_v54 = vmul.f32 0.5, %v2177_v52  ;;  %v1456_v6 = vadd.f32 %v1455_v56, %v1287_v12  ;;  %v972_v9 = vmax.f32 %v672_v39, 0.0  ;;  %v3957_v39 = vld [vmem:[%s4433_s24 + $0x130] sm:$0xff] }
 0x2c3   : > { %v2876_v7 = vadd.f32 0.001, %v2174_v4  ;;  %1658 = vadd.xlane.f32.xlu1 %v5102_v10  ;;  %v1928_v48 = vpop.xlane.xlu0 %1927  ;;  %1955 = vadd.xlane.f32.xlu2 %v1869_v61 }
 0x2c4   : > { %v3702_v46 = vpop.eup %3701  ;;  %v2179_v29 = vsub.f32 1.5, %v2178_v54  ;;  %v1631_v50 = vpop.xlane.xlu2 %1630  ;;  %v5111_v19 = vmul.f32 0.007874016, %v1928_v48 }
 0x2c5   : > { %v3704_v36 = vpop.eup %3703  ;;  %v3003_v25 = vmul.f32 %v3702_v46, %v4760_v15  ;;  %3705 = vrcp.f32 %v2876_v7  ;;  %v1742_v44 = vmul.f32 %v4697_v23, %v1631_v50  ;;  %v673_v38 = vpop.f32.mrf.mxu0 }
 0x2c6   : > { %v2180_v43 = vmul.f32 %v3700_v35, %v2179_v29  ;;  %v2188_v27 = vmul.f32 %v3704_v36, %v5085_v51  ;;  %3707 = vrsqrt.f32 %v5111_v19  ;;  %v842_v59 = vpop.f32.mrf.mxu1  ;;  %v674_v4 = vadd.f32 %v673_v38, %v4516_v30 }
 0x2c7   : > { %v3069_v52 = vmul.f32 %v4989_v22, %v3003_v25  ;;  %v5121_v15 = vsub.f32 %v4821_v14, %v1742_v44  ;;  %v1288_v56 = vpop.f32.mrf.mxu2  ;;  %v843_v54 = vadd.f32 %v842_v59, %v4518_v31  ;;  %v5131_v14 = vadd.f32 %v3957_v39, %v1456_v6 }
 0x2c8   : > { %v2181_v35 = vmul.f32 %v2180_v43, %v5060_v40  ;;  %v2189_v12 = vmul.f32 %v3704_v36, %v2188_v27  ;;  %v1457_v61 = vpop.f32.mrf.mxu3  ;;  %v1289_v48 = vadd.f32 %v4866_v42, %v1288_v56  ;;  %v974_v50 = vmax.f32 %v674_v4, 0.0 }
 0x2c9   : > { %6315 = vst [vmem:[#allocation23_spill] sm:$0xff] %v5121_v15  ;;  %v3135_v7 = vadd.f32 %v4993_v11, %v3069_v52  ;;  %v1870_v58 = vmul.f32 %v5121_v15, %v5121_v15  ;;  %v975_v25 = vmax.f32 %v843_v54, 0.0  ;;  %v973_v43 = vmax.f32 %v841_v45, 0.0 }
 0x2ca   : > { %v2183_v46 = vsel %vm2182_vm13, %v5060_v40, %v2181_v35  ;;  %v2190_v29 = vmul.f32 0.5, %v2189_v12  ;;  %v1044_v15 = vpack.c.bf16 %v974_v50, %v972_v9  ;;  %vm2206_vm1 = vcmp.eq.f32.partialorder %v5111_v19, inf }
 0x2cb   : > { %v3706_v44 = vpop.eup %3705  ;;  %3199 = vst [vmem:[%s5021_s29 + $0x20] sm:$0xff] %v3135_v7  ;;  %v2186_v38 = vsel %vm2184_vm14, %v2185_v16, %v2183_v46  ;;  %1957 = vadd.xlane.f32.xlu0 %v1870_v58  ;;  %v1930_v27 = vpop.xlane.xlu1 %1929  ;;  %1660 = vadd.xlane.f32.xlu2 %v5131_v14  ;;  %v1045_v12 = vpack.c.bf16 %v975_v25, %v973_v43  ;;  %vm2208_vm2 = vcmp.eq.f32.partialorder %v5111_v19, 0.0 }
 0x2cc   : > { %v1633_v59 = vpop.xlane.xlu0 %1632  ;;  %v3708_v52 = vpop.eup %3707  ;;  %v3004_v6 = vmul.f32 %v3706_v44, %v4772_v34  ;;  %v2877_v56 = vadd.f32 0.001, %v2186_v38  ;;  %v2191_v39 = vsub.f32 1.5, %v2190_v29  ;;  %v5142_v4 = vmul.f32 0.007874016, %v1930_v27  ;;  %1330 = vmatmul.bf16.gmra.mxu2 %v1044_v15  ;;  %v3958_v44 = vld [vmem:[%s4433_s24 + $0x138] sm:$0xff] }
 0x2cd   : > { %v2200_v35 = vmul.f32 %v3708_v52, %v5111_v19  ;;  %v1743_v40 = vmul.f32 %v4697_v23, %v1633_v59  ;;  %v676_v16 = vpop.f32.mrf.mxu0  ;;  %v1458_v7 = vadd.f32 %v1457_v61, %v1289_v48 }
 0x2ce   : > { %v3070_v45 = vmul.f32 %v4989_v22, %v3004_v6  ;;  %3709 = vrcp.f32 %v2877_v56  ;;  %v2192_v54 = vmul.f32 %v3704_v36, %v2191_v39  ;;  %v845_v34 = vpop.f32.mrf.mxu1  ;;  %1499 = vmatmul.bf16.gmra.mxu3 %v1045_v12  ;;  %v2197_v36 = vand.u32 2147483648, %v5085_v51 }
 0x2cf   : > { %v2201_v9 = vmul.f32 %v3708_v52, %v2200_v35  ;;  %3711 = vrsqrt.f32 %v5142_v4  ;;  %v1291_v58 = vpop.f32.mrf.mxu2  ;;  %v5150_v50 = vsub.f32 %v4833_v33, %v1743_v40  ;;  %v5159_v38 = vadd.f32 %v3958_v44, %v1458_v7 }
 0x2d0   : > { %v3136_v46 = vadd.f32 %v4993_v11, %v3070_v45  ;;  %v2193_v29 = vmul.f32 %v2192_v54, %v5085_v51  ;;  %v1460_v25 = vpop.f32.mrf.mxu3  ;;  %v1292_v61 = vadd.f32 %v4866_v42, %v1291_v58  ;;  %v677_v59 = vadd.f32 %v676_v16, %v4516_v30 }
 0x2d1   : > { %v2202_v15 = vmul.f32 0.5, %v2201_v9  ;;  %v1871_v33 = vmul.f32 %v5150_v50, %v5150_v50  ;;  %v846_v35 = vadd.f32 %v845_v34, %v4518_v31  ;;  %v2209_v58 = vand.u32 2147483648, %v5111_v19 }
 0x2d2   : > { %3200 = vst [vmem:[%s5021_s29 + $0x28] sm:$0xff] %v3136_v46  ;;  %v2195_v48 = vsel %vm2194_vm15, %v5085_v51, %v2193_v29  ;;  %v1461_v7 = vadd.f32 %v1460_v25, %v1292_v61  ;;  %vm2218_vm3 = vcmp.eq.f32.partialorder %v5142_v4, inf  ;;  %vm2220_vm4 = vcmp.eq.f32.partialorder %v5142_v4, 0.0 }
 0x2d3   : > { %v2198_v43 = vsel %vm2196_vm0, %v2197_v36, %v2195_v48  ;;  %v2203_v27 = vsub.f32 1.5, %v2202_v15  ;;  %v1932_v6 = vpop.xlane.xlu2 %1931  ;;  %1662 = vadd.xlane.f32.xlu0 %v5159_v38  ;;  %1959 = vadd.xlane.f32.xlu1 %v1871_v33  ;;  %v976_v15 = vmax.f32 %v677_v59, 0.0  ;;  %v3959_v59 = vld [vmem:[%s4433_s24 + $0x140] sm:$0xff] }
 0x2d4   : > { %v3710_v56 = vpop.eup %3709  ;;  %v2878_v39 = vadd.f32 0.001, %v2198_v43  ;;  %v5167_v51 = vmul.f32 0.007874016, %v1932_v6  ;;  %v1635_v12 = vpop.xlane.xlu1 %1634  ;;  %v5187_v6 = vadd.f32 %v3959_v59, %v1461_v7 }
 0x2d5   : > { %v3712_v40 = vpop.eup %3711  ;;  %v3005_v45 = vmul.f32 %v3710_v56, %v4788_v8  ;;  %v2204_v54 = vmul.f32 %v3708_v52, %v2203_v27  ;;  %v1744_v16 = vmul.f32 %v4697_v23, %v1635_v12  ;;  %v678_v9 = vpop.f32.mrf.mxu0  ;;  %v977_v27 = vmax.f32 %v846_v35, 0.0 }
 0x2d6   : > { %3713 = vrcp.f32 %v2878_v39  ;;  %v2212_v34 = vmul.f32 %v3712_v40, %v5142_v4  ;;  %v847_v46 = vpop.f32.mrf.mxu1  ;;  %v679_v61 = vadd.f32 %v678_v9, %v4516_v30  ;;  %vm2230_vm5 = vcmp.eq.f32.partialorder %v5167_v51, inf }
 0x2d7   : > { %v3071_v29 = vmul.f32 %v4989_v22, %v3005_v45  ;;  %v2205_v36 = vmul.f32 %v2204_v54, %v5111_v19  ;;  %3715 = vrsqrt.f32 %v5167_v51  ;;  %v1293_v8 = vpop.f32.mrf.mxu2  ;;  %v5178_v25 = vsub.f32 %v4849_v13, %v1744_v16 }
 0x2d8   : > { %v2213_v52 = vmul.f32 %v3712_v40, %v2212_v34  ;;  %v848_v48 = vadd.f32 %v847_v46, %v4518_v31  ;;  %v1462_v44 = vpop.f32.mrf.mxu3  ;;  %v978_v39 = vmax.f32 %v679_v61, 0.0  ;;  %v1294_v54 = vadd.f32 %v4866_v42, %v1293_v8 }
 0x2d9   : > { %v3137_v33 = vadd.f32 %v4993_v11, %v3071_v29  ;;  %v2207_v43 = vsel %vm2206_vm1, %v5111_v19, %v2205_v36  ;;  %v1872_v16 = vmul.f32 %v5178_v25, %v5178_v25  ;;  %vm2232_vm6 = vcmp.eq.f32.partialorder %v5167_v51, 0.0 }
 0x2da   : > { %v2210_v56 = vsel %vm2208_vm2, %v2209_v58, %v2207_v43  ;;  %v2214_v13 = vmul.f32 0.5, %v2213_v52  ;;  %v979_v12 = vmax.f32 %v848_v48, 0.0  ;;  %v1046_v29 = vpack.c.bf16 %v978_v39, %v976_v15 }
 0x2db   : > { %3201 = vst [vmem:[%s5021_s29 + $0x30] sm:$0xff] %v3137_v33  ;;  %v2879_v45 = vadd.f32 0.001, %v2210_v56  ;;  %v1637_v9 = vpop.xlane.xlu2 %1636  ;;  %v1934_v34 = vpop.xlane.xlu0 %1933  ;;  %1664 = vadd.xlane.f32.xlu1 %v5187_v6  ;;  %1961 = vadd.xlane.f32.xlu2 %v1872_v16 }
 0x2dc   : > { %v3714_v46 = vpop.eup %3713  ;;  %v2215_v35 = vsub.f32 1.5, %v2214_v13  ;;  %v1047_v7 = vpack.c.bf16 %v979_v12, %v977_v27  ;;  %v1745_v19 = vmul.f32 %v4697_v23, %v1637_v9  ;;  %v5198_v52 = vmul.f32 0.007874016, %v1934_v34  ;;  %1335 = vmatmul.bf16.gmra.mxu2 %v1046_v29  ;;  %v3960_v9 = vld [vmem:[%s4433_s24 + $0x148] sm:$0xff] }
 0x2dd   : > { %v3716_v58 = vpop.eup %3715  ;;  %v3006_v36 = vmul.f32 %v3714_v46, %v4800_v28  ;;  %3717 = vrcp.f32 %v2879_v45  ;;  %v681_v8 = vpop.f32.mrf.mxu0  ;;  %v1463_v27 = vadd.f32 %v1462_v44, %v1294_v54  ;;  %v2221_v13 = vand.u32 2147483648, %v5142_v4 }
 0x2de   : > { %v2216_v61 = vmul.f32 %v3712_v40, %v2215_v35  ;;  %v2224_v48 = vmul.f32 %v3716_v58, %v5167_v51  ;;  %v5202_v33 = vsub.f32 %v4863_v37, %v1745_v19  ;;  %v850_v15 = vpop.f32.mrf.mxu1  ;;  %3719 = vrsqrt.f32 %v5198_v52  ;;  %1504 = vmatmul.bf16.gmra.mxu3 %v1047_v7 }
 0x2df   : > { %v3072_v43 = vmul.f32 %v4989_v22, %v3006_v36  ;;  %v1296_v28 = vpop.f32.mrf.mxu2  ;;  %v5217_v34 = vadd.f32 %v3960_v9, %v1463_v27  ;;  %vm2242_vm7 = vcmp.eq.f32.partialorder %v5198_v52, inf  ;;  %vm2244_vm8 = vcmp.eq.f32.partialorder %v5198_v52, 0.0 }
 0x2e0   : > { %v2217_v59 = vmul.f32 %v2216_v61, %v5142_v4  ;;  %v2225_v40 = vmul.f32 %v3716_v58, %v2224_v48  ;;  %v1465_v56 = vpop.f32.mrf.mxu3  ;;  %v1297_v39 = vadd.f32 %v4866_v42, %v1296_v28  ;;  %v1873_v44 = vmul.f32 %v5202_v33, %v5202_v33 }
 0x2e1   : > { %v3138_v37 = vadd.f32 %v4993_v11, %v3072_v43 }
 0x2e2   : > { %v2219_v12 = vsel %vm2218_vm3, %v5142_v4, %v2217_v59  ;;  %v2226_v45 = vmul.f32 0.5, %v2225_v40  ;;  %1963 = vadd.xlane.f32.xlu0 %v1873_v44  ;;  %v682_v4 = vadd.f32 %v681_v8, %v4516_v30  ;;  %v1466_v61 = vadd.f32 %v1465_v56, %v1297_v39 }
 0x2e3   : > { %v3718_v54 = vpop.eup %3717  ;;  %3202 = vst [vmem:[%s5021_s29 + $0x38] sm:$0xff] %v3138_v37  ;;  %v2222_v16 = vsel %vm2220_vm4, %v2221_v13, %v2219_v12  ;;  %v1639_v46 = vpop.xlane.xlu0 %1638  ;;  %1666 = vadd.xlane.f32.xlu2 %v5217_v34  ;;  %v2233_v40 = vand.u32 2147483648, %v5167_v51  ;;  %v851_v8 = vadd.f32 %v850_v15, %v4518_v31 }
 0x2e4   : > { %v3007_v35 = vmul.f32 %v3718_v54, %v4816_v3  ;;  %v2880_v29 = vadd.f32 0.001, %v2222_v16  ;;  %v2227_v42 = vsub.f32 1.5, %v2226_v45  ;;  %v1936_v7 = vpop.xlane.xlu1 %1935  ;;  %v1746_v19 = vmul.f32 %v4697_v23, %v1639_v46  ;;  %v3720_v36 = vpop.eup %3719  ;;  %v3961_v16 = vld [vmem:[%s4433_s24 + $0x150] sm:$0xff] }
 0x2e5   : > { %v5224_v48 = vmul.f32 0.007874016, %v1936_v7  ;;  %v683_v43 = vpop.f32.mrf.mxu0  ;;  %v2236_v28 = vmul.f32 %v3720_v36, %v5198_v52  ;;  %v980_v12 = vmax.f32 %v682_v4, 0.0  ;;  %v5240_v9 = vadd.f32 %v3961_v16, %v1466_v61 }
 0x2e6   : > { %v3073_v27 = vmul.f32 %v4989_v22, %v3007_v35  ;;  %3721 = vrcp.f32 %v2880_v29  ;;  %v2228_v3 = vmul.f32 %v3716_v58, %v2227_v42  ;;  %v852_v59 = vpop.f32.mrf.mxu1  ;;  %v5235_v58 = vsub.f32 %v4877_v26, %v1746_v19  ;;  %v5246_v35 = vld [vmem:[#allocation10] ss:$0 sm:$0xff] }
 0x2e7   : > { %3723 = vrsqrt.f32 %v5224_v48  ;;  %v1298_v56 = vpop.f32.mrf.mxu2  ;;  %v2237_v39 = vmul.f32 %v3720_v36, %v2236_v28  ;;  %v684_v45 = vadd.f32 %v683_v43, %v4516_v30  ;;  %v853_v54 = vadd.f32 %v852_v59, %v4518_v31 }
 0x2e8   : > { %v3139_v37 = vadd.f32 %v4993_v11, %v3073_v27  ;;  %v2229_v13 = vmul.f32 %v2228_v3, %v5167_v51  ;;  %v1467_v44 = vpop.f32.mrf.mxu3  ;;  %v1299_v26 = vadd.f32 %v5246_v35, %v1298_v56  ;;  %v1874_v29 = vmul.f32 %v5235_v58, %v5235_v58 }
 0x2e9   : > { %v2238_v46 = vmul.f32 0.5, %v2237_v39  ;;  %v981_v7 = vmax.f32 %v851_v8, 0.0  ;;  %v982_v19 = vmax.f32 %v684_v45, 0.0  ;;  %v983_v4 = vmax.f32 %v853_v54, 0.0 }
 0x2ea   : > { %3203 = vst [vmem:[%s5021_s29 + $0x40] sm:$0xff] %v3139_v37  ;;  %v2231_v15 = vsel %vm2230_vm5, %v5167_v51, %v2229_v13  ;;  %1668 = vadd.xlane.f32.xlu0 %v5240_v9  ;;  %1965 = vadd.xlane.f32.xlu1 %v1874_v29  ;;  %v1468_v54 = vadd.f32 %v1467_v44, %v1299_v26  ;;  %v2245_v26 = vand.u32 2147483648, %v5198_v52  ;;  %vm2254_vm9 = vcmp.eq.f32.partialorder %v5224_v48, inf }
 0x2eb   : > { %v2234_v42 = vsel %vm2232_vm6, %v2233_v40, %v2231_v15  ;;  %v1938_v61 = vpop.xlane.xlu2 %1937  ;;  %v2239_v3 = vsub.f32 1.5, %v2238_v46  ;;  %v1048_v13 = vpack.c.bf16 %v982_v19, %v980_v12  ;;  %v1049_v39 = vpack.c.bf16 %v983_v4, %v981_v7 }
 0x2ec   : > { %v3722_v43 = vpop.eup %3721  ;;  %v2881_v27 = vadd.f32 0.001, %v2234_v42  ;;  %v5254_v28 = vmul.f32 0.007874016, %v1938_v61  ;;  %v1641_v59 = vpop.xlane.xlu1 %1640  ;;  %v3963_v61 = vld [vmem:[%s4433_s24 + $0x158] sm:$0xff]  ;;  %vm2256_vm10 = vcmp.eq.f32.partialorder %v5224_v48, 0.0 }
 0x2ed   : > { %v3724_v56 = vpop.eup %3723  ;;  %v3008_v37 = vmul.f32 %v3722_v43, %v4828_v20  ;;  %v1747_v51 = vmul.f32 %v4697_v23, %v1641_v59  ;;  %v686_v40 = vpop.f32.mrf.mxu0  ;;  %v2240_v8 = vmul.f32 %v3720_v36, %v2239_v3  ;;  %1340 = vmatmul.bf16.gmra.mxu2 %v1048_v13  ;;  %v5274_v43 = vadd.f32 %v3963_v61, %v1468_v54 }
 0x2ee   : > { %3725 = vrcp.f32 %v2881_v27  ;;  %v2248_v45 = vmul.f32 %v3724_v56, %v5224_v48  ;;  %v855_v16 = vpop.f32.mrf.mxu1  ;;  %1509 = vmatmul.bf16.gmra.mxu3 %v1049_v39  ;;  %v687_v27 = vadd.f32 %v686_v40, %v4516_v30  ;;  %vm2266_vm11 = vcmp.eq.f32.partialorder %v5254_v28, inf }
 0x2ef   : > { %v3074_v15 = vmul.f32 %v4989_v22, %v3008_v37  ;;  %3727 = vrsqrt.f32 %v5254_v28  ;;  %v1301_v20 = vpop.f32.mrf.mxu2  ;;  %v2241_v12 = vmul.f32 %v2240_v8, %v5198_v52  ;;  %v5264_v36 = vsub.f32 %v4894_v41, %v1747_v51 }
 0x2f0   : > { %v2249_v46 = vmul.f32 %v3724_v56, %v2248_v45  ;;  %v1470_v29 = vpop.f32.mrf.mxu3  ;;  %v1302_v42 = vadd.f32 %v5246_v35, %v1301_v20  ;;  %vm2268_vm12 = vcmp.eq.f32.partialorder %v5254_v28, 0.0 }
 0x2f1   : > { %v3140_v44 = vadd.f32 %v4993_v11, %v3074_v15  ;;  %v2243_v7 = vsel %vm2242_vm7, %v5198_v52, %v2241_v12  ;;  %v1875_v4 = vmul.f32 %v5264_v36, %v5264_v36 }
 0x2f2   : > { %v2250_v19 = vmul.f32 0.5, %v2249_v46  ;;  %v2246_v41 = vsel %vm2244_vm8, %v2245_v26, %v2243_v7  ;;  %1670 = vadd.xlane.f32.xlu1 %v5274_v43  ;;  %v1471_v40 = vadd.f32 %v1470_v29, %v1302_v42  ;;  %v2257_v26 = vand.u32 2147483648, %v5224_v48 }
 0x2f3   : > { %3204 = vst [vmem:[%s5021_s29 + $0x48] sm:$0xff] %v3140_v44  ;;  %v1643_v3 = vpop.xlane.xlu2 %1642  ;;  %v1940_v59 = vpop.xlane.xlu0 %1939  ;;  %v2882_v13 = vadd.f32 0.001, %v2246_v41  ;;  %1967 = vadd.xlane.f32.xlu2 %v1875_v4  ;;  %v984_v7 = vmax.f32 %v687_v27, 0.0 }
 0x2f4   : > { %v3726_v37 = vpop.eup %3725  ;;  %v2251_v39 = vsub.f32 1.5, %v2250_v19  ;;  %v1748_v52 = vmul.f32 %v4697_v23, %v1643_v3  ;;  %v5280_v51 = vmul.f32 0.007874016, %v1940_v59 }
 0x2f5   : > { %v3728_v8 = vpop.eup %3727  ;;  %v3009_v45 = vmul.f32 %v3726_v37, %v4844_v0  ;;  %v688_v54 = vpop.f32.mrf.mxu0  ;;  %3729 = vrcp.f32 %v2882_v13  ;;  %v856_v0 = vadd.f32 %v855_v16, %v4518_v31  ;;  %v3964_v13 = vld [vmem:[%s4433_s24 + $0x160] sm:$0xff] }
 0x2f6   : > { %v2252_v15 = vmul.f32 %v3724_v56, %v2251_v39  ;;  %v2260_v20 = vmul.f32 %v3728_v8, %v5254_v28  ;;  %v5287_v12 = vsub.f32 %v4905_v24, %v1748_v52  ;;  %v857_v46 = vpop.f32.mrf.mxu1  ;;  %3731 = vrsqrt.f32 %v5280_v51 }
 0x2f7   : > { %v3075_v44 = vmul.f32 %v4989_v22, %v3009_v45  ;;  %v1303_v29 = vpop.f32.mrf.mxu2  ;;  %v689_v19 = vadd.f32 %v688_v54, %v4516_v30  ;;  %v858_v61 = vadd.f32 %v857_v46, %v4518_v31  ;;  %v5304_v27 = vadd.f32 %v3964_v13, %v1471_v40 }
 0x2f8   : > { %v2253_v42 = vmul.f32 %v2252_v15, %v5224_v48  ;;  %v2261_v56 = vmul.f32 %v3728_v8, %v2260_v20  ;;  %v1472_v24 = vpop.f32.mrf.mxu3  ;;  %v1304_v41 = vadd.f32 %v5246_v35, %v1303_v29  ;;  %v1876_v16 = vmul.f32 %v5287_v12, %v5287_v12 }
 0x2f9   : > { %v3141_v4 = vadd.f32 %v4993_v11, %v3075_v44  ;;  %v986_v37 = vmax.f32 %v689_v19, 0.0  ;;  %v985_v39 = vmax.f32 %v856_v0, 0.0  ;;  %v987_v31 = vmax.f32 %v858_v61, 0.0 }
 0x2fa   : > { %v2255_v3 = vsel %vm2254_vm9, %v5224_v48, %v2253_v42  ;;  %v2262_v59 = vmul.f32 0.5, %v2261_v56  ;;  %1969 = vadd.xlane.f32.xlu0 %v1876_v16  ;;  %v1473_v56 = vadd.f32 %v1472_v24, %v1304_v41  ;;  %v3965_v16 = vld [vmem:[%s4433_s24 + $0x168] sm:$0xff]  ;;  %vm2278_vm13 = vcmp.eq.f32.partialorder %v5280_v51, inf }
 0x2fb   : > { %3205 = vst [vmem:[%s5021_s29 + $0x50] sm:$0xff] %v3141_v4  ;;  %v2258_v30 = vsel %vm2256_vm10, %v2257_v26, %v2255_v3  ;;  %v1645_v52 = vpop.xlane.xlu0 %1644  ;;  %v3730_v45 = vpop.eup %3729  ;;  %v1050_v20 = vpack.c.bf16 %v986_v37, %v984_v7  ;;  %1672 = vadd.xlane.f32.xlu2 %v5304_v27  ;;  %v1051_v42 = vpack.c.bf16 %v987_v31, %v985_v39  ;;  %v2269_v4 = vand.u32 2147483648, %v5254_v28 }
 0x2fc   : > { %v2883_v54 = vadd.f32 0.001, %v2258_v30  ;;  %v2263_v15 = vsub.f32 1.5, %v2262_v59  ;;  %v1942_v46 = vpop.xlane.xlu1 %1941  ;;  %v1749_v44 = vmul.f32 %v4697_v23, %v1645_v52  ;;  %v3732_v29 = vpop.eup %3731  ;;  %v3010_v40 = vmul.f32 %v3730_v45, %v4856_v55 }
 0x2fd   : > { %v5312_v48 = vmul.f32 0.007874016, %v1942_v46  ;;  %v2272_v0 = vmul.f32 %v3732_v29, %v5280_v51  ;;  %1345 = vmatmul.bf16.gmra.mxu2 %v1050_v20  ;;  %v5326_v3 = vadd.f32 %v3965_v16, %v1473_v56  ;;  %vm2280_vm14 = vcmp.eq.f32.partialorder %v5280_v51, 0.0 }
 0x2fe   : > { %3733 = vrcp.f32 %v2883_v54  ;;  %v2264_v26 = vmul.f32 %v3728_v8, %v2263_v15  ;;  %v5316_v19 = vsub.f32 %v4919_v47, %v1749_v44  ;;  %v3076_v7 = vmul.f32 %v4989_v22, %v3010_v40  ;;  %1514 = vmatmul.bf16.gmra.mxu3 %v1051_v42 }
 0x2ff   : > { %3735 = vrsqrt.f32 %v5312_v48  ;;  %v1306_v55 = vpop.f32.mrf.mxu2  ;;  %v2273_v8 = vmul.f32 %v3732_v29, %v2272_v0  ;;  %vm2290_vm15 = vcmp.eq.f32.partialorder %v5312_v48, inf  ;;  %vm2292_vm0 = vcmp.eq.f32.partialorder %v5312_v48, 0.0 }
 0x300   : > { %v2265_v24 = vmul.f32 %v2264_v26, %v5254_v28  ;;  %v1475_v61 = vpop.f32.mrf.mxu3  ;;  %v3142_v41 = vadd.f32 %v4993_v11, %v3076_v7  ;;  %v1307_v47 = vadd.f32 %v5246_v35, %v1306_v55  ;;  %v1877_v59 = vmul.f32 %v5316_v19, %v5316_v19 }
 0x301   : > { %v2274_v13 = vmul.f32 0.5, %v2273_v8 }
 0x302   : > { %v2267_v37 = vsel %vm2266_vm11, %v5254_v28, %v2265_v24  ;;  %3206 = vst [vmem:[%s5021_s29 + $0x58] sm:$0xff] %v3142_v41  ;;  %1674 = vadd.xlane.f32.xlu0 %v5326_v3  ;;  %1971 = vadd.xlane.f32.xlu1 %v1877_v59  ;;  %v1476_v20 = vadd.f32 %v1475_v61, %v1307_v47  ;;  %v2281_v24 = vand.u32 2147483648, %v5280_v51 }
 0x303   : > { %v2270_v30 = vsel %vm2268_vm12, %v2269_v4, %v2267_v37  ;;  %v2275_v52 = vsub.f32 1.5, %v2274_v13 }
 0x304   : > { %v3734_v39 = vpop.eup %3733  ;;  %v2884_v31 = vadd.f32 0.001, %v2270_v30  ;;  %v1647_v45 = vpop.xlane.xlu1 %1646 }
 0x305   : > { %v3736_v54 = vpop.eup %3735  ;;  %v3011_v15 = vmul.f32 %v3734_v39, %v4874_v62  ;;  %v1750_v46 = vmul.f32 %v4697_v23, %v1647_v45  ;;  %v1944_v44 = vpop.xlane.xlu2 %1943  ;;  %v2276_v28 = vmul.f32 %v3732_v29, %v2275_v52  ;;  %v5360_v45 = vld [vmem:[#allocation10 + $0x1] ss:$0 sm:$0xff] }
 0x306   : > { %3737 = vrcp.f32 %v2884_v31  ;;  %v2284_v40 = vmul.f32 %v3736_v54, %v5312_v48  ;;  %v5337_v42 = vmul.f32 0.007874016, %v1944_v44 }
 0x307   : > { %v3077_v56 = vmul.f32 %v4989_v22, %v3011_v15  ;;  %v5341_v26 = vsub.f32 %v4936_v60, %v1750_v46  ;;  %v1308_v0 = vpop.f32.mrf.mxu2  ;;  %v2277_v62 = vmul.f32 %v2276_v28, %v5280_v51  ;;  %v3966_v22 = vld [vmem:[%s4433_s24 + $0x170] sm:$0xff] }
 0x308   : > { %v2285_v7 = vmul.f32 %v3736_v54, %v2284_v40  ;;  %3739 = vrsqrt.f32 %v5337_v42  ;;  %v1477_v55 = vpop.f32.mrf.mxu3  ;;  %v5350_v4 = vadd.f32 %v3966_v22, %v1476_v20  ;;  %v1309_v61 = vadd.f32 %v5246_v35, %v1308_v0  ;;  %v5371_v40 = vld [vmem:[#allocation10 + $0x2] ss:$0 sm:$0xff] }
 0x309   : > { %v3143_v29 = vadd.f32 %v4993_v11, %v3077_v56  ;;  %v2279_v60 = vsel %vm2278_vm13, %v5280_v51, %v2277_v62  ;;  %v1878_v41 = vmul.f32 %v5341_v26, %v5341_v26  ;;  %v2293_v0 = vand.u32 2147483648, %v5312_v48 }
 0x30a   : > { %v2286_v8 = vmul.f32 0.5, %v2285_v7  ;;  %v2282_v47 = vsel %vm2280_vm14, %v2281_v24, %v2279_v60  ;;  %1676 = vadd.xlane.f32.xlu1 %v5350_v4  ;;  %v1478_v39 = vadd.f32 %v1477_v55, %v1309_v61  ;;  %vm2302_vm1 = vcmp.eq.f32.partialorder %v5337_v42, inf }
 0x30b   : > { %3207 = vst [vmem:[%s5021_s29 + $0x60] sm:$0xff] %v3143_v29  ;;  %v2885_v16 = vadd.f32 0.001, %v2282_v47  ;;  %1973 = vadd.xlane.f32.xlu2 %v1878_v41  ;;  %v3969_v29 = vld [vmem:[%s4433_s24 + $0x178] sm:$0xff]  ;;  %vm2304_vm2 = vcmp.eq.f32.partialorder %v5337_v42, 0.0 }
 0x30c   : > { %v3738_v11 = vpop.eup %3737  ;;  %v2287_v59 = vsub.f32 1.5, %v2286_v8 }
 0x30d   : > { %v3012_v37 = vmul.f32 %v3738_v11, %v4886_v21  ;;  %v1649_v13 = vpop.xlane.xlu2 %1648  ;;  %3741 = vrcp.f32 %v2885_v16 }
 0x30e   : > { %v3740_v30 = vpop.eup %3739  ;;  %v2288_v51 = vmul.f32 %v3736_v54, %v2287_v59  ;;  %v1751_v31 = vmul.f32 %v4697_v23, %v1649_v13  ;;  %v1946_v52 = vpop.xlane.xlu0 %1945 }
 0x30f   : > { %v3078_v15 = vmul.f32 %v5360_v45, %v3012_v37  ;;  %v2296_v20 = vmul.f32 %v3740_v30, %v5337_v42  ;;  %v5364_v46 = vmul.f32 0.007874016, %v1946_v52  ;;  %v1311_v44 = vpop.f32.mrf.mxu2 }
 0x310   : > { %v2289_v21 = vmul.f32 %v2288_v51, %v5312_v48  ;;  %v5369_v54 = vsub.f32 %v4960_v18, %v1751_v31  ;;  %v1480_v28 = vpop.f32.mrf.mxu3  ;;  %v1312_v55 = vadd.f32 %v5246_v35, %v1311_v44  ;;  %v5380_v18 = vadd.f32 %v3969_v29, %v1478_v39 }
 0x311   : > { %v3144_v56 = vadd.f32 %v5371_v40, %v3078_v15  ;;  %v2297_v62 = vmul.f32 %v3740_v30, %v2296_v20  ;;  %3743 = vrsqrt.f32 %v5364_v46  ;;  %vm2314_vm3 = vcmp.eq.f32.partialorder %v5364_v46, inf }
 0x312   : > { %v2291_v7 = vsel %vm2290_vm15, %v5312_v48, %v2289_v21  ;;  %v1879_v60 = vmul.f32 %v5369_v54, %v5369_v54  ;;  %v1481_v48 = vadd.f32 %v1480_v28, %v1312_v55  ;;  %v2305_v21 = vand.u32 2147483648, %v5337_v42 }
 0x313   : > { %3208 = vst [vmem:[%s5021_s29 + $0x68] sm:$0xff] %v3144_v56  ;;  %v2294_v24 = vsel %vm2292_vm0, %v2293_v0, %v2291_v7  ;;  %v2298_v22 = vmul.f32 0.5, %v2297_v62  ;;  %v3742_v8 = vpop.eup %3741  ;;  %1678 = vadd.xlane.f32.xlu2 %v5380_v18  ;;  %v3970_v56 = vld [vmem:[%s4433_s24 + $0x180] sm:$0xff]  ;;  %vm2316_vm4 = vcmp.eq.f32.partialorder %v5364_v46, 0.0 }
 0x314   : > { %v2886_v61 = vadd.f32 0.001, %v2294_v24  ;;  %v3013_v41 = vmul.f32 %v3742_v8, %v4900_v5  ;;  %1975 = vadd.xlane.f32.xlu0 %v1879_v60  ;;  %v5404_v0 = vadd.f32 %v3970_v56, %v1481_v48 }
 0x315   : > { %v2299_v47 = vsub.f32 1.5, %v2298_v22  ;;  %v1948_v11 = vpop.xlane.xlu1 %1947 }
 0x316   : > { %3745 = vrcp.f32 %v2886_v61  ;;  %v1651_v16 = vpop.xlane.xlu0 %1650  ;;  %v3079_v37 = vmul.f32 %v5360_v45, %v3013_v41  ;;  %v5388_v51 = vmul.f32 0.007874016, %v1948_v11 }
 0x317   : > { %v3744_v59 = vpop.eup %3743  ;;  %v2300_v13 = vmul.f32 %v3740_v30, %v2299_v47  ;;  %v1752_v39 = vmul.f32 %v4697_v23, %v1651_v16  ;;  %v1313_v52 = vpop.f32.mrf.mxu2 }
 0x318   : > { %v2308_v31 = vmul.f32 %v3744_v59, %v5364_v46  ;;  %v1482_v5 = vpop.f32.mrf.mxu3  ;;  %v3145_v15 = vadd.f32 %v5371_v40, %v3079_v37  ;;  %3747 = vrsqrt.f32 %v5388_v51  ;;  %v1314_v29 = vadd.f32 %v5246_v35, %v1313_v52 }
 0x319   : > { %v2301_v20 = vmul.f32 %v2300_v13, %v5337_v42  ;;  %v5398_v44 = vsub.f32 %v4985_v53, %v1752_v39  ;;  %vm2326_vm5 = vcmp.eq.f32.partialorder %v5388_v51, inf  ;;  %vm2328_vm6 = vcmp.eq.f32.partialorder %v5388_v51, 0.0 }
 0x31a   : > { %v2309_v30 = vmul.f32 %v3744_v59, %v2308_v31  ;;  %3209 = vst [vmem:[%s5021_s29 + $0x70] sm:$0xff] %v3145_v15  ;;  %v1483_v16 = vadd.f32 %v1482_v5, %v1314_v29 }
 0x31b   : > { %v2303_v28 = vsel %vm2302_vm1, %v5337_v42, %v2301_v20  ;;  %v1880_v24 = vmul.f32 %v5398_v44, %v5398_v44 }
 0x31c   : > { %v3746_v62 = vpop.eup %3745  ;;  %v2306_v7 = vsel %vm2304_vm2, %v2305_v21, %v2303_v28  ;;  %v2310_v55 = vmul.f32 0.5, %v2309_v30  ;;  %1680 = vadd.xlane.f32.xlu0 %v5404_v0  ;;  %v3971_v30 = vld [vmem:[%s4433_s24 + $0x188] sm:$0xff] }
 0x31d   : > { %v3014_v22 = vmul.f32 %v3746_v62, %v4911_v49  ;;  %v2887_v53 = vadd.f32 0.001, %v2306_v7  ;;  %1977 = vadd.xlane.f32.xlu1 %v1880_v24  ;;  %v1653_v8 = vpop.xlane.xlu1 %1652  ;;  %v5431_v28 = vadd.f32 %v3971_v30, %v1483_v16 }
 0x31e   : > { %v2311_v60 = vsub.f32 1.5, %v2310_v55  ;;  %v3748_v42 = vpop.eup %3747  ;;  %v1950_v41 = vpop.xlane.xlu2 %1949  ;;  %v1753_v47 = vmul.f32 %v4697_v23, %v1653_v8 }
 0x31f   : > { %v3080_v61 = vmul.f32 %v5360_v45, %v3014_v22  ;;  %3749 = vrcp.f32 %v2887_v53  ;;  %v2320_v11 = vmul.f32 %v3748_v42, %v5388_v51  ;;  %v5414_v37 = vmul.f32 0.007874016, %v1950_v41  ;;  %v1316_v49 = vpop.f32.mrf.mxu2 }
 0x320   : > { %v2312_v48 = vmul.f32 %v3744_v59, %v2311_v60  ;;  %v5418_v39 = vsub.f32 %v5017_v32, %v1753_v47  ;;  %v1485_v31 = vpop.f32.mrf.mxu3  ;;  %v2317_v59 = vand.u32 2147483648, %v5364_v46  ;;  %v1317_v5 = vadd.f32 %v5246_v35, %v1316_v49 }
 0x321   : > { %v3146_v13 = vadd.f32 %v5371_v40, %v3080_v61  ;;  %v2321_v15 = vmul.f32 %v3748_v42, %v2320_v11  ;;  %3751 = vrsqrt.f32 %v5414_v37  ;;  %vm2338_vm7 = vcmp.eq.f32.partialorder %v5414_v37, inf }
 0x322   : > { %v2313_v52 = vmul.f32 %v2312_v48, %v5364_v46  ;;  %v1881_v20 = vmul.f32 %v5418_v39, %v5418_v39  ;;  %v1486_v22 = vadd.f32 %v1485_v31, %v1317_v5  ;;  %v3972_v31 = vld [vmem:[%s4433_s24 + $0x190] sm:$0xff]  ;;  %vm2340_vm8 = vcmp.eq.f32.partialorder %v5414_v37, 0.0 }
 0x323   : > { %3210 = vst [vmem:[%s5021_s29 + $0x78] sm:$0xff] %v3146_v13  ;;  %v2322_v32 = vmul.f32 0.5, %v2321_v15  ;;  %v2329_v13 = vand.u32 2147483648, %v5388_v51 }
 0x324   : > { %v2315_v21 = vsel %vm2314_vm3, %v5364_v46, %v2313_v52  ;;  %1979 = vadd.xlane.f32.xlu2 %v1881_v20  ;;  %v5449_v52 = vadd.f32 %v3972_v31, %v1486_v22 }
 0x325   : > { %v3750_v56 = vpop.eup %3749  ;;  %v2318_v62 = vsel %vm2316_vm4, %v2317_v59, %v2315_v21  ;;  %v2323_v29 = vsub.f32 1.5, %v2322_v32  ;;  %1682 = vadd.xlane.f32.xlu1 %v5431_v28 }
 0x326   : > { %v3015_v7 = vmul.f32 %v3750_v56, %v4932_v17  ;;  %v2888_v55 = vadd.f32 0.001, %v2318_v62  ;;  %v1952_v24 = vpop.xlane.xlu0 %1951  ;;  %v1655_v53 = vpop.xlane.xlu2 %1654 }
 0x327   : > { %v5435_v60 = vmul.f32 0.007874016, %v1952_v24  ;;  %v3752_v46 = vpop.eup %3751  ;;  %v2324_v61 = vmul.f32 %v3748_v42, %v2323_v29  ;;  %v1754_v41 = vmul.f32 %v4697_v23, %v1655_v53  ;;  %v1318_v47 = vpop.f32.mrf.mxu2 }
 0x328   : > { %v3081_v8 = vmul.f32 %v5360_v45, %v3015_v7  ;;  %3753 = vrcp.f32 %v2888_v55  ;;  %v2332_v17 = vmul.f32 %v3752_v46, %v5414_v37  ;;  %v1487_v48 = vpop.f32.mrf.mxu3  ;;  %v1319_v59 = vadd.f32 %v5246_v35, %v1318_v47 }
 0x329   : > { %3755 = vrsqrt.f32 %v5435_v60  ;;  %v2325_v16 = vmul.f32 %v2324_v61, %v5388_v51  ;;  %v5444_v49 = vsub.f32 %v5051_v63, %v1754_v41  ;;  %vm2350_vm9 = vcmp.eq.f32.partialorder %v5435_v60, inf }
 0x32a   : > { %v3147_v11 = vadd.f32 %v5371_v40, %v3081_v8  ;;  %v2333_v42 = vmul.f32 %v3752_v46, %v2332_v17  ;;  %v1488_v22 = vadd.f32 %v1487_v48, %v1319_v59  ;;  %v2341_v48 = vand.u32 2147483648, %v5414_v37 }
 0x32b   : > { %v2327_v15 = vsel %vm2326_vm5, %v5388_v51, %v2325_v16  ;;  %v1882_v5 = vmul.f32 %v5444_v49, %v5444_v49  ;;  %vm2352_vm10 = vcmp.eq.f32.partialorder %v5435_v60, 0.0 }
 0x32c   : > { %3211 = vst [vmem:[%s5021_s29 + $0x80] sm:$0xff] %v3147_v11  ;;  %v2330_v63 = vsel %vm2328_vm6, %v2329_v13, %v2327_v15  ;;  %v2334_v20 = vmul.f32 0.5, %v2333_v42  ;;  %1684 = vadd.xlane.f32.xlu2 %v5449_v52  ;;  %v3973_v42 = vld [vmem:[%s4433_s24 + $0x198] sm:$0xff] }
 0x32d   : > { %v2889_v32 = vadd.f32 0.001, %v2330_v63  ;;  %1981 = vadd.xlane.f32.xlu0 %v1882_v5 }
 0x32e   : > { %v3754_v21 = vpop.eup %3753  ;;  %v1954_v30 = vpop.xlane.xlu1 %1953  ;;  %v2335_v55 = vsub.f32 1.5, %v2334_v20 }
 0x32f   : > { %v1657_v56 = vpop.xlane.xlu0 %1656  ;;  %v3756_v62 = vpop.eup %3755  ;;  %v3016_v7 = vmul.f32 %v3754_v21, %v4954_v2  ;;  %v5459_v29 = vmul.f32 0.007874016, %v1954_v30  ;;  %3757 = vrcp.f32 %v2889_v32  ;;  %v6316_v21 = vld [vmem:[#allocation19_spill] sm:$0xff] }
 0x330   : > { %v1755_v51 = vmul.f32 %v4697_v23, %v1657_v56  ;;  %v2344_v24 = vmul.f32 %v3756_v62, %v5435_v60  ;;  %v1321_v53 = vpop.f32.mrf.mxu2  ;;  %v2336_v61 = vmul.f32 %v3752_v46, %v2335_v55  ;;  %v5474_v46 = vadd.f32 %v3973_v42, %v1488_v22 }
 0x331   : > { %v3082_v8 = vmul.f32 %v5360_v45, %v3016_v7  ;;  %3759 = vrsqrt.f32 %v5459_v29  ;;  %v1490_v47 = vpop.f32.mrf.mxu3  ;;  %v1322_v13 = vadd.f32 %v5246_v35, %v1321_v53  ;;  %vm2362_vm11 = vcmp.eq.f32.partialorder %v5459_v29, inf }
 0x332   : > { %v2345_v41 = vmul.f32 %v3756_v62, %v2344_v24  ;;  %v5466_v2 = vsub.f32 %v5072_v1, %v1755_v51  ;;  %v2337_v11 = vmul.f32 %v2336_v61, %v5414_v37  ;;  %vm2364_vm12 = vcmp.eq.f32.partialorder %v5459_v29, 0.0 }
 0x333   : > { %v3148_v17 = vadd.f32 %v5371_v40, %v3082_v8  ;;  %v1491_v24 = vadd.f32 %v1490_v47, %v1322_v13  ;;  %v3974_v13 = vld [vmem:[%s4433_s24 + $0x1a0] sm:$0xff] }
 0x334   : > { %v2346_v16 = vmul.f32 0.5, %v2345_v41  ;;  %v1883_v31 = vmul.f32 %v5466_v2, %v5466_v2  ;;  %v2339_v1 = vsel %vm2338_vm7, %v5414_v37, %v2337_v11 }
 0x335   : > { %3212 = vst [vmem:[%s5021_s29 + $0x88] sm:$0xff] %v3148_v17  ;;  %v3758_v15 = vpop.eup %3757  ;;  %v2342_v59 = vsel %vm2340_vm8, %v2341_v48, %v2339_v1  ;;  %1686 = vadd.xlane.f32.xlu0 %v5474_v46  ;;  %v2353_v17 = vand.u32 2147483648, %v5435_v60  ;;  %v5502_v42 = vadd.f32 %v3974_v13, %v1491_v24 }
 0x336   : > { %v2347_v5 = vsub.f32 1.5, %v2346_v16  ;;  %1983 = vadd.xlane.f32.xlu1 %v1883_v31  ;;  %v1659_v63 = vpop.xlane.xlu1 %1658  ;;  %v3017_v32 = vmul.f32 %v3758_v15, %v6316_v21  ;;  %v2890_v30 = vadd.f32 0.001, %v2342_v59  ;;  %v1956_v56 = vpop.xlane.xlu2 %1955 }
 0x337   : > { %v3760_v20 = vpop.eup %3759  ;;  %v1756_v7 = vmul.f32 %v4697_v23, %v1659_v63  ;;  %v5485_v22 = vmul.f32 0.007874016, %v1956_v56 }
 0x338   : > { %v2348_v55 = vmul.f32 %v3756_v62, %v2347_v5  ;;  %v2356_v51 = vmul.f32 %v3760_v20, %v5459_v29  ;;  %v1323_v37 = vpop.f32.mrf.mxu2  ;;  %v3083_v53 = vmul.f32 %v5360_v45, %v3017_v32  ;;  %3761 = vrcp.f32 %v2890_v30  ;;  %v6317_v30 = vld [vmem:[#allocation20_spill] sm:$0xff] }
 0x339   : > { %v5489_v8 = vsub.f32 %v5102_v10, %v1756_v7  ;;  %3763 = vrsqrt.f32 %v5485_v22  ;;  %v1492_v62 = vpop.f32.mrf.mxu3  ;;  %v1324_v11 = vadd.f32 %v5246_v35, %v1323_v37  ;;  %vm2374_vm13 = vcmp.eq.f32.partialorder %v5485_v22, inf }
 0x33a   : > { %v2349_v61 = vmul.f32 %v2348_v55, %v5435_v60  ;;  %v2357_v41 = vmul.f32 %v3760_v20, %v2356_v51  ;;  %v3149_v47 = vadd.f32 %v5371_v40, %v3083_v53  ;;  %vm2376_vm14 = vcmp.eq.f32.partialorder %v5485_v22, 0.0 }
 0x33b   : > { %v1884_v16 = vmul.f32 %v5489_v8, %v5489_v8  ;;  %v1493_v63 = vadd.f32 %v1492_v62, %v1324_v11 }
 0x33c   : > { %v2351_v48 = vsel %vm2350_vm9, %v5435_v60, %v2349_v61  ;;  %v2358_v10 = vmul.f32 0.5, %v2357_v41  ;;  %3213 = vst [vmem:[%s5021_s29 + $0x90] sm:$0xff] %v3149_v47 }
 0x33d   : > { %v2354_v31 = vsel %vm2352_vm10, %v2353_v17, %v2351_v48  ;;  %1985 = vadd.xlane.f32.xlu2 %v1884_v16 }
 0x33e   : > { %v2891_v1 = vadd.f32 0.001, %v2354_v31  ;;  %v2359_v15 = vsub.f32 1.5, %v2358_v10  ;;  %1688 = vadd.xlane.f32.xlu1 %v5502_v42  ;;  %v1958_v59 = vpop.xlane.xlu0 %1957  ;;  %v3762_v5 = vpop.eup %3761  ;;  %v3975_v10 = vld [vmem:[%s4433_s24 + $0x1a8] sm:$0xff] }
 0x33f   : > { %v1661_v21 = vpop.xlane.xlu2 %1660  ;;  %v5506_v32 = vmul.f32 0.007874016, %v1958_v59  ;;  %v3764_v60 = vpop.eup %3763  ;;  %v3018_v56 = vmul.f32 %v3762_v5, %v6317_v30  ;;  %v5526_v16 = vadd.f32 %v3975_v10, %v1493_v63  ;;  %v6318_v59 = vld [vmem:[#allocation21_spill] sm:$0xff] }
 0x340   : > { %3765 = vrcp.f32 %v2891_v1  ;;  %v2360_v7 = vmul.f32 %v3760_v20, %v2359_v15  ;;  %v1757_v55 = vmul.f32 %v4697_v23, %v1661_v21  ;;  %v1326_v51 = vpop.f32.mrf.mxu2  ;;  %v2368_v24 = vmul.f32 %v3764_v60, %v5485_v22  ;;  %v3976_v10 = vld [vmem:[%s4433_s24 + $0x1b0] sm:$0xff] }
 0x341   : > { %3767 = vrsqrt.f32 %v5506_v32  ;;  %v3084_v37 = vmul.f32 %v5360_v45, %v3018_v56  ;;  %v1495_v41 = vpop.f32.mrf.mxu3  ;;  %v2365_v20 = vand.u32 2147483648, %v5459_v29  ;;  %v1327_v47 = vadd.f32 %v5246_v35, %v1326_v51 }
 0x342   : > { %v2361_v53 = vmul.f32 %v2360_v7, %v5459_v29  ;;  %v5516_v61 = vsub.f32 %v5131_v14, %v1757_v55  ;;  %v2369_v62 = vmul.f32 %v3764_v60, %v2368_v24  ;;  %vm2386_vm15 = vcmp.eq.f32.partialorder %v5506_v32, inf }
 0x343   : > { %v3150_v17 = vadd.f32 %v5371_v40, %v3084_v37  ;;  %v1496_v30 = vadd.f32 %v1495_v41, %v1327_v47  ;;  %vm2388_vm0 = vcmp.eq.f32.partialorder %v5506_v32, 0.0 }
 0x344   : > { %v2363_v11 = vsel %vm2362_vm11, %v5459_v29, %v2361_v53  ;;  %v1885_v48 = vmul.f32 %v5516_v61, %v5516_v61  ;;  %v2370_v13 = vmul.f32 0.5, %v2369_v62 }
 0x345   : > { %v2366_v14 = vsel %vm2364_vm12, %v2365_v20, %v2363_v11  ;;  %3214 = vst [vmem:[%s5021_s29 + $0x98] sm:$0xff] %v3150_v17  ;;  %1690 = vadd.xlane.f32.xlu2 %v5526_v16  ;;  %v2377_v17 = vand.u32 2147483648, %v5485_v22 }
 0x346   : > { %v3766_v31 = vpop.eup %3765  ;;  %v2892_v1 = vadd.f32 0.001, %v2366_v14  ;;  %1987 = vadd.xlane.f32.xlu0 %v1885_v48  ;;  %v2371_v21 = vsub.f32 1.5, %v2370_v13  ;;  %v1960_v29 = vpop.xlane.xlu1 %1959 }
 0x347   : > { %v3768_v15 = vpop.eup %3767  ;;  %v3019_v5 = vmul.f32 %v3766_v31, %v6318_v59  ;;  %v1663_v56 = vpop.xlane.xlu0 %1662  ;;  %v5532_v63 = vmul.f32 0.007874016, %v1960_v29  ;;  %v6319_v59 = vld [vmem:[#allocation22_spill] sm:$0xff] }
 0x348   : > { %3769 = vrcp.f32 %v2892_v1  ;;  %v2380_v7 = vmul.f32 %v3768_v15, %v5506_v32  ;;  %v1758_v55 = vmul.f32 %v4697_v23, %v1663_v56  ;;  %v1328_v51 = vpop.f32.mrf.mxu2  ;;  %v2372_v37 = vmul.f32 %v3764_v60, %v2371_v21 }
 0x349   : > { %v3085_v24 = vmul.f32 %v5360_v45, %v3019_v5  ;;  %3771 = vrsqrt.f32 %v5532_v63  ;;  %v1497_v20 = vpop.f32.mrf.mxu3  ;;  %v1329_v48 = vadd.f32 %v5246_v35, %v1328_v51  ;;  %v5546_v60 = vadd.f32 %v3976_v10, %v1496_v30  ;;  %v3977_v10 = vld [vmem:[%s4433_s24 + $0x1b8] sm:$0xff] }
 0x34a   : > { %v2381_v53 = vmul.f32 %v3768_v15, %v2380_v7  ;;  %v2373_v62 = vmul.f32 %v2372_v37, %v5485_v22  ;;  %v5541_v47 = vsub.f32 %v5159_v38, %v1758_v55  ;;  %vm2398_vm1 = vcmp.eq.f32.partialorder %v5532_v63, inf }
 0x34b   : > { %v3151_v41 = vadd.f32 %v5371_v40, %v3085_v24  ;;  %v1498_v7 = vadd.f32 %v1497_v20, %v1329_v48  ;;  %vm2400_vm2 = vcmp.eq.f32.partialorder %v5532_v63, 0.0 }
 0x34c   : > { %v2382_v11 = vmul.f32 0.5, %v2381_v53  ;;  %v2375_v14 = vsel %vm2374_vm13, %v5485_v22, %v2373_v62  ;;  %v1886_v13 = vmul.f32 %v5541_v47, %v5541_v47 }
 0x34d   : > { %3215 = vst [vmem:[%s5021_s29 + $0xa0] sm:$0xff] %v3151_v41  ;;  %v2378_v1 = vsel %vm2376_vm14, %v2377_v17, %v2375_v14  ;;  %v2389_v17 = vand.u32 2147483648, %v5506_v32  ;;  %v5571_v14 = vadd.f32 %v3977_v10, %v1498_v7 }
 0x34e   : > { %v3770_v31 = vpop.eup %3769  ;;  %v2383_v38 = vsub.f32 1.5, %v2382_v11  ;;  %1692 = vadd.xlane.f32.xlu0 %v5546_v60  ;;  %v2893_v21 = vadd.f32 0.001, %v2378_v1  ;;  %1989 = vadd.xlane.f32.xlu1 %v1886_v13  ;;  %v1665_v29 = vpop.xlane.xlu1 %1664 }
 0x34f   : > { %v3020_v5 = vmul.f32 %v3770_v31, %v6319_v59  ;;  %v3772_v30 = vpop.eup %3771  ;;  %v1962_v55 = vpop.xlane.xlu2 %1961  ;;  %v1759_v51 = vmul.f32 %v4697_v23, %v1665_v29 }
 0x350   : > { %v2384_v56 = vmul.f32 %v3768_v15, %v2383_v38  ;;  %3773 = vrcp.f32 %v2893_v21  ;;  %v2392_v24 = vmul.f32 %v3772_v30, %v5532_v63  ;;  %v5558_v37 = vmul.f32 0.007874016, %v1962_v55  ;;  %v1331_v53 = vpop.f32.mrf.mxu2 }
 0x351   : > { %v3086_v22 = vmul.f32 %v5360_v45, %v3020_v5  ;;  %v5563_v15 = vsub.f32 %v5187_v6, %v1759_v51  ;;  %v1500_v20 = vpop.f32.mrf.mxu3  ;;  %v1332_v6 = vadd.f32 %v5246_v35, %v1331_v53 }
 0x352   : > { %v2385_v41 = vmul.f32 %v2384_v56, %v5506_v32  ;;  %v2393_v11 = vmul.f32 %v3772_v30, %v2392_v24  ;;  %3775 = vrsqrt.f32 %v5558_v37  ;;  %vm2410_vm3 = vcmp.eq.f32.partialorder %v5558_v37, inf }
 0x353   : > { %v3152_v62 = vadd.f32 %v5371_v40, %v3086_v22  ;;  %v1887_v1 = vmul.f32 %v5563_v15, %v5563_v15  ;;  %v1501_v51 = vadd.f32 %v1500_v20, %v1332_v6  ;;  %v2401_v20 = vand.u32 2147483648, %v5532_v63 }
 0x354   : > { %v2387_v48 = vsel %vm2386_vm15, %v5506_v32, %v2385_v41  ;;  %v2394_v31 = vmul.f32 0.5, %v2393_v11  ;;  %vm2412_vm4 = vcmp.eq.f32.partialorder %v5558_v37, 0.0 }
 0x355   : > { %3216 = vst [vmem:[%s5021_s29 + $0xa8] sm:$0xff] %v3152_v62  ;;  %v2390_v13 = vsel %vm2388_vm0, %v2389_v17, %v2387_v48  ;;  %v1964_v59 = vpop.xlane.xlu0 %1963  ;;  %1991 = vadd.xlane.f32.xlu2 %v1887_v1 }
 0x356   : > { %v2894_v38 = vadd.f32 0.001, %v2390_v13  ;;  %v3774_v5 = vpop.eup %3773  ;;  %v2395_v21 = vsub.f32 1.5, %v2394_v31  ;;  %1694 = vadd.xlane.f32.xlu1 %v5571_v14  ;;  %v5578_v29 = vmul.f32 0.007874016, %v1964_v59  ;;  %v3978_v31 = vld [vmem:[%s4433_s24 + $0x1c0] sm:$0xff] }
 0x357   : > { %v3021_v32 = vmul.f32 %v3774_v5, %v5096_v57  ;;  %v1667_v56 = vpop.xlane.xlu2 %1666  ;;  %v5598_v6 = vadd.f32 %v3978_v31, %v1501_v51 }
 0x358   : > { %3777 = vrcp.f32 %v2894_v38  ;;  %v3776_v7 = vpop.eup %3775  ;;  %v2396_v55 = vmul.f32 %v3772_v30, %v2395_v21  ;;  %v1760_v22 = vmul.f32 %v4697_v23, %v1667_v56  ;;  %v1333_v24 = vpop.f32.mrf.mxu2  ;;  %v6320_v21 = vld [vmem:[#allocation23_spill] sm:$0xff]  ;;  %vm2422_vm5 = vcmp.eq.f32.partialorder %v5578_v29, inf }
 0x359   : > { %3779 = vrsqrt.f32 %v5578_v29  ;;  %v3087_v53 = vmul.f32 %v5360_v45, %v3021_v32  ;;  %v2404_v41 = vmul.f32 %v3776_v7, %v5558_v37  ;;  %v1502_v62 = vpop.f32.mrf.mxu3  ;;  %v1334_v10 = vadd.f32 %v5246_v35, %v1333_v24 }
 0x35a   : > { %v2397_v17 = vmul.f32 %v2396_v55, %v5532_v63  ;;  %v5588_v57 = vsub.f32 %v5217_v34, %v1760_v22  ;;  %vm2424_vm6 = vcmp.eq.f32.partialorder %v5578_v29, 0.0 }
 0x35b   : > { %v3153_v30 = vadd.f32 %v5371_v40, %v3087_v53  ;;  %v2405_v11 = vmul.f32 %v3776_v7, %v2404_v41  ;;  %v1503_v41 = vadd.f32 %v1502_v62, %v1334_v10 }
 0x35c   : > { %v2399_v48 = vsel %vm2398_vm1, %v5532_v63, %v2397_v17  ;;  %v1888_v13 = vmul.f32 %v5588_v57, %v5588_v57 }
 0x35d   : > { %3217 = vst [vmem:[%s5021_s29 + $0xb0] sm:$0xff] %v3153_v30  ;;  %v2402_v34 = vsel %vm2400_vm2, %v2401_v20, %v2399_v48  ;;  %v2406_v38 = vmul.f32 0.5, %v2405_v11  ;;  %v1669_v59 = vpop.xlane.xlu0 %1668  ;;  %1696 = vadd.xlane.f32.xlu2 %v5598_v6  ;;  %v1966_v63 = vpop.xlane.xlu1 %1965 }
 0x35e   : > { %v3778_v1 = vpop.eup %3777  ;;  %v2895_v56 = vadd.f32 0.001, %v2402_v34  ;;  %1993 = vadd.xlane.f32.xlu0 %v1888_v13  ;;  %v1761_v55 = vmul.f32 %v4697_v23, %v1669_v59  ;;  %v5605_v51 = vmul.f32 0.007874016, %v1966_v63 }
 0x35f   : > { %v3780_v5 = vpop.eup %3779  ;;  %v3022_v32 = vmul.f32 %v3778_v1, %v6320_v21  ;;  %v2407_v22 = vsub.f32 1.5, %v2406_v38 }
 0x360   : > { %v2416_v24 = vmul.f32 %v3780_v5, %v5578_v29  ;;  %3781 = vrcp.f32 %v2895_v56  ;;  %v5609_v17 = vsub.f32 %v5240_v9, %v1761_v55  ;;  %v1336_v30 = vpop.f32.mrf.mxu2  ;;  %v2413_v9 = vand.u32 2147483648, %v5558_v37 }
 0x361   : > { %v3088_v53 = vmul.f32 %v5360_v45, %v3022_v32  ;;  %v2408_v20 = vmul.f32 %v3776_v7, %v2407_v22  ;;  %3783 = vrsqrt.f32 %v5605_v51  ;;  %v1505_v48 = vpop.f32.mrf.mxu3  ;;  %v1337_v31 = vadd.f32 %v5246_v35, %v1336_v30  ;;  %v3979_v7 = vld [vmem:[%s4433_s24 + $0x1c8] sm:$0xff] }
 0x362   : > { %v2417_v11 = vmul.f32 %v3780_v5, %v2416_v24  ;;  %v1889_v38 = vmul.f32 %v5609_v17, %v5609_v17  ;;  %v5621_v62 = vadd.f32 %v3979_v7, %v1503_v41  ;;  %vm2434_vm7 = vcmp.eq.f32.partialorder %v5605_v51, inf }
 0x363   : > { %v3154_v13 = vadd.f32 %v5371_v40, %v3088_v53  ;;  %v2409_v1 = vmul.f32 %v2408_v20, %v5558_v37  ;;  %v1506_v32 = vadd.f32 %v1505_v48, %v1337_v31  ;;  %vm2436_vm8 = vcmp.eq.f32.partialorder %v5605_v51, 0.0 }
 0x364   : > { %v2418_v34 = vmul.f32 0.5, %v2417_v11  ;;  %1995 = vadd.xlane.f32.xlu1 %v1889_v38  ;;  %v3980_v38 = vld [vmem:[%s4433_s24 + $0x1d0] sm:$0xff] }
 0x365   : > { %3218 = vst [vmem:[%s5021_s29 + $0xb8] sm:$0xff] %v3154_v13  ;;  %v2411_v10 = vsel %vm2410_vm3, %v5558_v37, %v2409_v1  ;;  %v1671_v63 = vpop.xlane.xlu1 %1670 }
 0x366   : > { %v2419_v59 = vsub.f32 1.5, %v2418_v34  ;;  %v3782_v35 = vpop.eup %3781  ;;  %v2414_v21 = vsel %vm2412_vm4, %v2413_v9, %v2411_v10  ;;  %1698 = vadd.xlane.f32.xlu0 %v5621_v62  ;;  %v1968_v56 = vpop.xlane.xlu2 %1967  ;;  %v1762_v37 = vmul.f32 %v4697_v23, %v1671_v63  ;;  %v5643_v9 = vadd.f32 %v3980_v38, %v1506_v32 }
 0x367   : > { %v3784_v55 = vpop.eup %3783  ;;  %v3023_v22 = vmul.f32 %v3782_v35, %v5150_v50  ;;  %v2896_v24 = vadd.f32 0.001, %v2414_v21  ;;  %v5627_v41 = vmul.f32 0.007874016, %v1968_v56  ;;  %v2425_v50 = vand.u32 2147483648, %v5578_v29 }
 0x368   : > { %v2420_v53 = vmul.f32 %v3780_v5, %v2419_v59  ;;  %v2428_v30 = vmul.f32 %v3784_v55, %v5605_v51  ;;  %v1338_v20 = vpop.f32.mrf.mxu2  ;;  %v5640_v34 = vsub.f32 %v5274_v43, %v1762_v37  ;;  %v5646_v35 = vld [vmem:[#allocation10] ss:$0 sm:$0xff] }
 0x369   : > { %v3089_v11 = vmul.f32 %v5360_v45, %v3023_v22  ;;  %3785 = vrcp.f32 %v2896_v24  ;;  %v1507_v13 = vpop.f32.mrf.mxu3  ;;  %v1339_v21 = vadd.f32 %v5646_v35, %v1338_v20  ;;  %vm2446_vm9 = vcmp.eq.f32.partialorder %v5627_v41, inf }
 0x36a   : > { %v2421_v48 = vmul.f32 %v2420_v53, %v5578_v29  ;;  %v2429_v5 = vmul.f32 %v3784_v55, %v2428_v30  ;;  %3787 = vrsqrt.f32 %v5627_v41  ;;  %v1890_v56 = vmul.f32 %v5640_v34, %v5640_v34 }
 0x36b   : > { %v3155_v31 = vadd.f32 %v5371_v40, %v3089_v11  ;;  %v1508_v11 = vadd.f32 %v1507_v13, %v1339_v21  ;;  %vm2448_vm10 = vcmp.eq.f32.partialorder %v5627_v41, 0.0 }
 0x36c   : > { %v2423_v1 = vsel %vm2422_vm5, %v5578_v29, %v2421_v48  ;;  %v2430_v10 = vmul.f32 0.5, %v2429_v5  ;;  %1700 = vadd.xlane.f32.xlu1 %v5643_v9  ;;  %1997 = vadd.xlane.f32.xlu2 %v1890_v56  ;;  %v3982_v56 = vld [vmem:[%s4433_s24 + $0x1d8] sm:$0xff] }
 0x36d   : > { %v2426_v7 = vsel %vm2424_vm6, %v2425_v50, %v2423_v1  ;;  %3219 = vst [vmem:[%s5021_s29 + $0xc0] sm:$0xff] %v3155_v31  ;;  %v1970_v29 = vpop.xlane.xlu0 %1969 }
 0x36e   : > { %v2897_v59 = vadd.f32 0.001, %v2426_v7  ;;  %v2431_v63 = vsub.f32 1.5, %v2430_v10  ;;  %v1673_v43 = vpop.xlane.xlu2 %1672  ;;  %v5652_v22 = vmul.f32 0.007874016, %v1970_v29  ;;  %v5672_v29 = vadd.f32 %v3982_v56, %v1508_v11 }
 0x36f   : > { %v3786_v32 = vpop.eup %3785  ;;  %v1763_v24 = vmul.f32 %v4697_v23, %v1673_v43 }
 0x370   : > { %3789 = vrcp.f32 %v2897_v59  ;;  %v3788_v53 = vpop.eup %3787  ;;  %v3024_v30 = vmul.f32 %v3786_v32, %v5178_v25  ;;  %v2432_v37 = vmul.f32 %v3784_v55, %v2431_v63  ;;  %v1341_v50 = vpop.f32.mrf.mxu2  ;;  %v2437_v25 = vand.u32 2147483648, %v5605_v51 }
 0x371   : > { %3791 = vrsqrt.f32 %v5652_v22  ;;  %v2440_v20 = vmul.f32 %v3788_v53, %v5627_v41  ;;  %v5659_v48 = vsub.f32 %v5304_v27, %v1763_v24  ;;  %v1510_v5 = vpop.f32.mrf.mxu3  ;;  %v1342_v38 = vadd.f32 %v5646_v35, %v1341_v50 }
 0x372   : > { %v3090_v31 = vmul.f32 %v5360_v45, %v3024_v30  ;;  %v2433_v1 = vmul.f32 %v2432_v37, %v5605_v51  ;;  %vm2458_vm11 = vcmp.eq.f32.partialorder %v5652_v22, inf  ;;  %vm2460_vm12 = vcmp.eq.f32.partialorder %v5652_v22, 0.0 }
 0x373   : > { %v2441_v55 = vmul.f32 %v3788_v53, %v2440_v20  ;;  %v1891_v13 = vmul.f32 %v5659_v48, %v5659_v48 }
 0x374   : > { %v3156_v27 = vadd.f32 %v5371_v40, %v3090_v31  ;;  %v2435_v7 = vsel %vm2434_vm7, %v5605_v51, %v2433_v1  ;;  %v1511_v31 = vadd.f32 %v1510_v5, %v1342_v38  ;;  %1702 = vadd.xlane.f32.xlu2 %v5672_v29  ;;  %v3983_v5 = vld [vmem:[%s4433_s24 + $0x1e0] sm:$0xff] }
 0x375   : > { %v2438_v59 = vsel %vm2436_vm8, %v2437_v25, %v2435_v7  ;;  %v2442_v21 = vmul.f32 0.5, %v2441_v55  ;;  %1999 = vadd.xlane.f32.xlu0 %v1891_v13  ;;  %v1972_v63 = vpop.xlane.xlu1 %1971  ;;  %v1675_v43 = vpop.xlane.xlu0 %1674 }
 0x376   : > { %v3790_v10 = vpop.eup %3789  ;;  %3220 = vst [vmem:[%s5021_s29 + $0xc8] sm:$0xff] %v3156_v27  ;;  %v2898_v30 = vadd.f32 0.001, %v2438_v59  ;;  %v5676_v37 = vmul.f32 0.007874016, %v1972_v63  ;;  %v1764_v20 = vmul.f32 %v4697_v23, %v1675_v43  ;;  %v5689_v38 = vadd.f32 %v3983_v5, %v1511_v31 }
 0x377   : > { %v3792_v32 = vpop.eup %3791  ;;  %v3025_v24 = vmul.f32 %v3790_v10, %v5202_v33  ;;  %v2443_v51 = vsub.f32 1.5, %v2442_v21 }
 0x378   : > { %v2452_v50 = vmul.f32 %v3792_v32, %v5652_v22  ;;  %3793 = vrcp.f32 %v2898_v30  ;;  %v1343_v33 = vpop.f32.mrf.mxu2  ;;  %v5685_v27 = vsub.f32 %v5326_v3, %v1764_v20  ;;  %vm2470_vm13 = vcmp.eq.f32.partialorder %v5676_v37, inf }
 0x379   : > { %v3091_v11 = vmul.f32 %v5360_v45, %v3025_v24  ;;  %v2444_v1 = vmul.f32 %v3788_v53, %v2443_v51  ;;  %3795 = vrsqrt.f32 %v5676_v37  ;;  %v1512_v55 = vpop.f32.mrf.mxu3  ;;  %v2449_v53 = vand.u32 2147483648, %v5627_v41 }
 0x37a   : > { %v2453_v25 = vmul.f32 %v3792_v32, %v2452_v50  ;;  %v1344_v59 = vadd.f32 %v5646_v35, %v1343_v33  ;;  %v1892_v21 = vmul.f32 %v5685_v27, %v5685_v27  ;;  %vm2472_vm14 = vcmp.eq.f32.partialorder %v5676_v37, 0.0 }
 0x37b   : > { %v3157_v13 = vadd.f32 %v5371_v40, %v3091_v11  ;;  %v2445_v7 = vmul.f32 %v2444_v1, %v5627_v41 }
 0x37c   : > { %v2454_v10 = vmul.f32 0.5, %v2453_v25  ;;  %2001 = vadd.xlane.f32.xlu1 %v1892_v21  ;;  %v1513_v1 = vadd.f32 %v1512_v55, %v1344_v59  ;;  %v3984_v21 = vld [vmem:[%s4433_s24 + $0x1e8] sm:$0xff] }
 0x37d   : > { %3221 = vst [vmem:[%s5021_s29 + $0xd0] sm:$0xff] %v3157_v13  ;;  %v2447_v56 = vsel %vm2446_vm9, %v5627_v41, %v2445_v7  ;;  %1704 = vadd.xlane.f32.xlu0 %v5689_v38  ;;  %v1677_v59 = vpop.xlane.xlu1 %1676 }
 0x37e   : > { %v2455_v3 = vsub.f32 1.5, %v2454_v10  ;;  %v3794_v63 = vpop.eup %3793  ;;  %v2450_v43 = vsel %vm2448_vm10, %v2449_v53, %v2447_v56  ;;  %v1974_v24 = vpop.xlane.xlu2 %1973  ;;  %v5714_v56 = vadd.f32 %v3984_v21, %v1513_v1 }
 0x37f   : > { %v3796_v30 = vpop.eup %3795  ;;  %v3026_v20 = vmul.f32 %v3794_v63, %v5235_v58  ;;  %v2899_v51 = vadd.f32 0.001, %v2450_v43  ;;  %v5701_v31 = vmul.f32 0.007874016, %v1974_v24  ;;  %v2461_v58 = vand.u32 2147483648, %v5652_v22 }
 0x380   : > { %v2456_v50 = vmul.f32 %v3792_v32, %v2455_v3  ;;  %v2464_v11 = vmul.f32 %v3796_v30, %v5676_v37  ;;  %v1346_v33 = vpop.f32.mrf.mxu2 }
 0x381   : > { %v3092_v25 = vmul.f32 %v5360_v45, %v3026_v20  ;;  %3797 = vrcp.f32 %v2899_v51  ;;  %v1515_v13 = vpop.f32.mrf.mxu3  ;;  %v1347_v10 = vadd.f32 %v5646_v35, %v1346_v33  ;;  %v1765_v20 = vmul.f32 %v4697_v23, %v1677_v59  ;;  %v3985_v51 = vld [vmem:[%s4433_s24 + $0x1f0] sm:$0xff] }
 0x382   : > { %v2457_v41 = vmul.f32 %v2456_v50, %v5652_v22  ;;  %v2465_v7 = vmul.f32 %v3796_v30, %v2464_v11  ;;  %3799 = vrsqrt.f32 %v5701_v31  ;;  %vm2482_vm15 = vcmp.eq.f32.partialorder %v5701_v31, inf }
 0x383   : > { %v3158_v32 = vadd.f32 %v5371_v40, %v3092_v25  ;;  %v1516_v63 = vadd.f32 %v1515_v13, %v1347_v10  ;;  %vm2484_vm0 = vcmp.eq.f32.partialorder %v5701_v31, 0.0 }
 0x384   : > { %v2459_v55 = vsel %vm2458_vm11, %v5652_v22, %v2457_v41  ;;  %v2466_v53 = vmul.f32 0.5, %v2465_v7  ;;  %1706 = vadd.xlane.f32.xlu1 %v5714_v56 }
 0x385   : > { %v2462_v5 = vsel %vm2460_vm12, %v2461_v58, %v2459_v55  ;;  %3222 = vst [vmem:[%s5021_s29 + $0xd8] sm:$0xff] %v3158_v32  ;;  %v5720_v22 = vadd.f32 %v3985_v51, %v1516_v63  ;;  %v5734_v55 = vsub.f32 %v5350_v4, %v1765_v20  ;;  %v3986_v4 = vld [vmem:[%s4433_s24 + $0x1f8] sm:$0xff] }
 0x386   : > { %v2900_v3 = vadd.f32 0.001, %v2462_v5  ;;  %v2467_v43 = vsub.f32 1.5, %v2466_v53  ;;  %v1679_v10 = vpop.xlane.xlu2 %1678 }
 0x387   : > { %v3798_v24 = vpop.eup %3797  ;;  %v1976_v50 = vpop.xlane.xlu0 %1975  ;;  %1708 = vadd.xlane.f32.xlu2 %v5720_v22 }
 0x388   : > { %3801 = vrcp.f32 %v2900_v3  ;;  %v3800_v11 = vpop.eup %3799  ;;  %v3027_v25 = vmul.f32 %v3798_v24, %v5264_v36  ;;  %v2468_v41 = vmul.f32 %v3796_v30, %v2467_v43  ;;  %v5723_v1 = vmul.f32 0.007874016, %v1976_v50  ;;  %v1348_v13 = vpop.f32.mrf.mxu2 }
 0x389   : > { %v2476_v33 = vmul.f32 %v3800_v11, %v5701_v31  ;;  %v1349_v32 = vadd.f32 %v5646_v35, %v1348_v13  ;;  %v2473_v36 = vand.u32 2147483648, %v5676_v37  ;;  %v1517_v5 = vpop.f32.mrf.mxu3  ;;  %v1766_v24 = vmul.f32 %v4697_v23, %v1679_v10 }
 0x38a   : > { %v3093_v58 = vmul.f32 %v5360_v45, %v3027_v25  ;;  %v2469_v7 = vmul.f32 %v2468_v41, %v5676_v37  ;;  %3803 = vrsqrt.f32 %v5723_v1  ;;  %vm2494_vm1 = vcmp.eq.f32.partialorder %v5723_v1, inf }
 0x38b   : > { %v2477_v30 = vmul.f32 %v3800_v11, %v2476_v33  ;;  %v1518_v35 = vadd.f32 %v1517_v5, %v1349_v32  ;;  %v5755_v32 = vld [vmem:[#allocation10 + $0x2] ss:$0 sm:$0xff]  ;;  %vm2496_vm2 = vcmp.eq.f32.partialorder %v5723_v1, 0.0 }
 0x38c   : > { %v3159_v45 = vadd.f32 %v5371_v40, %v3093_v58  ;;  %v2471_v53 = vsel %vm2470_vm13, %v5676_v37, %v2469_v7  ;;  %v1893_v40 = vmul.f32 %v5734_v55, %v5734_v55  ;;  %v5747_v37 = vld [vmem:[#allocation10 + $0x1] ss:$0 sm:$0xff] }
 0x38d   : > { %v2474_v21 = vsel %vm2472_vm14, %v2473_v36, %v2471_v53  ;;  %v2478_v3 = vmul.f32 0.5, %v2477_v30  ;;  %v5743_v20 = vadd.f32 %v3986_v4, %v1518_v35  ;;  %v5759_v30 = vsub.f32 %v5380_v18, %v1766_v24 }
 0x38e   : > { %v3802_v59 = vpop.eup %3801  ;;  %3223 = vst [vmem:[%s5021_s29 + $0xe0] sm:$0xff] %v3159_v45  ;;  %v2901_v43 = vadd.f32 0.001, %v2474_v21 }
 0x38f   : > { %v3028_v63 = vmul.f32 %v3802_v59, %v5287_v12  ;;  %v2479_v51 = vsub.f32 1.5, %v2478_v3  ;;  %v1681_v50 = vpop.xlane.xlu0 %1680  ;;  %1710 = vadd.xlane.f32.xlu0 %v5743_v20  ;;  %2003 = vadd.xlane.f32.xlu2 %v1893_v40  ;;  %v1894_v21 = vmul.f32 %v5759_v30, %v5759_v30 }
 0x390   : > { %v3804_v25 = vpop.eup %3803  ;;  %3805 = vrcp.f32 %v2901_v43  ;;  %v1978_v12 = vpop.xlane.xlu1 %1977  ;;  %v1767_v33 = vmul.f32 %v4697_v23, %v1681_v50 }
 0x391   : > { %v3094_v41 = vmul.f32 %v5747_v37, %v3028_v63  ;;  %v2480_v13 = vmul.f32 %v3800_v11, %v2479_v51  ;;  %v2488_v58 = vmul.f32 %v3804_v25, %v5723_v1  ;;  %v5753_v7 = vmul.f32 0.007874016, %v1978_v12 }
 0x392   : > { %v5762_v10 = vsub.f32 %v5404_v0, %v1767_v33  ;;  %v2485_v11 = vand.u32 2147483648, %v5701_v31 }
 0x393   : > { %v3160_v36 = vadd.f32 %v5755_v32, %v3094_v41  ;;  %v2481_v5 = vmul.f32 %v2480_v13, %v5701_v31  ;;  %v2489_v45 = vmul.f32 %v3804_v25, %v2488_v58  ;;  %3807 = vrsqrt.f32 %v5753_v7 }
 0x394   : > { %v1895_v53 = vmul.f32 %v5762_v10, %v5762_v10  ;;  %v2497_v58 = vand.u32 2147483648, %v5723_v1  ;;  %vm2506_vm3 = vcmp.eq.f32.partialorder %v5753_v7, inf  ;;  %vm2508_vm4 = vcmp.eq.f32.partialorder %v5753_v7, 0.0 }
 0x395   : > { %3224 = vst [vmem:[%s5021_s29 + $0xe8] sm:$0xff] %v3160_v36  ;;  %v2483_v35 = vsel %vm2482_vm15, %v5701_v31, %v2481_v5  ;;  %v2490_v18 = vmul.f32 0.5, %v2489_v45 }
 0x396   : > { %v3806_v0 = vpop.eup %3805  ;;  %v2486_v59 = vsel %vm2484_vm0, %v2485_v11, %v2483_v35  ;;  %2007 = vadd.xlane.f32.xlu1 %v1895_v53 }
 0x397   : > { %v3029_v3 = vmul.f32 %v3806_v0, %v5316_v19  ;;  %v2902_v63 = vadd.f32 0.001, %v2486_v59  ;;  %v2491_v43 = vsub.f32 1.5, %v2490_v18  ;;  %v1980_v24 = vpop.xlane.xlu2 %1979  ;;  %2005 = vadd.xlane.f32.xlu0 %v1894_v21 }
 0x398   : > { %v5776_v4 = vmul.f32 0.007874016, %v1980_v24  ;;  %v1683_v51 = vpop.xlane.xlu1 %1682 }
 0x399   : > { %v3808_v40 = vpop.eup %3807  ;;  %v3095_v31 = vmul.f32 %v5747_v37, %v3029_v3  ;;  %3809 = vrcp.f32 %v2902_v63  ;;  %v2492_v50 = vmul.f32 %v3804_v25, %v2491_v43  ;;  %v1768_v41 = vmul.f32 %v4697_v23, %v1683_v51 }
 0x39a   : > { %v2500_v12 = vmul.f32 %v3808_v40, %v5753_v7  ;;  %3811 = vrsqrt.f32 %v5776_v4  ;;  %vm2518_vm5 = vcmp.eq.f32.partialorder %v5776_v4, inf  ;;  %vm2520_vm6 = vcmp.eq.f32.partialorder %v5776_v4, 0.0 }
 0x39b   : > { %v3161_v19 = vadd.f32 %v5755_v32, %v3095_v31  ;;  %v2493_v33 = vmul.f32 %v2492_v50, %v5723_v1  ;;  %v5785_v13 = vsub.f32 %v5431_v28, %v1768_v41 }
 0x39c   : > { %v2501_v36 = vmul.f32 %v3808_v40, %v2500_v12  ;;  %v2509_v12 = vand.u32 2147483648, %v5753_v7 }
 0x39d   : > { %3225 = vst [vmem:[%s5021_s29 + $0xf0] sm:$0xff] %v3161_v19  ;;  %v2495_v25 = vsel %vm2494_vm1, %v5723_v1, %v2493_v33  ;;  %v1896_v5 = vmul.f32 %v5785_v13, %v5785_v13 }
 0x39e   : > { %v2498_v45 = vsel %vm2496_vm2, %v2497_v58, %v2495_v25  ;;  %v2502_v11 = vmul.f32 0.5, %v2501_v36 }
 0x39f   : > { %v3810_v53 = vpop.eup %3809  ;;  %v2903_v35 = vadd.f32 0.001, %v2498_v45  ;;  %2009 = vadd.xlane.f32.xlu2 %v1896_v5  ;;  %v1685_v28 = vpop.xlane.xlu2 %1684 }
 0x3a0   : > { %v3812_v18 = vpop.eup %3811  ;;  %v3030_v0 = vmul.f32 %v3810_v53, %v5341_v26  ;;  %v2503_v59 = vsub.f32 1.5, %v2502_v11  ;;  %v1769_v21 = vmul.f32 %v4697_v23, %v1685_v28  ;;  %v1982_v3 = vpop.xlane.xlu0 %1981 }
 0x3a1   : > { %3813 = vrcp.f32 %v2903_v35  ;;  %v2512_v1 = vmul.f32 %v3812_v18, %v5776_v4  ;;  %v5797_v63 = vmul.f32 0.007874016, %v1982_v3 }
 0x3a2   : > { %v3096_v43 = vmul.f32 %v5747_v37, %v3030_v0  ;;  %v2504_v24 = vmul.f32 %v3808_v40, %v2503_v59  ;;  %v5801_v51 = vsub.f32 %v5449_v52, %v1769_v21  ;;  %v2521_v21 = vand.u32 2147483648, %v5776_v4 }
 0x3a3   : > { %v2513_v31 = vmul.f32 %v3812_v18, %v2512_v1  ;;  %3815 = vrsqrt.f32 %v5797_v63  ;;  %vm2530_vm7 = vcmp.eq.f32.partialorder %v5797_v63, inf  ;;  %vm2532_vm8 = vcmp.eq.f32.partialorder %v5797_v63, 0.0 }
 0x3a4   : > { %v3162_v26 = vadd.f32 %v5755_v32, %v3096_v43  ;;  %v2505_v50 = vmul.f32 %v2504_v24, %v5753_v7  ;;  %v1897_v41 = vmul.f32 %v5801_v51, %v5801_v51 }
 0x3a5   : > { %v2514_v19 = vmul.f32 0.5, %v2513_v31 }
 0x3a6   : > { %3226 = vst [vmem:[%s5021_s29 + $0xf8] sm:$0xff] %v3162_v26  ;;  %v2507_v40 = vsel %vm2506_vm3, %v5753_v7, %v2505_v50  ;;  %2011 = vadd.xlane.f32.xlu0 %v1897_v41 }
 0x3a7   : > { %v3814_v52 = vpop.eup %3813  ;;  %v2510_v33 = vsel %vm2508_vm4, %v2509_v12, %v2507_v40  ;;  %v2515_v58 = vsub.f32 1.5, %v2514_v19 }
 0x3a8   : > { %v3031_v36 = vmul.f32 %v3814_v52, %v5369_v54  ;;  %v2904_v25 = vadd.f32 0.001, %v2510_v33  ;;  %v1687_v45 = vpop.xlane.xlu0 %1686 }
 0x3a9   : > { %v1984_v5 = vpop.xlane.xlu1 %1983  ;;  %v3816_v11 = vpop.eup %3815  ;;  %v2516_v53 = vmul.f32 %v3812_v18, %v2515_v58  ;;  %v1770_v28 = vmul.f32 %v4697_v23, %v1687_v45 }
 0x3aa   : > { %v5814_v35 = vmul.f32 0.007874016, %v1984_v5  ;;  %v3097_v0 = vmul.f32 %v5747_v37, %v3031_v36  ;;  %3817 = vrcp.f32 %v2904_v25  ;;  %v2524_v7 = vmul.f32 %v3816_v11, %v5797_v63 }
 0x3ab   : > { %v2517_v59 = vmul.f32 %v2516_v53, %v5776_v4  ;;  %v5825_v3 = vsub.f32 %v5474_v46, %v1770_v28  ;;  %v2533_v53 = vand.u32 2147483648, %v5797_v63 }
 0x3ac   : > { %3819 = vrsqrt.f32 %v5814_v35  ;;  %v3163_v54 = vadd.f32 %v5755_v32, %v3097_v0  ;;  %v2525_v18 = vmul.f32 %v3816_v11, %v2524_v7  ;;  %vm2542_vm9 = vcmp.eq.f32.partialorder %v5814_v35, inf }
 0x3ad   : > { %v2519_v1 = vsel %vm2518_vm5, %v5776_v4, %v2517_v59  ;;  %v1898_v31 = vmul.f32 %v5825_v3, %v5825_v3  ;;  %vm2544_vm10 = vcmp.eq.f32.partialorder %v5814_v35, 0.0 }
 0x3ae   : > { %3227 = vst [vmem:[%s5021_s29 + $0x100] sm:$0xff] %v3163_v54  ;;  %v2522_v43 = vsel %vm2520_vm6, %v2521_v21, %v2519_v1  ;;  %v2526_v24 = vmul.f32 0.5, %v2525_v18 }
 0x3af   : > { %v2905_v26 = vadd.f32 0.001, %v2522_v43  ;;  %2013 = vadd.xlane.f32.xlu1 %v1898_v31 }
 0x3b0   : > { %v3818_v50 = vpop.eup %3817  ;;  %v2527_v41 = vsub.f32 1.5, %v2526_v24  ;;  %v1986_v12 = vpop.xlane.xlu2 %1985 }
 0x3b1   : > { %v1689_v19 = vpop.xlane.xlu1 %1688  ;;  %v3032_v46 = vmul.f32 %v3818_v50, %v5398_v44  ;;  %3821 = vrcp.f32 %v2905_v26  ;;  %v5833_v52 = vmul.f32 0.007874016, %v1986_v12 }
 0x3b2   : > { %v3820_v40 = vpop.eup %3819  ;;  %v1771_v4 = vmul.f32 %v4697_v23, %v1689_v19  ;;  %v2528_v33 = vmul.f32 %v3816_v11, %v2527_v41 }
 0x3b3   : > { %v2536_v58 = vmul.f32 %v3820_v40, %v5814_v35  ;;  %v3098_v36 = vmul.f32 %v5747_v37, %v3032_v46  ;;  %3823 = vrsqrt.f32 %v5833_v52  ;;  %v2545_v46 = vand.u32 2147483648, %v5814_v35 }
 0x3b4   : > { %v2529_v25 = vmul.f32 %v2528_v33, %v5797_v63  ;;  %v5841_v45 = vsub.f32 %v5502_v42, %v1771_v4  ;;  %vm2554_vm11 = vcmp.eq.f32.partialorder %v5833_v52, inf  ;;  %vm2556_vm12 = vcmp.eq.f32.partialorder %v5833_v52, 0.0 }
 0x3b5   : > { %v2537_v5 = vmul.f32 %v3820_v40, %v2536_v58  ;;  %v3164_v44 = vadd.f32 %v5755_v32, %v3098_v36 }
 0x3b6   : > { %v2531_v11 = vsel %vm2530_vm7, %v5797_v63, %v2529_v25  ;;  %v1899_v0 = vmul.f32 %v5841_v45, %v5841_v45 }
 0x3b7   : > { %v2538_v28 = vmul.f32 0.5, %v2537_v5  ;;  %v3822_v7 = vpop.eup %3821  ;;  %3228 = vst [vmem:[%s5021_s29 + $0x108] sm:$0xff] %v3164_v44  ;;  %v2534_v59 = vsel %vm2532_vm8, %v2533_v53, %v2531_v11 }
 0x3b8   : > { %v3033_v42 = vmul.f32 %v3822_v7, %v5418_v39  ;;  %v2906_v54 = vadd.f32 0.001, %v2534_v59  ;;  %2015 = vadd.xlane.f32.xlu2 %v1899_v0  ;;  %v1691_v18 = vpop.xlane.xlu2 %1690 }
 0x3b9   : > { %v2539_v21 = vsub.f32 1.5, %v2538_v28  ;;  %v1988_v1 = vpop.xlane.xlu0 %1987  ;;  %v3824_v43 = vpop.eup %3823  ;;  %v1772_v24 = vmul.f32 %v4697_v23, %v1691_v18  ;;  %v2557_v18 = vand.u32 2147483648, %v5833_v52 }
 0x3ba   : > { %v5853_v31 = vmul.f32 0.007874016, %v1988_v1  ;;  %v3099_v63 = vmul.f32 %v5747_v37, %v3033_v42  ;;  %3825 = vrcp.f32 %v2906_v54  ;;  %v2548_v50 = vmul.f32 %v3824_v43, %v5833_v52 }
 0x3bb   : > { %v2540_v26 = vmul.f32 %v3820_v40, %v2539_v21  ;;  %v5858_v41 = vsub.f32 %v5526_v16, %v1772_v24 }
 0x3bc   : > { %3827 = vrsqrt.f32 %v5853_v31  ;;  %v3165_v39 = vadd.f32 %v5755_v32, %v3099_v63  ;;  %v2549_v19 = vmul.f32 %v3824_v43, %v2548_v50  ;;  %vm2566_vm13 = vcmp.eq.f32.partialorder %v5853_v31, inf }
 0x3bd   : > { %v2541_v12 = vmul.f32 %v2540_v26, %v5814_v35  ;;  %v1900_v4 = vmul.f32 %v5858_v41, %v5858_v41  ;;  %vm2568_vm14 = vcmp.eq.f32.partialorder %v5853_v31, 0.0 }
 0x3be   : > { %3229 = vst [vmem:[%s5021_s29 + $0x110] sm:$0xff] %v3165_v39  ;;  %v2550_v16 = vmul.f32 0.5, %v2549_v19 }
 0x3bf   : > { %v2543_v40 = vsel %vm2542_vm9, %v5814_v35, %v2541_v12  ;;  %2017 = vadd.xlane.f32.xlu0 %v1900_v4 }
 0x3c0   : > { %v2546_v33 = vsel %vm2544_vm10, %v2545_v46, %v2543_v40  ;;  %v3826_v58 = vpop.eup %3825  ;;  %v2551_v25 = vsub.f32 1.5, %v2550_v16 }
 0x3c1   : > { %v2907_v36 = vadd.f32 0.001, %v2546_v33  ;;  %v1693_v5 = vpop.xlane.xlu0 %1692  ;;  %v3034_v53 = vmul.f32 %v3826_v58, %v5444_v49  ;;  %v1990_v11 = vpop.xlane.xlu1 %1989 }
 0x3c2   : > { %v3828_v44 = vpop.eup %3827  ;;  %v1773_v28 = vmul.f32 %v4697_v23, %v1693_v5  ;;  %v2552_v0 = vmul.f32 %v3824_v43, %v2551_v25  ;;  %v5873_v59 = vmul.f32 0.007874016, %v1990_v11 }
 0x3c3   : > { %3829 = vrcp.f32 %v2907_v36  ;;  %v2560_v7 = vmul.f32 %v3828_v44, %v5853_v31  ;;  %v3100_v35 = vmul.f32 %v5747_v37, %v3034_v53  ;;  %v2569_v36 = vand.u32 2147483648, %v5853_v31 }
 0x3c4   : > { %v5877_v42 = vsub.f32 %v5546_v60, %v1773_v28  ;;  %v2553_v54 = vmul.f32 %v2552_v0, %v5833_v52  ;;  %3831 = vrsqrt.f32 %v5873_v59  ;;  %vm2578_vm15 = vcmp.eq.f32.partialorder %v5873_v59, inf }
 0x3c5   : > { %v2561_v21 = vmul.f32 %v3828_v44, %v2560_v7  ;;  %v3166_v49 = vadd.f32 %v5755_v32, %v3100_v35  ;;  %vm2580_vm0 = vcmp.eq.f32.partialorder %v5873_v59, 0.0 }
 0x3c6   : > { %v1901_v1 = vmul.f32 %v5877_v42, %v5877_v42  ;;  %v2555_v43 = vsel %vm2554_vm11, %v5833_v52, %v2553_v54 }
 0x3c7   : > { %v2562_v60 = vmul.f32 0.5, %v2561_v21  ;;  %3230 = vst [vmem:[%s5021_s29 + $0x118] sm:$0xff] %v3166_v49  ;;  %v2558_v24 = vsel %vm2556_vm12, %v2557_v18, %v2555_v43 }
 0x3c8   : > { %2019 = vadd.xlane.f32.xlu1 %v1901_v1  ;;  %v2908_v26 = vadd.f32 0.001, %v2558_v24  ;;  %v1992_v12 = vpop.xlane.xlu2 %1991 }
 0x3c9   : > { %v3830_v63 = vpop.eup %3829  ;;  %v2563_v50 = vsub.f32 1.5, %v2562_v60  ;;  %v1695_v19 = vpop.xlane.xlu1 %1694  ;;  %v5890_v40 = vmul.f32 0.007874016, %v1992_v12 }
 0x3ca   : > { %v3035_v39 = vmul.f32 %v3830_v63, %v5466_v2  ;;  %v3832_v46 = vpop.eup %3831  ;;  %3833 = vrcp.f32 %v2908_v26  ;;  %v1774_v16 = vmul.f32 %v4697_v23, %v1695_v19 }
 0x3cb   : > { %v2564_v4 = vmul.f32 %v3828_v44, %v2563_v50  ;;  %v2572_v33 = vmul.f32 %v3832_v46, %v5873_v59  ;;  %3835 = vrsqrt.f32 %v5890_v40  ;;  %v2581_v50 = vand.u32 2147483648, %v5873_v59 }
 0x3cc   : > { %v3101_v52 = vmul.f32 %v5747_v37, %v3035_v39  ;;  %v5901_v5 = vsub.f32 %v5571_v14, %v1774_v16  ;;  %vm2590_vm1 = vcmp.eq.f32.partialorder %v5890_v40, inf  ;;  %vm2592_vm2 = vcmp.eq.f32.partialorder %v5890_v40, 0.0 }
 0x3cd   : > { %v2565_v58 = vmul.f32 %v2564_v4, %v5853_v31  ;;  %v2573_v25 = vmul.f32 %v3832_v46, %v2572_v33 }
 0x3ce   : > { %v3167_v2 = vadd.f32 %v5755_v32, %v3101_v52  ;;  %v1902_v28 = vmul.f32 %v5901_v5, %v5901_v5 }
 0x3cf   : > { %v2567_v44 = vsel %vm2566_vm13, %v5853_v31, %v2565_v58  ;;  %v2574_v11 = vmul.f32 0.5, %v2573_v25 }
 0x3d0   : > { %3231 = vst [vmem:[%s5021_s29 + $0x120] sm:$0xff] %v3167_v2  ;;  %v2570_v53 = vsel %vm2568_vm14, %v2569_v36, %v2567_v44  ;;  %v3834_v0 = vpop.eup %3833  ;;  %2021 = vadd.xlane.f32.xlu2 %v1902_v28  ;;  %v1697_v21 = vpop.xlane.xlu2 %1696 }
 0x3d1   : > { %v2909_v7 = vadd.f32 0.001, %v2570_v53  ;;  %v3036_v35 = vmul.f32 %v3834_v0, %v5489_v8  ;;  %v2575_v54 = vsub.f32 1.5, %v2574_v11  ;;  %v1994_v49 = vpop.xlane.xlu0 %1993  ;;  %v3836_v14 = vpop.eup %3835  ;;  %v1775_v18 = vmul.f32 %v4697_v23, %v1697_v21 }
 0x3d2   : > { %v5910_v31 = vmul.f32 0.007874016, %v1994_v49  ;;  %v2584_v60 = vmul.f32 %v3836_v14, %v5890_v40 }
 0x3d3   : > { %3837 = vrcp.f32 %v2909_v7  ;;  %v3102_v1 = vmul.f32 %v5747_v37, %v3036_v35  ;;  %v2576_v43 = vmul.f32 %v3832_v46, %v2575_v54  ;;  %v5915_v24 = vsub.f32 %v5598_v6, %v1775_v18 }
 0x3d4   : > { %3839 = vrsqrt.f32 %v5910_v31  ;;  %v2585_v26 = vmul.f32 %v3836_v14, %v2584_v60  ;;  %v2593_v7 = vand.u32 2147483648, %v5890_v40  ;;  %vm2602_vm3 = vcmp.eq.f32.partialorder %v5910_v31, inf }
 0x3d5   : > { %v3168_v8 = vadd.f32 %v5755_v32, %v3102_v1  ;;  %v2577_v63 = vmul.f32 %v2576_v43, %v5873_v59  ;;  %v1903_v39 = vmul.f32 %v5915_v24, %v5915_v24  ;;  %vm2604_vm4 = vcmp.eq.f32.partialorder %v5910_v31, 0.0 }
 0x3d6   : > { %v2586_v6 = vmul.f32 0.5, %v2585_v26 }
 0x3d7   : > { %3232 = vst [vmem:[%s5021_s29 + $0x128] sm:$0xff] %v3168_v8  ;;  %v2579_v12 = vsel %vm2578_vm15, %v5873_v59, %v2577_v63  ;;  %2023 = vadd.xlane.f32.xlu0 %v1903_v39  ;;  %v1996_v4 = vpop.xlane.xlu1 %1995 }
 0x3d8   : > { %v2582_v46 = vsel %vm2580_vm0, %v2581_v50, %v2579_v12  ;;  %v2587_v33 = vsub.f32 1.5, %v2586_v6  ;;  %v5928_v58 = vmul.f32 0.007874016, %v1996_v4 }
 0x3d9   : > { %v3838_v19 = vpop.eup %3837  ;;  %v2910_v52 = vadd.f32 0.001, %v2582_v46  ;;  %v1699_v2 = vpop.xlane.xlu0 %1698  ;;  %v2605_v46 = vand.u32 2147483648, %v5910_v31 }
 0x3da   : > { %v3037_v16 = vmul.f32 %v3838_v19, %v5516_v61  ;;  %v3840_v36 = vpop.eup %3839  ;;  %v1776_v25 = vmul.f32 %v4697_v23, %v1699_v2  ;;  %v2588_v59 = vmul.f32 %v3836_v14, %v2587_v33  ;;  %vm2614_vm5 = vcmp.eq.f32.partialorder %v5928_v58, inf }
 0x3db   : > { %3841 = vrcp.f32 %v2910_v52  ;;  %v2596_v53 = vmul.f32 %v3840_v36, %v5910_v31  ;;  %vm2616_vm6 = vcmp.eq.f32.partialorder %v5928_v58, 0.0 }
 0x3dc   : > { %v3103_v44 = vmul.f32 %v5747_v37, %v3037_v16  ;;  %3843 = vrsqrt.f32 %v5928_v58  ;;  %v2589_v61 = vmul.f32 %v2588_v59, %v5890_v40  ;;  %v5937_v0 = vsub.f32 %v5621_v62, %v1776_v25 }
 0x3dd   : > { %v2597_v28 = vmul.f32 %v3840_v36, %v2596_v53 }
 0x3de   : > { %v3169_v11 = vadd.f32 %v5755_v32, %v3103_v44  ;;  %v2591_v35 = vsel %vm2590_vm1, %v5890_v40, %v2589_v61  ;;  %v1904_v21 = vmul.f32 %v5937_v0, %v5937_v0 }
 0x3df   : > { %v2598_v54 = vmul.f32 0.5, %v2597_v28  ;;  %v2594_v49 = vsel %vm2592_vm2, %v2593_v7, %v2591_v35  ;;  %v1701_v14 = vpop.xlane.xlu1 %1700  ;;  %v1998_v63 = vpop.xlane.xlu2 %1997 }
 0x3e0   : > { %3233 = vst [vmem:[%s5021_s29 + $0x130] sm:$0xff] %v3169_v11  ;;  %v2911_v1 = vadd.f32 0.001, %v2594_v49  ;;  %2025 = vadd.xlane.f32.xlu1 %v1904_v21  ;;  %v1777_v62 = vmul.f32 %v4697_v23, %v1701_v14  ;;  %v5949_v50 = vmul.f32 0.007874016, %v1998_v63  ;;  %v2617_v21 = vand.u32 2147483648, %v5928_v58 }
 0x3e1   : > { %v3842_v18 = vpop.eup %3841  ;;  %v2599_v43 = vsub.f32 1.5, %v2598_v54 }
 0x3e2   : > { %v3844_v60 = vpop.eup %3843  ;;  %v3038_v8 = vmul.f32 %v3842_v18, %v5541_v47  ;;  %3845 = vrcp.f32 %v2911_v1  ;;  %v5953_v12 = vsub.f32 %v5643_v9, %v1777_v62  ;;  %vm2626_vm7 = vcmp.eq.f32.partialorder %v5949_v50, inf }
 0x3e3   : > { %v2600_v26 = vmul.f32 %v3840_v36, %v2599_v43  ;;  %v2608_v40 = vmul.f32 %v3844_v60, %v5928_v58  ;;  %3847 = vrsqrt.f32 %v5949_v50  ;;  %vm2628_vm8 = vcmp.eq.f32.partialorder %v5949_v50, 0.0 }
 0x3e4   : > { %v3104_v39 = vmul.f32 %v5747_v37, %v3038_v8  ;;  %v1905_v4 = vmul.f32 %v5953_v12, %v5953_v12 }
 0x3e5   : > { %v2601_v6 = vmul.f32 %v2600_v26, %v5910_v31  ;;  %v2609_v19 = vmul.f32 %v3844_v60, %v2608_v40 }
 0x3e6   : > { %v3170_v47 = vadd.f32 %v5755_v32, %v3104_v39  ;;  %2027 = vadd.xlane.f32.xlu2 %v1905_v4 }
 0x3e7   : > { %v2603_v16 = vsel %vm2602_vm3, %v5910_v31, %v2601_v6  ;;  %v2610_v9 = vmul.f32 0.5, %v2609_v19  ;;  %v1703_v53 = vpop.xlane.xlu2 %1702 }
 0x3e8   : > { %3234 = vst [vmem:[%s5021_s29 + $0x138] sm:$0xff] %v3170_v47  ;;  %v2606_v52 = vsel %vm2604_vm4, %v2605_v46, %v2603_v16  ;;  %v2000_v33 = vpop.xlane.xlu0 %1999  ;;  %v3846_v2 = vpop.eup %3845  ;;  %v1778_v28 = vmul.f32 %v4697_v23, %v1703_v53 }
 0x3e9   : > { %v2912_v36 = vadd.f32 0.001, %v2606_v52  ;;  %v2611_v25 = vsub.f32 1.5, %v2610_v9  ;;  %v5965_v44 = vmul.f32 0.007874016, %v2000_v33  ;;  %v3039_v59 = vmul.f32 %v3846_v2, %v5563_v15  ;;  %v3848_v11 = vpop.eup %3847 }
 0x3ea   : > { %v2620_v7 = vmul.f32 %v3848_v11, %v5949_v50  ;;  %v5974_v54 = vsub.f32 %v5672_v29, %v1778_v28  ;;  %v2629_v52 = vand.u32 2147483648, %v5949_v50 }
 0x3eb   : > { %3849 = vrcp.f32 %v2912_v36  ;;  %v2612_v61 = vmul.f32 %v3844_v60, %v2611_v25  ;;  %v3105_v31 = vmul.f32 %v5747_v37, %v3039_v59  ;;  %vm2638_vm9 = vcmp.eq.f32.partialorder %v5965_v44, inf }
 0x3ec   : > { %3851 = vrsqrt.f32 %v5965_v44  ;;  %v2621_v49 = vmul.f32 %v3848_v11, %v2620_v7  ;;  %v1906_v18 = vmul.f32 %v5974_v54, %v5974_v54  ;;  %vm2640_vm10 = vcmp.eq.f32.partialorder %v5965_v44, 0.0 }
 0x3ed   : > { %v2613_v35 = vmul.f32 %v2612_v61, %v5928_v58  ;;  %v3171_v15 = vadd.f32 %v5755_v32, %v3105_v31 }
 0x3ee   : > { %v2622_v43 = vmul.f32 0.5, %v2621_v49  ;;  %2029 = vadd.xlane.f32.xlu0 %v1906_v18  ;;  %v2641_v18 = vand.u32 2147483648, %v5965_v44 }
 0x3ef   : > { %v2615_v14 = vsel %vm2614_vm5, %v5928_v58, %v2613_v35  ;;  %3235 = vst [vmem:[%s5021_s29 + $0x140] sm:$0xff] %v3171_v15  ;;  %v2002_v8 = vpop.xlane.xlu1 %2001 }
 0x3f0   : > { %v2618_v1 = vsel %vm2616_vm6, %v2617_v21, %v2615_v14  ;;  %v1705_v62 = vpop.xlane.xlu0 %1704  ;;  %v2623_v39 = vsub.f32 1.5, %v2622_v43  ;;  %v5986_v6 = vmul.f32 0.007874016, %v2002_v8 }
 0x3f1   : > { %v3850_v29 = vpop.eup %3849  ;;  %v2913_v60 = vadd.f32 0.001, %v2618_v1  ;;  %v1779_v63 = vmul.f32 %v4697_v23, %v1705_v62 }
 0x3f2   : > { %v3852_v26 = vpop.eup %3851  ;;  %v3040_v40 = vmul.f32 %v3850_v29, %v5588_v57  ;;  %v2624_v46 = vmul.f32 %v3848_v11, %v2623_v39  ;;  %vm2650_vm11 = vcmp.eq.f32.partialorder %v5986_v6, inf  ;;  %vm2652_vm12 = vcmp.eq.f32.partialorder %v5986_v6, 0.0 }
 0x3f3   : > { %3853 = vrcp.f32 %v2913_v60  ;;  %v2632_v58 = vmul.f32 %v3852_v26, %v5965_v44  ;;  %v5990_v19 = vsub.f32 %v5689_v38, %v1779_v63 }
 0x3f4   : > { %v3106_v47 = vmul.f32 %v5747_v37, %v3040_v40  ;;  %3855 = vrsqrt.f32 %v5986_v6  ;;  %v2625_v9 = vmul.f32 %v2624_v46, %v5949_v50 }
 0x3f5   : > { %v2633_v4 = vmul.f32 %v3852_v26, %v2632_v58  ;;  %v1907_v16 = vmul.f32 %v5990_v19, %v5990_v19 }
 0x3f6   : > { %v3172_v57 = vadd.f32 %v5755_v32, %v3106_v47  ;;  %v2627_v38 = vsel %vm2626_vm7, %v5949_v50, %v2625_v9 }
 0x3f7   : > { %v2634_v33 = vmul.f32 0.5, %v2633_v4  ;;  %2031 = vadd.xlane.f32.xlu1 %v1907_v16  ;;  %v2630_v36 = vsel %vm2628_vm8, %v2629_v52, %v2627_v38  ;;  %v1707_v59 = vpop.xlane.xlu1 %1706  ;;  %v2653_v16 = vand.u32 2147483648, %v5986_v6 }
 0x3f8   : > { %3236 = vst [vmem:[%s5021_s29 + $0x148] sm:$0xff] %v3172_v57  ;;  %v2914_v61 = vadd.f32 0.001, %v2630_v36  ;;  %v1780_v28 = vmul.f32 %v4697_v23, %v1707_v59 }
 0x3f9   : > { %v3854_v2 = vpop.eup %3853  ;;  %v2635_v25 = vsub.f32 1.5, %v2634_v33 }
 0x3fa   : > { %v3856_v53 = vpop.eup %3855  ;;  %v3041_v11 = vmul.f32 %v3854_v2, %v5609_v17  ;;  %3857 = vrcp.f32 %v2914_v61  ;;  %v6008_v15 = vsub.f32 %v5714_v56, %v1780_v28  ;;  %v1709_v50 = vpop.xlane.xlu2 %1708 }
 0x3fb   : > { %v2636_v31 = vmul.f32 %v3852_v26, %v2635_v25  ;;  %v2644_v7 = vmul.f32 %v3856_v53, %v5986_v6  ;;  %v1781_v14 = vmul.f32 %v4697_v23, %v1709_v50 }
 0x3fc   : > { %v3107_v35 = vmul.f32 %v5747_v37, %v3041_v11  ;;  %v1908_v1 = vmul.f32 %v6008_v15, %v6008_v15 }
 0x3fd   : > { %v2637_v21 = vmul.f32 %v2636_v31, %v5965_v44  ;;  %v2645_v49 = vmul.f32 %v3856_v53, %v2644_v7  ;;  %v6020_v62 = vsub.f32 %v5720_v22, %v1781_v14 }
 0x3fe   : > { %v3173_v17 = vadd.f32 %v5755_v32, %v3107_v35  ;;  %2033 = vadd.xlane.f32.xlu2 %v1908_v1 }
 0x3ff   : > { %v2639_v43 = vsel %vm2638_vm9, %v5965_v44, %v2637_v21  ;;  %v2646_v56 = vmul.f32 0.5, %v2645_v49  ;;  %v1909_v63 = vmul.f32 %v6020_v62, %v6020_v62 }
 0x400   : > { %3237 = vst [vmem:[%s5021_s29 + $0x150] sm:$0xff] %v3173_v17  ;;  %v2642_v29 = vsel %vm2640_vm10, %v2641_v18, %v2639_v43  ;;  %v3858_v26 = vpop.eup %3857 }
 0x401   : > { %v2915_v60 = vadd.f32 0.001, %v2642_v29  ;;  %v2647_v8 = vsub.f32 1.5, %v2646_v56  ;;  %v3042_v40 = vmul.f32 %v3858_v26, %v5640_v34  ;;  %2035 = vadd.xlane.f32.xlu0 %v1909_v63 }
 0x402   : > { %v1711_v58 = vpop.xlane.xlu0 %1710  ;;  %v2004_v44 = vpop.xlane.xlu2 %2003 }
 0x403   : > { %3859 = vrcp.f32 %v2915_v60  ;;  %v2648_v39 = vmul.f32 %v3856_v53, %v2647_v8  ;;  %v1782_v22 = vmul.f32 %v4697_v23, %v1711_v58  ;;  %v3108_v47 = vmul.f32 %v5747_v37, %v3042_v40 }
 0x404   : > { %v2085_v4 = vmul.f32 0.007874016, %v2004_v44 }
 0x405   : > { %v2649_v46 = vmul.f32 %v2648_v39, %v5986_v6  ;;  %v6032_v57 = vsub.f32 %v5743_v20, %v1782_v22  ;;  %v3174_v34 = vadd.f32 %v5755_v32, %v3108_v47 }
 0x406   : > { %3861 = vrsqrt.f32 %v2085_v4  ;;  %vm2662_vm13 = vcmp.eq.f32.partialorder %v2085_v4, inf  ;;  %v2665_v63 = vand.u32 2147483648, %v2085_v4  ;;  %vm2664_vm14 = vcmp.eq.f32.partialorder %v2085_v4, 0.0 }
 0x407   : > { %v2651_v9 = vsel %vm2650_vm11, %v5986_v6, %v2649_v46  ;;  %v1910_v52 = vmul.f32 %v6032_v57, %v6032_v57  ;;  %3238 = vst [vmem:[%s5021_s29 + $0x158] sm:$0xff] %v3174_v34 }
 0x408   : > { %v2654_v23 = vsel %vm2652_vm12, %v2653_v16, %v2651_v9 }
 0x409   : > { %v3860_v33 = vpop.eup %3859  ;;  %v2916_v38 = vadd.f32 0.001, %v2654_v23  ;;  %v2008_v2 = vpop.xlane.xlu1 %2007  ;;  %2037 = vadd.xlane.f32.xlu1 %v1910_v52 }
 0x40a   : > { %v3043_v36 = vmul.f32 %v3860_v33, %v5659_v48  ;;  %v2087_v20 = vmul.f32 0.007874016, %v2008_v2  ;;  %v2006_v25 = vpop.xlane.xlu0 %2005 }
 0x40b   : > { %3863 = vrcp.f32 %v2916_v38  ;;  %v2086_v53 = vmul.f32 0.007874016, %v2006_v25 }
 0x40c   : > { %v3109_v59 = vmul.f32 %v5747_v37, %v3043_v36  ;;  %3865 = vrsqrt.f32 %v2087_v20  ;;  %v3862_v6 = vpop.eup %3861  ;;  %vm2686_vm15 = vcmp.eq.f32.partialorder %v2087_v20, inf  ;;  %v2689_v52 = vand.u32 2147483648, %v2087_v20 }
 0x40d   : > { %v2656_v61 = vmul.f32 %v3862_v6, %v2085_v4  ;;  %3867 = vrsqrt.f32 %v2086_v53  ;;  %vm2688_vm0 = vcmp.eq.f32.partialorder %v2087_v20, 0.0  ;;  %vm2674_vm1 = vcmp.eq.f32.partialorder %v2086_v53, inf }
 0x40e   : > { %v3175_v11 = vadd.f32 %v5755_v32, %v3109_v59  ;;  %vm2676_vm2 = vcmp.eq.f32.partialorder %v2086_v53, 0.0 }
 0x40f   : > { %v2657_v28 = vmul.f32 %v3862_v6, %v2656_v61 }
 0x410   : > { %3239 = vst [vmem:[%s5021_s29 + $0x160] sm:$0xff] %v3175_v11 }
 0x411   : > { %v3864_v31 = vpop.eup %3863  ;;  %v2658_v35 = vmul.f32 0.5, %v2657_v28 }
 0x412   : > { %v3866_v7 = vpop.eup %3865  ;;  %v3044_v48 = vmul.f32 %v3864_v31, %v5685_v27  ;;  %v2010_v50 = vpop.xlane.xlu2 %2009 }
 0x413   : > { %v2680_v21 = vmul.f32 %v3866_v7, %v2087_v20  ;;  %v6045_v49 = vmul.f32 0.007874016, %v2010_v50  ;;  %v2659_v17 = vsub.f32 1.5, %v2658_v35  ;;  %v3868_v18 = vpop.eup %3867 }
 0x414   : > { %v3110_v14 = vmul.f32 %v5747_v37, %v3044_v48  ;;  %v2668_v29 = vmul.f32 %v3868_v18, %v2086_v53 }
 0x415   : > { %v2681_v1 = vmul.f32 %v3866_v7, %v2680_v21  ;;  %3869 = vrsqrt.f32 %v6045_v49  ;;  %v2660_v56 = vmul.f32 %v3862_v6, %v2659_v17  ;;  %v2677_v6 = vand.u32 2147483648, %v2086_v53 }
 0x416   : > { %v3176_v43 = vadd.f32 %v5755_v32, %v3110_v14  ;;  %v2669_v27 = vmul.f32 %v3868_v18, %v2668_v29  ;;  %vm2698_vm3 = vcmp.eq.f32.partialorder %v6045_v49, inf  ;;  %vm2700_vm4 = vcmp.eq.f32.partialorder %v6045_v49, 0.0 }
 0x417   : > { %v2682_v60 = vmul.f32 0.5, %v2681_v1  ;;  %v2661_v8 = vmul.f32 %v2660_v56, %v2085_v4  ;;  %v2701_v1 = vand.u32 2147483648, %v6045_v49 }
 0x418   : > { %3240 = vst [vmem:[%s5021_s29 + $0x168] sm:$0xff] %v3176_v43  ;;  %v2670_v58 = vmul.f32 0.5, %v2669_v27 }
 0x419   : > { %v2683_v26 = vsub.f32 1.5, %v2682_v60  ;;  %v2012_v40 = vpop.xlane.xlu0 %2011  ;;  %v2663_v39 = vsel %vm2662_vm13, %v2085_v4, %v2661_v8 }
 0x41a   : > { %v6051_v44 = vmul.f32 0.007874016, %v2012_v40  ;;  %v2666_v47 = vsel %vm2664_vm14, %v2665_v63, %v2663_v39  ;;  %v2671_v34 = vsub.f32 1.5, %v2670_v58 }
 0x41b   : > { %v3870_v22 = vpop.eup %3869  ;;  %v2684_v46 = vmul.f32 %v3866_v7, %v2683_v26  ;;  %v2917_v16 = vadd.f32 0.001, %v2666_v47 }
 0x41c   : > { %v2692_v9 = vmul.f32 %v3870_v22, %v6045_v49  ;;  %3871 = vrsqrt.f32 %v6051_v44  ;;  %v2672_v33 = vmul.f32 %v3868_v18, %v2671_v34  ;;  %vm2710_vm5 = vcmp.eq.f32.partialorder %v6051_v44, inf }
 0x41d   : > { %v2685_v23 = vmul.f32 %v2684_v46, %v2087_v20  ;;  %3873 = vrcp.f32 %v2917_v16  ;;  %v2713_v16 = vand.u32 2147483648, %v6051_v44  ;;  %vm2712_vm6 = vcmp.eq.f32.partialorder %v6051_v44, 0.0 }
 0x41e   : > { %v2693_v38 = vmul.f32 %v3870_v22, %v2692_v9  ;;  %v2673_v36 = vmul.f32 %v2672_v33, %v2086_v53 }
 0x41f   : > { %v2687_v2 = vsel %vm2686_vm15, %v2087_v20, %v2685_v23 }
 0x420   : > { %v2690_v4 = vsel %vm2688_vm0, %v2689_v52, %v2687_v2  ;;  %v2694_v25 = vmul.f32 0.5, %v2693_v38  ;;  %v2675_v61 = vsel %vm2674_vm1, %v2086_v53, %v2673_v36 }
 0x421   : > { %v2919_v59 = vadd.f32 0.001, %v2690_v4  ;;  %v2678_v31 = vsel %vm2676_vm2, %v2677_v6, %v2675_v61 }
 0x422   : > { %v3872_v11 = vpop.eup %3871  ;;  %v2695_v28 = vsub.f32 1.5, %v2694_v25  ;;  %v2014_v48 = vpop.xlane.xlu1 %2013  ;;  %v2918_v50 = vadd.f32 0.001, %v2678_v31 }
 0x423   : > { %3875 = vrcp.f32 %v2919_v59  ;;  %v2704_v7 = vmul.f32 %v3872_v11, %v6051_v44  ;;  %v3874_v35 = vpop.eup %3873  ;;  %v6056_v14 = vmul.f32 0.007874016, %v2014_v48 }
 0x424   : > { %v2696_v21 = vmul.f32 %v3870_v22, %v2695_v28  ;;  %v3045_v20 = vmul.f32 %v3874_v35, %v5734_v55  ;;  %3877 = vrcp.f32 %v2918_v50  ;;  %v6093_v28 = vld [vmem:[#allocation10 + $0x2] ss:$0 sm:$0xff] }
 0x425   : > { %v2705_v17 = vmul.f32 %v3872_v11, %v2704_v7  ;;  %3879 = vrsqrt.f32 %v6056_v14  ;;  %vm2722_vm7 = vcmp.eq.f32.partialorder %v6056_v14, inf  ;;  %v2725_v35 = vand.u32 2147483648, %v6056_v14 }
 0x426   : > { %v2697_v18 = vmul.f32 %v2696_v21, %v6045_v49  ;;  %v3111_v53 = vmul.f32 %v5747_v37, %v3045_v20  ;;  %vm2724_vm8 = vcmp.eq.f32.partialorder %v6056_v14, 0.0 }
 0x427   : > { %v2706_v43 = vmul.f32 0.5, %v2705_v17 }
 0x428   : > { %v2699_v56 = vsel %vm2698_vm3, %v6045_v49, %v2697_v18  ;;  %v3177_v55 = vadd.f32 %v5755_v32, %v3111_v53 }
 0x429   : > { %v3876_v29 = vpop.eup %3875  ;;  %v2702_v60 = vsel %vm2700_vm4, %v2701_v1, %v2699_v56  ;;  %v2707_v8 = vsub.f32 1.5, %v2706_v43 }
 0x42a   : > { %v3047_v27 = vmul.f32 %v3876_v29, %v5762_v10  ;;  %v2920_v63 = vadd.f32 0.001, %v2702_v60  ;;  %3241 = vst [vmem:[%s5021_s29 + $0x170] sm:$0xff] %v3177_v55  ;;  %v3878_v39 = vpop.eup %3877 }
 0x42b   : > { %v2708_v26 = vmul.f32 %v3872_v11, %v2707_v8  ;;  %v2016_v40 = vpop.xlane.xlu2 %2015  ;;  %v3880_v47 = vpop.eup %3879  ;;  %v3046_v49 = vmul.f32 %v3878_v39, %v5759_v30  ;;  %v6088_v11 = vld [vmem:[#allocation10 + $0x1] ss:$0 sm:$0xff] }
 0x42c   : > { %v3113_v58 = vmul.f32 %v5747_v37, %v3047_v27  ;;  %3881 = vrcp.f32 %v2920_v63  ;;  %v6070_v22 = vmul.f32 0.007874016, %v2016_v40  ;;  %v2716_v34 = vmul.f32 %v3880_v47, %v6056_v14 }
 0x42d   : > { %v2709_v46 = vmul.f32 %v2708_v26, %v6051_v44  ;;  %v3112_v9 = vmul.f32 %v5747_v37, %v3046_v49 }
 0x42e   : > { %v3179_v10 = vadd.f32 %v5755_v32, %v3113_v58  ;;  %3883 = vrsqrt.f32 %v6070_v22  ;;  %v2717_v52 = vmul.f32 %v3880_v47, %v2716_v34  ;;  %vm2734_vm9 = vcmp.eq.f32.partialorder %v6070_v22, inf }
 0x42f   : > { %v2711_v23 = vsel %vm2710_vm5, %v6051_v44, %v2709_v46  ;;  %v3178_v33 = vadd.f32 %v5755_v32, %v3112_v9  ;;  %vm2736_vm10 = vcmp.eq.f32.partialorder %v6070_v22, 0.0 }
 0x430   : > { %3243 = vst [vmem:[%s5021_s29 + $0x180] sm:$0xff] %v3179_v10  ;;  %v2714_v30 = vsel %vm2712_vm6, %v2713_v16, %v2711_v23  ;;  %v2718_v4 = vmul.f32 0.5, %v2717_v52 }
 0x431   : > { %v2921_v38 = vadd.f32 0.001, %v2714_v30  ;;  %3242 = vst [vmem:[%s5021_s29 + $0x178] sm:$0xff] %v3178_v33 }
 0x432   : > { %v3882_v2 = vpop.eup %3881  ;;  %v2018_v36 = vpop.xlane.xlu0 %2017  ;;  %v2719_v6 = vsub.f32 1.5, %v2718_v4 }
 0x433   : > { %v3048_v25 = vmul.f32 %v3882_v2, %v5785_v13  ;;  %3885 = vrcp.f32 %v2921_v38  ;;  %v6086_v59 = vmul.f32 0.007874016, %v2018_v36 }
 0x434   : > { %v3884_v37 = vpop.eup %3883  ;;  %v2720_v32 = vmul.f32 %v3880_v47, %v2719_v6 }
 0x435   : > { %v3114_v44 = vmul.f32 %v6088_v11, %v3048_v25  ;;  %v2728_v61 = vmul.f32 %v3884_v37, %v6070_v22  ;;  %3887 = vrsqrt.f32 %v6086_v59  ;;  %vm2746_vm11 = vcmp.eq.f32.partialorder %v6086_v59, inf }
 0x436   : > { %v2721_v13 = vmul.f32 %v2720_v32, %v6056_v14  ;;  %vm2748_vm12 = vcmp.eq.f32.partialorder %v6086_v59, 0.0 }
 0x437   : > { %v3180_v31 = vadd.f32 %v6093_v28, %v3114_v44  ;;  %v2729_v7 = vmul.f32 %v3884_v37, %v2728_v61 }
 0x438   : > { %v2723_v20 = vsel %vm2722_vm7, %v6056_v14, %v2721_v13  ;;  %v2737_v14 = vand.u32 2147483648, %v6070_v22 }
 0x439   : > { %v3886_v48 = vpop.eup %3885  ;;  %3244 = vst [vmem:[%s5021_s29 + $0x188] sm:$0xff] %v3180_v31  ;;  %v2730_v50 = vmul.f32 0.5, %v2729_v7  ;;  %v2726_v53 = vsel %vm2724_vm8, %v2725_v35, %v2723_v20 }
 0x43a   : > { %v3049_v21 = vmul.f32 %v3886_v48, %v5801_v51  ;;  %v2922_v29 = vadd.f32 0.001, %v2726_v53 }
 0x43b   : > { %v2020_v17 = vpop.xlane.xlu1 %2019  ;;  %v3888_v18 = vpop.eup %3887  ;;  %v2731_v1 = vsub.f32 1.5, %v2730_v50 }
 0x43c   : > { %v2093_v43 = vmul.f32 0.007874016, %v2020_v17  ;;  %v3115_v56 = vmul.f32 %v6088_v11, %v3049_v21  ;;  %v2740_v55 = vmul.f32 %v3888_v18, %v6086_v59 }
 0x43d   : > { %v2732_v60 = vmul.f32 %v3884_v37, %v2731_v1 }
 0x43e   : > { %3889 = vrsqrt.f32 %v2093_v43  ;;  %v3181_v8 = vadd.f32 %v6093_v28, %v3115_v56  ;;  %v2741_v51 = vmul.f32 %v3888_v18, %v2740_v55  ;;  %vm2758_vm13 = vcmp.eq.f32.partialorder %v2093_v43, inf }
 0x43f   : > { %3891 = vrcp.f32 %v2922_v29  ;;  %v2733_v27 = vmul.f32 %v2732_v60, %v6070_v22  ;;  %v2761_v13 = vand.u32 2147483648, %v2093_v43  ;;  %vm2760_vm14 = vcmp.eq.f32.partialorder %v2093_v43, 0.0 }
 0x440   : > { %3245 = vst [vmem:[%s5021_s29 + $0x190] sm:$0xff] %v3181_v8  ;;  %v2742_v63 = vmul.f32 0.5, %v2741_v51 }
 0x441   : > { %v2735_v26 = vsel %vm2734_vm9, %v6070_v22, %v2733_v27  ;;  %v2749_v22 = vand.u32 2147483648, %v6086_v59 }
 0x442   : > { %v2738_v40 = vsel %vm2736_vm10, %v2737_v14, %v2735_v26  ;;  %v2743_v39 = vsub.f32 1.5, %v2742_v63 }
 0x443   : > { %v2923_v47 = vadd.f32 0.001, %v2738_v40  ;;  %v2022_v16 = vpop.xlane.xlu2 %2021 }
 0x444   : > { %v3890_v58 = vpop.eup %3889  ;;  %v2744_v46 = vmul.f32 %v3888_v18, %v2743_v39  ;;  %v2094_v9 = vmul.f32 0.007874016, %v2022_v16 }
 0x445   : > { %v3892_v49 = vpop.eup %3891  ;;  %v2752_v10 = vmul.f32 %v3890_v58, %v2093_v43  ;;  %3893 = vrcp.f32 %v2923_v47 }
 0x446   : > { %v3050_v34 = vmul.f32 %v3892_v49, %v5825_v3  ;;  %v2745_v23 = vmul.f32 %v2744_v46, %v6086_v59  ;;  %3895 = vrsqrt.f32 %v2094_v9  ;;  %vm2770_vm15 = vcmp.eq.f32.partialorder %v2094_v9, inf }
 0x447   : > { %v2753_v30 = vmul.f32 %v3890_v58, %v2752_v10  ;;  %v2773_v14 = vand.u32 2147483648, %v2094_v9  ;;  %vm2772_vm0 = vcmp.eq.f32.partialorder %v2094_v9, 0.0 }
 0x448   : > { %v3116_v52 = vmul.f32 %v6088_v11, %v3050_v34  ;;  %v2747_v33 = vsel %vm2746_vm11, %v6086_v59, %v2745_v23 }
 0x449   : > { %v2754_v38 = vmul.f32 0.5, %v2753_v30  ;;  %v2750_v2 = vsel %vm2748_vm12, %v2749_v22, %v2747_v33 }
 0x44a   : > { %v3182_v3 = vadd.f32 %v6093_v28, %v3116_v52  ;;  %v2924_v4 = vadd.f32 0.001, %v2750_v2  ;;  %v2024_v37 = vpop.xlane.xlu0 %2023 }
 0x44b   : > { %v2755_v36 = vsub.f32 1.5, %v2754_v38  ;;  %v3894_v25 = vpop.eup %3893  ;;  %v2095_v61 = vmul.f32 0.007874016, %v2024_v37 }
 0x44c   : > { %3246 = vst [vmem:[%s5021_s29 + $0x198] sm:$0xff] %v3182_v3  ;;  %v3051_v6 = vmul.f32 %v3894_v25, %v5841_v45  ;;  %3897 = vrcp.f32 %v2924_v4  ;;  %v3896_v32 = vpop.eup %3895 }
 0x44d   : > { %v2756_v44 = vmul.f32 %v3890_v58, %v2755_v36  ;;  %v2764_v59 = vmul.f32 %v3896_v32, %v2094_v9  ;;  %3899 = vrsqrt.f32 %v2095_v61  ;;  %vm2782_vm1 = vcmp.eq.f32.partialorder %v2095_v61, inf }
 0x44e   : > { %v3117_v31 = vmul.f32 %v6088_v11, %v3051_v6  ;;  %vm2784_vm2 = vcmp.eq.f32.partialorder %v2095_v61, 0.0 }
 0x44f   : > { %v2757_v7 = vmul.f32 %v2756_v44, %v2093_v43  ;;  %v2765_v50 = vmul.f32 %v3896_v32, %v2764_v59 }
 0x450   : > { %v3183_v48 = vadd.f32 %v6093_v28, %v3117_v31 }
 0x451   : > { %v2759_v35 = vsel %vm2758_vm13, %v2093_v43, %v2757_v7  ;;  %v2766_v17 = vmul.f32 0.5, %v2765_v50 }
 0x452   : > { %v2762_v21 = vsel %vm2760_vm14, %v2761_v13, %v2759_v35  ;;  %v3898_v20 = vpop.eup %3897  ;;  %3247 = vst [vmem:[%s5021_s29 + $0x1a0] sm:$0xff] %v3183_v48 }
 0x453   : > { %v2925_v45 = vadd.f32 0.001, %v2762_v21  ;;  %v3052_v18 = vmul.f32 %v3898_v20, %v5858_v41  ;;  %v3900_v53 = vpop.eup %3899  ;;  %v2767_v1 = vsub.f32 1.5, %v2766_v17  ;;  %v2026_v56 = vpop.xlane.xlu1 %2025 }
 0x454   : > { %v2776_v55 = vmul.f32 %v3900_v53, %v2095_v61  ;;  %v2096_v60 = vmul.f32 0.007874016, %v2026_v56 }
 0x455   : > { %3901 = vrcp.f32 %v2925_v45  ;;  %v3118_v29 = vmul.f32 %v6088_v11, %v3052_v18  ;;  %v2768_v8 = vmul.f32 %v3896_v32, %v2767_v1 }
 0x456   : > { %v2777_v51 = vmul.f32 %v3900_v53, %v2776_v55  ;;  %3903 = vrsqrt.f32 %v2096_v60  ;;  %vm2794_vm3 = vcmp.eq.f32.partialorder %v2096_v60, inf  ;;  %v2797_v13 = vand.u32 2147483648, %v2096_v60 }
 0x457   : > { %v3184_v43 = vadd.f32 %v6093_v28, %v3118_v29  ;;  %v2769_v27 = vmul.f32 %v2768_v8, %v2094_v9  ;;  %vm2796_vm4 = vcmp.eq.f32.partialorder %v2096_v60, 0.0 }
 0x458   : > { %v2778_v63 = vmul.f32 0.5, %v2777_v51 }
 0x459   : > { %3248 = vst [vmem:[%s5021_s29 + $0x1a8] sm:$0xff] %v3184_v43  ;;  %v2771_v41 = vsel %vm2770_vm15, %v2094_v9, %v2769_v27  ;;  %v2028_v47 = vpop.xlane.xlu2 %2027 }
 0x45a   : > { %v2774_v39 = vsel %vm2772_vm0, %v2773_v14, %v2771_v41  ;;  %v2779_v58 = vsub.f32 1.5, %v2778_v63  ;;  %v6130_v46 = vmul.f32 0.007874016, %v2028_v47 }
 0x45b   : > { %v3902_v26 = vpop.eup %3901  ;;  %v2926_v49 = vadd.f32 0.001, %v2774_v39 }
 0x45c   : > { %v3053_v40 = vmul.f32 %v3902_v26, %v5877_v42  ;;  %v3904_v10 = vpop.eup %3903  ;;  %v2780_v34 = vmul.f32 %v3900_v53, %v2779_v58  ;;  %v2785_v42 = vand.u32 2147483648, %v2095_v61  ;;  %vm2806_vm5 = vcmp.eq.f32.partialorder %v6130_v46, inf }
 0x45d   : > { %3905 = vrcp.f32 %v2926_v49  ;;  %v2788_v23 = vmul.f32 %v3904_v10, %v2096_v60  ;;  %vm2808_vm6 = vcmp.eq.f32.partialorder %v6130_v46, 0.0 }
 0x45e   : > { %v3119_v16 = vmul.f32 %v6088_v11, %v3053_v40  ;;  %v2781_v52 = vmul.f32 %v2780_v34, %v2095_v61  ;;  %3907 = vrsqrt.f32 %v6130_v46 }
 0x45f   : > { %v2789_v9 = vmul.f32 %v3904_v10, %v2788_v23 }
 0x460   : > { %v3185_v30 = vadd.f32 %v6093_v28, %v3119_v16  ;;  %v2783_v22 = vsel %vm2782_vm1, %v2095_v61, %v2781_v52 }
 0x461   : > { %v2786_v33 = vsel %vm2784_vm2, %v2785_v42, %v2783_v22  ;;  %v2790_v38 = vmul.f32 0.5, %v2789_v9  ;;  %v2030_v36 = vpop.xlane.xlu0 %2029 }
 0x462   : > { %3249 = vst [vmem:[%s5021_s29 + $0x1b0] sm:$0xff] %v3185_v30  ;;  %v2927_v3 = vadd.f32 0.001, %v2786_v33  ;;  %v6137_v6 = vmul.f32 0.007874016, %v2030_v36 }
 0x463   : > { %v3906_v2 = vpop.eup %3905  ;;  %v2791_v4 = vsub.f32 1.5, %v2790_v38 }
 0x464   : > { %v3908_v25 = vpop.eup %3907  ;;  %v3054_v37 = vmul.f32 %v3906_v2, %v5901_v5  ;;  %3909 = vrcp.f32 %v2927_v3  ;;  %vm2818_vm7 = vcmp.eq.f32.partialorder %v6137_v6, inf  ;;  %vm2820_vm8 = vcmp.eq.f32.partialorder %v6137_v6, 0.0 }
 0x465   : > { %v2792_v44 = vmul.f32 %v3904_v10, %v2791_v4  ;;  %v2800_v32 = vmul.f32 %v3908_v25, %v6130_v46  ;;  %3911 = vrsqrt.f32 %v6137_v6 }
 0x466   : > { %v3120_v31 = vmul.f32 %v6088_v11, %v3054_v37 }
 0x467   : > { %v2793_v61 = vmul.f32 %v2792_v44, %v2096_v60  ;;  %v2801_v7 = vmul.f32 %v3908_v25, %v2800_v32 }
 0x468   : > { %v3186_v59 = vadd.f32 %v6093_v28, %v3120_v31 }
 0x469   : > { %v2795_v48 = vsel %vm2794_vm3, %v2096_v60, %v2793_v61  ;;  %v2802_v5 = vmul.f32 0.5, %v2801_v7 }
 0x46a   : > { %v2032_v35 = vpop.xlane.xlu1 %2031  ;;  %v3910_v50 = vpop.eup %3909  ;;  %3250 = vst [vmem:[%s5021_s29 + $0x1b8] sm:$0xff] %v3186_v59  ;;  %v2798_v21 = vsel %vm2796_vm4, %v2797_v13, %v2795_v48 }
 0x46b   : > { %v6144_v20 = vmul.f32 0.007874016, %v2032_v35  ;;  %v3055_v45 = vmul.f32 %v3910_v50, %v5915_v24  ;;  %v2928_v17 = vadd.f32 0.001, %v2798_v21  ;;  %v2803_v18 = vsub.f32 1.5, %v2802_v5  ;;  %v3912_v53 = vpop.eup %3911 }
 0x46c   : > { %v2812_v29 = vmul.f32 %v3912_v53, %v6137_v6  ;;  %v2809_v24 = vand.u32 2147483648, %v6130_v46 }
 0x46d   : > { %3913 = vrsqrt.f32 %v6144_v20  ;;  %v3121_v1 = vmul.f32 %v6088_v11, %v3055_v45  ;;  %v2804_v56 = vmul.f32 %v3908_v25, %v2803_v18  ;;  %vm2830_vm9 = vcmp.eq.f32.partialorder %v6144_v20, inf }
 0x46e   : > { %3915 = vrcp.f32 %v2928_v17  ;;  %v2813_v8 = vmul.f32 %v3912_v53, %v2812_v29  ;;  %v2833_v32 = vand.u32 2147483648, %v6144_v20  ;;  %vm2832_vm10 = vcmp.eq.f32.partialorder %v6144_v20, 0.0 }
 0x46f   : > { %v3187_v55 = vadd.f32 %v6093_v28, %v3121_v1  ;;  %v2805_v60 = vmul.f32 %v2804_v56, %v6130_v46 }
 0x470   : > { %v2814_v51 = vmul.f32 0.5, %v2813_v8 }
 0x471   : > { %3251 = vst [vmem:[%s5021_s29 + $0x1c0] sm:$0xff] %v3187_v55  ;;  %v2807_v43 = vsel %vm2806_vm5, %v6130_v46, %v2805_v60  ;;  %v2034_v63 = vpop.xlane.xlu2 %2033 }
 0x472   : > { %v2810_v14 = vsel %vm2808_vm6, %v2809_v24, %v2807_v43  ;;  %v2815_v40 = vsub.f32 1.5, %v2814_v51  ;;  %v6158_v58 = vmul.f32 0.007874016, %v2034_v63 }
 0x473   : > { %v3914_v27 = vpop.eup %3913  ;;  %v2929_v41 = vadd.f32 0.001, %v2810_v14 }
 0x474   : > { %v3916_v26 = vpop.eup %3915  ;;  %v2824_v39 = vmul.f32 %v3914_v27, %v6144_v20  ;;  %v2816_v49 = vmul.f32 %v3912_v53, %v2815_v40  ;;  %v2036_v16 = vpop.xlane.xlu0 %2035  ;;  %vm2842_vm11 = vcmp.eq.f32.partialorder %v6158_v58, inf  ;;  %v2845_v60 = vand.u32 2147483648, %v6158_v58 }
 0x475   : > { %v3056_v47 = vmul.f32 %v3916_v26, %v5937_v0  ;;  %3917 = vrcp.f32 %v2929_v41  ;;  %v6164_v30 = vmul.f32 0.007874016, %v2036_v16  ;;  %v2821_v0 = vand.u32 2147483648, %v6137_v6 }
 0x476   : > { %v2825_v10 = vmul.f32 %v3914_v27, %v2824_v39  ;;  %3919 = vrsqrt.f32 %v6158_v58  ;;  %v2817_v34 = vmul.f32 %v2816_v49, %v6137_v6  ;;  %vm2844_vm12 = vcmp.eq.f32.partialorder %v6158_v58, 0.0 }
 0x477   : > { %v3122_v46 = vmul.f32 %v6088_v11, %v3056_v47  ;;  %3921 = vrsqrt.f32 %v6164_v30  ;;  %vm2854_vm13 = vcmp.eq.f32.partialorder %v6164_v30, inf  ;;  %v2857_v41 = vand.u32 2147483648, %v6164_v30 }
 0x478   : > { %v2826_v23 = vmul.f32 0.5, %v2825_v10  ;;  %v2819_v42 = vsel %vm2818_vm7, %v6137_v6, %v2817_v34  ;;  %vm2856_vm14 = vcmp.eq.f32.partialorder %v6164_v30, 0.0 }
 0x479   : > { %v3188_v52 = vadd.f32 %v6093_v28, %v3122_v46  ;;  %v2822_v22 = vsel %vm2820_vm8, %v2821_v0, %v2819_v42 }
 0x47a   : > { %v2827_v9 = vsub.f32 1.5, %v2826_v23  ;;  %v2930_v38 = vadd.f32 0.001, %v2822_v22 }
 0x47b   : > { %3252 = vst [vmem:[%s5021_s29 + $0x1c8] sm:$0xff] %v3188_v52  ;;  %v3918_v33 = vpop.eup %3917 }
 0x47c   : > { %v2828_v3 = vmul.f32 %v3914_v27, %v2827_v9  ;;  %v3920_v2 = vpop.eup %3919  ;;  %v3057_v4 = vmul.f32 %v3918_v33, %v5953_v12  ;;  %v2038_v36 = vpop.xlane.xlu1 %2037  ;;  %3923 = vrcp.f32 %v2930_v38 }
 0x47d   : > { %v2836_v37 = vmul.f32 %v3920_v2, %v6158_v58  ;;  %v2102_v44 = vmul.f32 0.007874016, %v2038_v36  ;;  %v3922_v31 = vpop.eup %3921 }
 0x47e   : > { %v2829_v25 = vmul.f32 %v2828_v3, %v6144_v20  ;;  %v3123_v6 = vmul.f32 %v6088_v11, %v3057_v4  ;;  %v2848_v13 = vmul.f32 %v3922_v31, %v6164_v30 }
 0x47f   : > { %v2837_v12 = vmul.f32 %v3920_v2, %v2836_v37  ;;  %3925 = vrsqrt.f32 %v2102_v44  ;;  %vm2866_vm15 = vcmp.eq.f32.partialorder %v2102_v44, inf  ;;  %v2869_v46 = vand.u32 2147483648, %v2102_v44 }
 0x480   : > { %v2831_v61 = vsel %vm2830_vm9, %v6144_v20, %v2829_v25  ;;  %v3189_v7 = vadd.f32 %v6093_v28, %v3123_v6  ;;  %v2849_v35 = vmul.f32 %v3922_v31, %v2848_v13  ;;  %vm2868_vm0 = vcmp.eq.f32.partialorder %v2102_v44, 0.0 }
 0x481   : > { %v2834_v59 = vsel %vm2832_vm10, %v2833_v32, %v2831_v61  ;;  %v2838_v5 = vmul.f32 0.5, %v2837_v12 }
 0x482   : > { %v2931_v48 = vadd.f32 0.001, %v2834_v59  ;;  %3253 = vst [vmem:[%s5021_s29 + $0x1d0] sm:$0xff] %v3189_v7  ;;  %v3924_v50 = vpop.eup %3923  ;;  %v2850_v17 = vmul.f32 0.5, %v2849_v35 }
 0x483   : > { %v2839_v21 = vsub.f32 1.5, %v2838_v5  ;;  %v3058_v45 = vmul.f32 %v3924_v50, %v5974_v54 }
 0x484   : > { %3927 = vrcp.f32 %v2931_v48  ;;  %v2851_v1 = vsub.f32 1.5, %v2850_v17 }
 0x485   : > { %v3926_v18 = vpop.eup %3925  ;;  %v2840_v20 = vmul.f32 %v3920_v2, %v2839_v21  ;;  %v3124_v53 = vmul.f32 %v6088_v11, %v3058_v45 }
 0x486   : > { %v2860_v56 = vmul.f32 %v3926_v18, %v2102_v44  ;;  %v2852_v8 = vmul.f32 %v3922_v31, %v2851_v1 }
 0x487   : > { %v2841_v29 = vmul.f32 %v2840_v20, %v6158_v58  ;;  %v3190_v55 = vadd.f32 %v6093_v28, %v3124_v53 }
 0x488   : > { %v2861_v24 = vmul.f32 %v3926_v18, %v2860_v56  ;;  %v2853_v14 = vmul.f32 %v2852_v8, %v6164_v30 }
 0x489   : > { %v2843_v54 = vsel %vm2842_vm11, %v6158_v58, %v2841_v29  ;;  %3254 = vst [vmem:[%s5021_s29 + $0x1d8] sm:$0xff] %v3190_v55 }
 0x48a   : > { %v3928_v43 = vpop.eup %3927  ;;  %v2846_v27 = vsel %vm2844_vm12, %v2845_v60, %v2843_v54  ;;  %v2862_v63 = vmul.f32 0.5, %v2861_v24  ;;  %v2855_v39 = vsel %vm2854_vm13, %v6164_v30, %v2853_v14 }
 0x48b   : > { %v3059_v51 = vmul.f32 %v3928_v43, %v5990_v19  ;;  %v2932_v26 = vadd.f32 0.001, %v2846_v27  ;;  %v2858_v47 = vsel %vm2856_vm14, %v2857_v41, %v2855_v39 }
 0x48c   : > { %v2863_v58 = vsub.f32 1.5, %v2862_v63  ;;  %v2933_v49 = vadd.f32 0.001, %v2858_v47 }
 0x48d   : > { %v3125_v40 = vmul.f32 %v6088_v11, %v3059_v51  ;;  %3929 = vrcp.f32 %v2932_v26 }
 0x48e   : > { %v2864_v10 = vmul.f32 %v3926_v18, %v2863_v58  ;;  %3931 = vrcp.f32 %v2933_v49 }
 0x48f   : > { %v3191_v19 = vadd.f32 %v6093_v28, %v3125_v40 }
 0x490   : > { %v2865_v16 = vmul.f32 %v2864_v10, %v2102_v44 }
 0x491   : > { %3255 = vst [vmem:[%s5021_s29 + $0x1e0] sm:$0xff] %v3191_v19 }
 0x492   : > { %v2867_v34 = vsel %vm2866_vm15, %v2102_v44, %v2865_v16 }
 0x493   : > { %v3930_v23 = vpop.eup %3929  ;;  %v2870_v52 = vsel %vm2868_vm0, %v2869_v46, %v2867_v34 }
 0x494   : > { %v3060_v30 = vmul.f32 %v3930_v23, %v6008_v15  ;;  %v2934_v0 = vadd.f32 0.001, %v2870_v52  ;;  %v3932_v42 = vpop.eup %3931 }
 0x495   : > { %v3061_v22 = vmul.f32 %v3932_v42, %v6020_v62 }
 0x496   : > { %v3126_v9 = vmul.f32 %v6088_v11, %v3060_v30  ;;  %3933 = vrcp.f32 %v2934_v0 }
 0x497   : > { %v3127_v38 = vmul.f32 %v6088_v11, %v3061_v22 }
 0x498   : > { %v3192_v33 = vadd.f32 %v6093_v28, %v3126_v9 }
 0x499   : > { %v3193_v3 = vadd.f32 %v6093_v28, %v3127_v38 }
 0x49a   : > { %3256 = vst [vmem:[%s5021_s29 + $0x1e8] sm:$0xff] %v3192_v33 }
 0x49b   : > { %3257 = vst [vmem:[%s5021_s29 + $0x1f0] sm:$0xff] %v3193_v3 }
 0x49c   : > { %v3934_v2 = vpop.eup %3933 }
 0x49d   : > { %v3062_v4 = vmul.f32 %v3934_v2, %v6032_v57 }
 0x49f   : > { %v3128_v15 = vmul.f32 %v6088_v11, %v3062_v4  ;;  %3266 = sbr.rel (!%p4334_p11) target bundleno = 1219 (0x4c3), region = 64 }
 0x4a1   : > { %v3194_v36 = vadd.f32 %v6093_v28, %v3128_v15 }
 0x4a3   : > { %3258 = vst [vmem:[%s5021_s29 + $0x1f8] sm:$0xff] %v3194_v36 }
 0x4a4   : > { %s6333_s17 = smov (!%p3269_p6, %s3268_s17), 64 }
 0x4a5   : > { %s3544_s28 = sshll.u32 %s6333_s17, 3 }
 0x4a6   : > { %s3272_s11 = ssub.s32 512, %s3544_s28 }
 0x4a7   : > { %s3273_s14 = sshll.u32 %s3272_s11, 4 }
 0x4a8   : > { %3274 = vsyncadd %s3260_s7, %s3273_s14  ;;  %p6223_p5 = scmp.ne.s32.totalorder %s3544_s28, 0  ;;  %s3584_s15 = sshll.u32 %s4303_s22, 9 }
 0x4a9   : > { %s3277_s16 = scalar_lea.hbm %s6282_s5, %s3584_s15  ;;  %s3279_s23 = sshll.u32 %s5021_s29, 4  ;;  %s6232_s23 = int_to_ptr.vmem [resolvable:$true] %s3279_s23 }
 0x4aa   : > { %s3281_s25 = sshll.u32 %s3277_s16, 4  ;;  %s3548_s26 = sshll.u32 %s6333_s17, 7  ;;  %s6234_s25 = int_to_ptr.hbm [resolvable:$true] %s3281_s25 }
 0x4ab   : > { %s4150_s8 = sshra.s32 %s6232_s23, 4  ;;  %s4152_s9 = sshrl.u32 %s3548_s26, 4  ;;  %s4151_s8 = int_to_ptr.vmem [resolvable:$true] %s4150_s8 }
 0x4ac   : > { %s4157_s10 = scalar_lea.vmem %s4151_s8, %s4152_s9  ;;  %s4249_s22 = smov [#allocation11]  }
 0x4ad   : > { %p4158_p11 = scmp.ne.s32.totalorder %s4151_s8, %s4157_s10  ;;  %s4161_s1 = scalar_lea.vmem %s4249_s22, 1024 }
 0x4ae   : > { %p4163_p1 = scmp.lt.s32.totalorder %s4161_s1, %s4157_s10 }
 0x4af   : > { %p4159_p9 = pnand %p4158_p11, %p6223_p5 }
 0x4b1   : > { %p4160_p10 = pneg %p4159_p9 }
 0x4b3   : > { %p4165_p0 = pnand %p4163_p1, %p4160_p10 }
 0x4b5   : > { %4168 = shalt.err (!%p4165_p0)
}
 0x4b6   : > { %s4169_s3 = sshra.s32 %s6234_s25, 4  ;;  %s4180_s28 = scalar_lea.hbm %s6282_s5, 600  ;;  %s4170_s3 = int_to_ptr.hbm [resolvable:$true] %s4169_s3 }
 0x4b7   : > { %s4176_s24 = scalar_lea.hbm %s4170_s3, %s4152_s9  ;;  %p4181_p4 = scmp.lt.s32.totalorder %s4170_s3, %s6282_s5 }
 0x4b8   : > { %p4177_p3 = scmp.ne.s32.totalorder %s4170_s3, %s4176_s24  ;;  %p4182_p12 = scmp.lt.s32.totalorder %s4180_s28, %s4176_s24 }
 0x4ba   : > { %p4178_p7 = pnand %p4177_p3, %p6223_p5  ;;  %p4183_p13 = por %p4182_p12, %p4181_p4 }
 0x4bc   : > { %p4179_p8 = pneg %p4178_p7 }
 0x4be   : > { %p4184_p2 = pnand %p4183_p13, %p4179_p8 }
 0x4c0   : > { %4187 = shalt.err (!%p4184_p2)
}
 0x4c1   : > { %s4250_s15 = smov 128   ;;  %s4251_s13 = smov 8  }
 0x4c2   : > { %3287 = dma.vmem_to_hbm [thread:$0]  (%p6223_p5), %s6232_s23, %s3548_s26, %s6234_s25, %s3260_s7, %s4250_s15, %s4250_s15, %s4251_s13  }
 0x4c3 PF: > { %s6322_s6 = sld [smem:[#allocation18_spill]]  ;;  %s3296_s16 = sand.u32 1, %s4223_s18  }
 0x4c4   : > { %p6324_p11 = scmp.ge.s32.totalorder %s4235_s21, 2  ;;  %s3297_s8 = scalar_lea.sflag [#allocation4], %s3296_s16 }
 0x4c9   : > { %p6323_p6 = scmp.ne.s32.totalorder %s6322_s6, 0 }
 0x4cb   : > { %p3617_p9 = pnand %p6324_p11, %p6323_p6 }
 0x4cd   : > { %p3618_p10 = pneg %p3617_p9 }
 0x4cf   : > { %4218 = dma.done.wait (%p3618_p10), %s3297_s8, 8192  }
 0x4d0   : > { %4220 = vsyncadd (%p3618_p10), %s3297_s8, 4294959104  ;;  %s6325_s21 = sld [smem:[#allocation16_spill]]  ;;  %s6327_s18 = smov %s4227_s19 }
 0x4d1   : > { %s6326_s30 = sld [smem:[#allocation17_spill]]  ;;  %s6328_s19 = smov %s4231_s20 }
 0x4d6   : > { %p20_p1 = scmp.ge.s32.totalorder %s6325_s21, 4  }
 0x4d7   : > { %s6329_s20 = smov %s6326_s30 }
 0x4d8   :  { %22 = sbr.rel (!%p20_p1) target bundleno = 10 (0xa), region = 101 }
 0x4dd   :  { %3303 = vsyncpa [#allocation3], 1 }
 0x4de   :  { %3305 = vsyncpa [#allocation3 + $0x1], 1 }
 0x4df   :  { %3306 = vsyncpa [#allocation6], 1 }
 0x4e0   :  { %3307 = vsyncpa [#allocation9], 1 }
 0x4e1   :  { %3308 = vsyncpa [#allocation4], 1 }
 0x4e2   :  { %3310 = vsyncpa [#allocation4 + $0x1], 1 }

</bundles_post_ra>
